<compile_context>
chip_gen: v6e
topology: v6e:2x2x1
jax: 0.10.0
libtpu: 0.0.40
codegen_flags: <defaults>
</compile_context>

<pallas_src>
import jax
import jax.numpy as jnp
from jax import lax
from jax.experimental import pallas as pl
from jax.experimental.pallas import tpu as pltpu

_VMEM_LIMIT_BYTES = 48 * 1024 * 1024   # raised scoped VMEM; still < v7x's 64 MiB physical
_VMEM_BUDGET_BYTES = 32 * 1024 * 1024  # working-set cap used when picking the row tile height


def _conv3x3_ps2_kernel(x_ref, w_ref, o_ref, slabs_ref, patch_ref):
    """One (batch, row-tile) grid step of fused 3x3 same-conv (no bias) + PixelShuffle(2).

    x_ref     : (1, Cin, H*W)               flat input image (VMEM-resident across row tiles)
    w_ref     : (Cout, 9*Cin)               im2col weights, column = (dy*3 + dx)*Cin + cin
    o_ref     : (1, C_ps, 2*TH, 2*W)        NCHW output rows for this tile (rows on sublanes)
    slabs_ref : (n_tiles, Cin, (TH+2)*W+2)  per-tile flat padded slabs (built once at t == 0)
    patch_ref : (9*Cin, TH*W)               im2col patch scratch (single MXU push per tile)
    """
    n_tiles, Cin, slab_len = slabs_ref.shape
    C_ps = o_ref.shape[1]
    TH = o_ref.shape[2] // 2
    W = o_ref.shape[3] // 2
    THW = TH * W
    cdt = slabs_ref.dtype

    t = pl.program_id(1)

    # Build every row tile's padded slab once per batch element. Each slab holds the tile's rows
    # plus the +-1 row halo, flat over lanes, with a 1-lane lead so all 9 tap offsets are >= 0.
    # Only the tiny halo strips are zero-filled; the interior is a dense copy (review item).
    @pl.when(t == 0)
    def _build_slabs():
        zcol = jnp.zeros((Cin, 1), cdt)
        zrow = jnp.zeros((Cin, W), cdt)
        for tt in range(n_tiles):                       # static unroll; runs once per image
            r0 = tt * TH
            head = zrow if tt == 0 else x_ref[0, :, (r0 - 1) * W:r0 * W].astype(cdt)
            tail = (zrow if tt == n_tiles - 1
                    else x_ref[0, :, (r0 + TH) * W:(r0 + TH + 1) * W].astype(cdt))
            slabs_ref[tt, :, 0:1] = zcol
            slabs_ref[tt, :, 1:1 + W] = head
            slabs_ref[tt, :, 1 + W:1 + W + THW] = x_ref[0, :, r0 * W:(r0 + TH) * W].astype(cdt)
            slabs_ref[tt, :, 1 + W + THW:1 + 2 * W + THW] = tail
            slabs_ref[tt, :, 1 + 2 * W + THW:] = zcol

    slab = slabs_ref[t]                                  # (Cin, slab_len)

    # Width-edge handling folded into two pre-masked slab copies (2 selects total):
    #   dx == 0 taps are invalid exactly where slab-lane % W == 0 (output column w == 0),
    #   dx == 2 taps are invalid exactly where slab-lane % W == 1 (output column w == W-1).
    lane = lax.broadcasted_iota(jnp.int32, (1, slab_len), 1)
    zero = jnp.zeros_like(slab)
    slab_by_dx = (jnp.where(lane % W == 0, zero, slab),  # used by dx == 0 taps
                  slab,                                   # dx == 1 taps (always valid)
                  jnp.where(lane % W == 1, zero, slab))   # used by dx == 2 taps

    # Taps are static lane-offset slices of the flat slab (cheap shifts, no reshape/concat),
    # written straight into the im2col scratch (review: patch scratch, bounded live ranges).
    for dy in range(3):
        for dx in range(3):
            k = dy * 3 + dx
            s = dy * W + dx
            patch_ref[k * Cin:(k + 1) * Cin, :] = slab_by_dx[dx][:, s:s + THW]

    # Single MXU push: (Cout, 9*Cin) @ (9*Cin, TH*W), f32 accumulation.
    conv = jnp.dot(w_ref[...], patch_ref[...], preferred_element_type=jnp.float32)

    # Fused PixelShuffle(2): out[c, 2h+i, 2w+j] = conv[4c+2i+j, h*W + w]. Rows land on the
    # sublane axis of the 4-D NCHW output block (sublane-dense even when C_ps < 8).
    y = conv.reshape(C_ps, 2, 2, TH, W)                   # (c, i, j, h, w)
    y = jnp.transpose(y, (0, 3, 1, 4, 2))                 # (c, h, i, w, j)
    o_ref[...] = y.reshape(1, C_ps, 2 * TH, 2 * W).astype(o_ref.dtype)


def _pick_tile_h(H, W, Cin, Cout, in_bytes, cdt_bytes, out_bytes):
    """Largest row-tile TH that divides H, keeps the output block's sublane dim 8-aligned
    (2*TH % 8 == 0 or TH == H), and fits the estimated VMEM working set (incl. double buffers)."""
    C_ps = Cout // 4

    def vmem_need(th):
        n_t = H // th
        slab_len = (th + 2) * W + 2
        x_blk = 2 * Cin * H * W * in_bytes                 # double-buffered resident input image
        slabs = n_t * Cin * slab_len * cdt_bytes           # per-tile padded slabs
        patch = 9 * Cin * th * W * cdt_bytes               # im2col scratch
        o_blk = 2 * C_ps * (2 * th) * (2 * W) * out_bytes  # double-buffered output block
        wgt = 2 * Cout * 9 * Cin * cdt_bytes
        return x_blk + slabs + patch + o_blk + wgt

    cands = [th for th in range(H, 0, -1) if H % th == 0 and (th == H or th % 4 == 0)]
    fits = [th for th in cands if vmem_need(th) <= _VMEM_BUDGET_BYTES]
    return max(fits) if fits else cands[-1]


def pruned_upsample(x_nchw, weight_oihw, *, compute_dtype=None):
    """Matches PrunedUpsample.forward (PyTorch NCHW semantics).

    x_nchw:      (N, Cin, H, W) float32
    weight_oihw: (Cout, Cin, 3, 3), Cout % 4 == 0
    returns      (N, Cout//4, 2H, 2W)
    compute_dtype: optionally jnp.bfloat16 on v6e/v7x (full-rate MXU, halved VMEM) if the
                   accuracy budget allows; default keeps the input dtype (float32 here).
    """
    N, Cin, H, W = x_nchw.shape
    Cout, Cin_w, kh, kw = weight_oihw.shape
    assert (kh, kw) == (3, 3) and Cin_w == Cin
    assert Cout % 4 == 0, "PixelShuffle(2) requires out_channels % 4 == 0"
    C_ps = Cout // 4

    cdt = jnp.dtype(compute_dtype) if compute_dtype is not None else x_nchw.dtype
    TH = _pick_tile_h(H, W, Cin, Cout,
                      x_nchw.dtype.itemsize, cdt.itemsize, x_nchw.dtype.itemsize)
    n_tiles = H // TH

    # (N, Cin, H, W) -> (N, Cin, H*W): contiguous collapse, free (no extra HBM pass).
    x_flat = x_nchw.reshape(N, Cin, H * W)
    # (Cout, Cin, 3, 3) -> (Cout, (dy*3+dx)*Cin + cin): matches the patch row order. Tiny tensor.
    w2 = jnp.transpose(weight_oihw, (0, 2, 3, 1)).reshape(Cout, 9 * Cin).astype(cdt)

    return pl.pallas_call(
        _conv3x3_ps2_kernel,
        out_shape=jax.ShapeDtypeStruct((N, C_ps, 2 * H, 2 * W), x_nchw.dtype),
        grid_spec=pltpu.PrefetchScalarGridSpec(
            num_scalar_prefetch=0,
            grid=(N, n_tiles),
            in_specs=[
                # Whole (flat) image per batch element; index_map ignores t so the block stays
                # VMEM-resident across row tiles (each image read from HBM exactly once).
                pl.BlockSpec((1, Cin, H * W), lambda n, t: (n, 0, 0)),
                pl.BlockSpec((Cout, 9 * Cin), lambda n, t: (0, 0)),
            ],
            # 4-D NCHW output block: sublane axis = 2*TH output rows (8-aligned), lane axis = 2*W.
            out_specs=pl.BlockSpec((1, C_ps, 2 * TH, 2 * W), lambda n, t: (n, 0, t, 0)),
            scratch_shapes=[
                pltpu.VMEM((n_tiles, Cin, (TH + 2) * W + 2), cdt),   # per-tile padded slabs
                pltpu.VMEM((9 * Cin, TH * W), cdt),                  # im2col patch
            ],
        ),
        compiler_params=pltpu.CompilerParams(
            # Batch axis may be split across TensorCores; the row-tile axis must stay sequential
            # because the padded slabs are built at t == 0 and reused for t > 0 of the same image.
            dimension_semantics=("parallel", "arbitrary"),
            vmem_limit_bytes=_VMEM_LIMIT_BYTES,
        ),
    )(x_flat, w2)


def _reference(x_nchw, weight_oihw):
    """Pure-JAX reference (lax conv + pixel shuffle) for the correctness check."""
    conv = lax.conv_general_dilated(
        x_nchw, weight_oihw,
        window_strides=(1, 1), padding=((1, 1), (1, 1)),
        dimension_numbers=("NCHW", "OIHW", "NCHW"),
    )
    N, Cout, H, W = conv.shape
    C = Cout // 4
    y = conv.reshape(N, C, 2, 2, H, W)
    y = jnp.transpose(y, (0, 1, 4, 2, 5, 3))
    return y.reshape(N, C, 2 * H, 2 * W)


if __name__ == "__main__":
    in_channels, out_channels = 4, 8        # out_channels divisible by 4
    N, H, W = 2, 16, 16

    key = jax.random.PRNGKey(0)
    kx, kw = jax.random.split(key)
    x = jax.random.normal(kx, (N, in_channels, H, W), dtype=jnp.float32)
    # Deterministic conv weight (Kaiming-uniform-like scale), shape (Cout, Cin, 3, 3).
    bound = 1.0 / (in_channels * 9) ** 0.5
    weight = jax.random.uniform(
        kw, (out_channels, in_channels, 3, 3),
        minval=-bound, maxval=bound, dtype=jnp.float32,
    )

    out = jax.block_until_ready(pruned_upsample(x, weight))
    ref = jax.block_until_ready(_reference(x, weight))

    assert out.shape == (N, out_channels // 4, 2 * H, 2 * W), out.shape
    assert jnp.allclose(out, ref, atol=1e-5, rtol=1e-5), "mismatch vs reference"

    print("KERNEL_OK")
</pallas_src>

<mosaic_0001>
module attributes {stable_mosaic.version = 11 : i64} {
  func.func @_conv3x3_ps2_kernel(%arg0: i32, %arg1: i32, %arg2: memref<1x4x256xf32, #tpu.memory_space<vmem>>, %arg3: memref<8x36xf32, #tpu.memory_space<vmem>>, %arg4: memref<1x2x32x32xf32, #tpu.memory_space<vmem>>, %arg5: memref<1x4x290xf32, #tpu.memory_space<vmem>>, %arg6: memref<36x256xf32, #tpu.memory_space<vmem>>) attributes {dimension_semantics = [#tpu.dimension_semantics<parallel>, #tpu.dimension_semantics<arbitrary>], iteration_bounds = array<i64: 2, 1>, scalar_prefetch = 0 : i64, scratch_operands = 2 : i64, tpu.core_type = #tpu.core_type<tc>, window_params = [{transform_indices = @transform_0, window_bounds = array<i64: 1, 4, 256>}, {pipeline_mode = #tpu.pipeline_mode<synchronous>, transform_indices = @transform_1, window_bounds = array<i64: 8, 36>}, {transform_indices = @transform_2, window_bounds = array<i64: 1, 2, 32, 32>}]} {
    %c0_i32 = arith.constant 0 : i32
    %0 = arith.cmpi eq, %arg1, %c0_i32 : i32
    %1 = arith.extui %0 : i1 to i32
    %c0_i32_0 = arith.constant 0 : i32
    %2 = arith.cmpi ne, %1, %c0_i32_0 : i32
    scf.if %2 {
      %cst_33 = arith.constant 0.000000e+00 : f32
      %75 = vector.broadcast %cst_33 : f32 to vector<4x1xf32>
      %cst_34 = arith.constant 0.000000e+00 : f32
      %76 = vector.broadcast %cst_34 : f32 to vector<4x16xf32>
      %c0_35 = arith.constant 0 : index
      %c0_36 = arith.constant 0 : index
      %c0_37 = arith.constant 0 : index
      %77 = vector.load %arg5[%c0_35, %c0_36, %c0_37] : memref<1x4x290xf32, #tpu.memory_space<vmem>>, vector<1x4x1xf32>
      %78 = vector.shape_cast %77 : vector<1x4x1xf32> to vector<4x1xf32>
      %79 = vector.shape_cast %75 : vector<4x1xf32> to vector<1x4x1xf32>
      tpu.vector_store %arg5[%c0_35, %c0_36, %c0_37], %79 {strides = array<i32>} : memref<1x4x290xf32, #tpu.memory_space<vmem>>, vector<1x4x1xf32>,
      %c0_38 = arith.constant 0 : index
      %c0_39 = arith.constant 0 : index
      %c1 = arith.constant 1 : index
      %80 = vector.load %arg5[%c0_38, %c0_39, %c1] : memref<1x4x290xf32, #tpu.memory_space<vmem>>, vector<1x4x16xf32>
      %81 = vector.shape_cast %80 : vector<1x4x16xf32> to vector<4x16xf32>
      %82 = vector.shape_cast %76 : vector<4x16xf32> to vector<1x4x16xf32>
      tpu.vector_store %arg5[%c0_38, %c0_39, %c1], %82 {strides = array<i32>} : memref<1x4x290xf32, #tpu.memory_space<vmem>>, vector<1x4x16xf32>,
      %c0_40 = arith.constant 0 : index
      %c0_41 = arith.constant 0 : index
      %c0_42 = arith.constant 0 : index
      %83 = vector.load %arg2[%c0_40, %c0_41, %c0_42] : memref<1x4x256xf32, #tpu.memory_space<vmem>>, vector<1x4x256xf32>
      %84 = vector.shape_cast %83 : vector<1x4x256xf32> to vector<4x256xf32>
      %c0_43 = arith.constant 0 : index
      %c0_44 = arith.constant 0 : index
      %c17 = arith.constant 17 : index
      %85 = vector.load %arg5[%c0_43, %c0_44, %c17] : memref<1x4x290xf32, #tpu.memory_space<vmem>>, vector<1x4x256xf32>
      %86 = vector.shape_cast %85 : vector<1x4x256xf32> to vector<4x256xf32>
      %87 = vector.shape_cast %84 : vector<4x256xf32> to vector<1x4x256xf32>
      tpu.vector_store %arg5[%c0_43, %c0_44, %c17], %87 {strides = array<i32>} : memref<1x4x290xf32, #tpu.memory_space<vmem>>, vector<1x4x256xf32>,
      %c0_45 = arith.constant 0 : index
      %c0_46 = arith.constant 0 : index
      %c273 = arith.constant 273 : index
      %88 = vector.load %arg5[%c0_45, %c0_46, %c273] : memref<1x4x290xf32, #tpu.memory_space<vmem>>, vector<1x4x16xf32>
      %89 = vector.shape_cast %88 : vector<1x4x16xf32> to vector<4x16xf32>
      %90 = vector.shape_cast %76 : vector<4x16xf32> to vector<1x4x16xf32>
      tpu.vector_store %arg5[%c0_45, %c0_46, %c273], %90 {strides = array<i32>} : memref<1x4x290xf32, #tpu.memory_space<vmem>>, vector<1x4x16xf32>,
      %c0_47 = arith.constant 0 : index
      %c0_48 = arith.constant 0 : index
      %c289 = arith.constant 289 : index
      %91 = vector.load %arg5[%c0_47, %c0_48, %c289] : memref<1x4x290xf32, #tpu.memory_space<vmem>>, vector<1x4x1xf32>
      %92 = vector.shape_cast %91 : vector<1x4x1xf32> to vector<4x1xf32>
      %93 = vector.shape_cast %75 : vector<4x1xf32> to vector<1x4x1xf32>
      tpu.vector_store %arg5[%c0_47, %c0_48, %c289], %93 {strides = array<i32>} : memref<1x4x290xf32, #tpu.memory_space<vmem>>, vector<1x4x1xf32>,
    } else {
    }
    %3 = arith.index_cast %arg1 : i32 to index
    %c0 = arith.constant 0 : index
    %c0_1 = arith.constant 0 : index
    %4 = vector.load %arg5[%3, %c0, %c0_1] : memref<1x4x290xf32, #tpu.memory_space<vmem>>, vector<1x4x290xf32>
    %5 = vector.shape_cast %4 : vector<1x4x290xf32> to vector<4x290xf32>
    %6 = tpu.iota {dimensions = array<i32: 1>} : vector<1x290xi32>
    %cst = arith.constant 0.000000e+00 : f32
    %7 = vector.broadcast %cst : f32 to vector<4x290xf32>
    %c16_i32 = arith.constant 16 : i32
    %c0_i32_2 = arith.constant 0 : i32
    %8 = arith.cmpi eq, %c16_i32, %c0_i32_2 : i32
    %c1_i32 = arith.constant 1 : i32
    %9 = arith.select %8, %c1_i32, %c16_i32 : i32
    %10 = vector.broadcast %9 : i32 to vector<1x290xi32>
    %11 = arith.remsi %6, %10 : vector<1x290xi32>
    %c0_i32_3 = arith.constant 0 : i32
    %12 = vector.broadcast %c0_i32_3 : i32 to vector<1x290xi32>
    %13 = arith.cmpi ne, %11, %12 : vector<1x290xi32>
    %c0_i32_4 = arith.constant 0 : i32
    %14 = vector.broadcast %c0_i32_4 : i32 to vector<1x290xi32>
    %15 = arith.cmpi slt, %11, %14 : vector<1x290xi32>
    %c0_i32_5 = arith.constant 0 : i32
    %16 = arith.cmpi slt, %9, %c0_i32_5 : i32
    %17 = vector.broadcast %16 : i1 to vector<1x290xi1>
    %18 = vector.broadcast %17 : vector<1x290xi1> to vector<1x290xi1>
    %19 = arith.xori %15, %18 : vector<1x290xi1>
    %20 = arith.andi %19, %13 : vector<1x290xi1>
    %21 = vector.broadcast %9 : i32 to vector<1x290xi32>
    %22 = arith.addi %11, %21 : vector<1x290xi32>
    %23 = arith.select %20, %22, %11 : vector<1x290xi1>, vector<1x290xi32>
    %c0_i32_6 = arith.constant 0 : i32
    %24 = vector.broadcast %c0_i32_6 : i32 to vector<1x290xi32>
    %25 = arith.cmpi eq, %23, %24 : vector<1x290xi32>
    %26 = vector.shape_cast %25 : vector<1x290xi1> to vector<1x290xi1>
    %27 = vector.broadcast %26 : vector<1x290xi1> to vector<4x290xi1>
    %28 = arith.select %27, %7, %5 : vector<4x290xi1>, vector<4x290xf32>
    %c16_i32_7 = arith.constant 16 : i32
    %c0_i32_8 = arith.constant 0 : i32
    %29 = arith.cmpi eq, %c16_i32_7, %c0_i32_8 : i32
    %c1_i32_9 = arith.constant 1 : i32
    %30 = arith.select %29, %c1_i32_9, %c16_i32_7 : i32
    %31 = vector.broadcast %30 : i32 to vector<1x290xi32>
    %32 = arith.remsi %6, %31 : vector<1x290xi32>
    %c0_i32_10 = arith.constant 0 : i32
    %33 = vector.broadcast %c0_i32_10 : i32 to vector<1x290xi32>
    %34 = arith.cmpi ne, %32, %33 : vector<1x290xi32>
    %c0_i32_11 = arith.constant 0 : i32
    %35 = vector.broadcast %c0_i32_11 : i32 to vector<1x290xi32>
    %36 = arith.cmpi slt, %32, %35 : vector<1x290xi32>
    %c0_i32_12 = arith.constant 0 : i32
    %37 = arith.cmpi slt, %30, %c0_i32_12 : i32
    %38 = vector.broadcast %37 : i1 to vector<1x290xi1>
    %39 = vector.broadcast %38 : vector<1x290xi1> to vector<1x290xi1>
    %40 = arith.xori %36, %39 : vector<1x290xi1>
    %41 = arith.andi %40, %34 : vector<1x290xi1>
    %42 = vector.broadcast %30 : i32 to vector<1x290xi32>
    %43 = arith.addi %32, %42 : vector<1x290xi32>
    %44 = arith.select %41, %43, %32 : vector<1x290xi1>, vector<1x290xi32>
    %c1_i32_13 = arith.constant 1 : i32
    %45 = vector.broadcast %c1_i32_13 : i32 to vector<1x290xi32>
    %46 = arith.cmpi eq, %44, %45 : vector<1x290xi32>
    %47 = vector.shape_cast %46 : vector<1x290xi1> to vector<1x290xi1>
    %48 = vector.broadcast %47 : vector<1x290xi1> to vector<4x290xi1>
    %49 = arith.select %48, %7, %5 : vector<4x290xi1>, vector<4x290xf32>
    %50 = vector.extract_strided_slice %28 {offsets = [0, 0], sizes = [4, 256], strides = [1, 1]} : vector<4x290xf32> to vector<4x256xf32>
    %c0_14 = arith.constant 0 : index
    %c0_15 = arith.constant 0 : index
    %51 = vector.load %arg6[%c0_14, %c0_15] : memref<36x256xf32, #tpu.memory_space<vmem>>, vector<4x256xf32>
    tpu.vector_store %arg6[%c0_14, %c0_15], %50 {strides = array<i32>} : memref<36x256xf32, #tpu.memory_space<vmem>>, vector<4x256xf32>,
    %52 = vector.extract_strided_slice %5 {offsets = [0, 1], sizes = [4, 256], strides = [1, 1]} : vector<4x290xf32> to vector<4x256xf32>
    %c4 = arith.constant 4 : index
    %c0_16 = arith.constant 0 : index
    %53 = vector.load %arg6[%c4, %c0_16] : memref<36x256xf32, #tpu.memory_space<vmem>>, vector<4x256xf32>
    tpu.vector_store %arg6[%c4, %c0_16], %52 {strides = array<i32>} : memref<36x256xf32, #tpu.memory_space<vmem>>, vector<4x256xf32>,
    %54 = vector.extract_strided_slice %49 {offsets = [0, 2], sizes = [4, 256], strides = [1, 1]} : vector<4x290xf32> to vector<4x256xf32>
    %c8 = arith.constant 8 : index
    %c0_17 = arith.constant 0 : index
    %55 = vector.load %arg6[%c8, %c0_17] : memref<36x256xf32, #tpu.memory_space<vmem>>, vector<4x256xf32>
    tpu.vector_store %arg6[%c8, %c0_17], %54 {strides = array<i32>} : memref<36x256xf32, #tpu.memory_space<vmem>>, vector<4x256xf32>,
    %56 = vector.extract_strided_slice %28 {offsets = [0, 16], sizes = [4, 256], strides = [1, 1]} : vector<4x290xf32> to vector<4x256xf32>
    %c12 = arith.constant 12 : index
    %c0_18 = arith.constant 0 : index
    %57 = vector.load %arg6[%c12, %c0_18] : memref<36x256xf32, #tpu.memory_space<vmem>>, vector<4x256xf32>
    tpu.vector_store %arg6[%c12, %c0_18], %56 {strides = array<i32>} : memref<36x256xf32, #tpu.memory_space<vmem>>, vector<4x256xf32>,
    %58 = vector.extract_strided_slice %5 {offsets = [0, 17], sizes = [4, 256], strides = [1, 1]} : vector<4x290xf32> to vector<4x256xf32>
    %c16 = arith.constant 16 : index
    %c0_19 = arith.constant 0 : index
    %59 = vector.load %arg6[%c16, %c0_19] : memref<36x256xf32, #tpu.memory_space<vmem>>, vector<4x256xf32>
    tpu.vector_store %arg6[%c16, %c0_19], %58 {strides = array<i32>} : memref<36x256xf32, #tpu.memory_space<vmem>>, vector<4x256xf32>,
    %60 = vector.extract_strided_slice %49 {offsets = [0, 18], sizes = [4, 256], strides = [1, 1]} : vector<4x290xf32> to vector<4x256xf32>
    %c20 = arith.constant 20 : index
    %c0_20 = arith.constant 0 : index
    %61 = vector.load %arg6[%c20, %c0_20] : memref<36x256xf32, #tpu.memory_space<vmem>>, vector<4x256xf32>
    tpu.vector_store %arg6[%c20, %c0_20], %60 {strides = array<i32>} : memref<36x256xf32, #tpu.memory_space<vmem>>, vector<4x256xf32>,
    %62 = vector.extract_strided_slice %28 {offsets = [0, 32], sizes = [4, 256], strides = [1, 1]} : vector<4x290xf32> to vector<4x256xf32>
    %c24 = arith.constant 24 : index
    %c0_21 = arith.constant 0 : index
    %63 = vector.load %arg6[%c24, %c0_21] : memref<36x256xf32, #tpu.memory_space<vmem>>, vector<4x256xf32>
    tpu.vector_store %arg6[%c24, %c0_21], %62 {strides = array<i32>} : memref<36x256xf32, #tpu.memory_space<vmem>>, vector<4x256xf32>,
    %64 = vector.extract_strided_slice %5 {offsets = [0, 33], sizes = [4, 256], strides = [1, 1]} : vector<4x290xf32> to vector<4x256xf32>
    %c28 = arith.constant 28 : index
    %c0_22 = arith.constant 0 : index
    %65 = vector.load %arg6[%c28, %c0_22] : memref<36x256xf32, #tpu.memory_space<vmem>>, vector<4x256xf32>
    tpu.vector_store %arg6[%c28, %c0_22], %64 {strides = array<i32>} : memref<36x256xf32, #tpu.memory_space<vmem>>, vector<4x256xf32>,
    %66 = vector.extract_strided_slice %49 {offsets = [0, 34], sizes = [4, 256], strides = [1, 1]} : vector<4x290xf32> to vector<4x256xf32>
    %c32 = arith.constant 32 : index
    %c0_23 = arith.constant 0 : index
    %67 = vector.load %arg6[%c32, %c0_23] : memref<36x256xf32, #tpu.memory_space<vmem>>, vector<4x256xf32>
    tpu.vector_store %arg6[%c32, %c0_23], %66 {strides = array<i32>} : memref<36x256xf32, #tpu.memory_space<vmem>>, vector<4x256xf32>,
    %c0_24 = arith.constant 0 : index
    %c0_25 = arith.constant 0 : index
    %68 = vector.load %arg3[%c0_24, %c0_25] : memref<8x36xf32, #tpu.memory_space<vmem>>, vector<8x36xf32>
    %c0_26 = arith.constant 0 : index
    %c0_27 = arith.constant 0 : index
    %69 = vector.load %arg6[%c0_26, %c0_27] : memref<36x256xf32, #tpu.memory_space<vmem>>, vector<36x256xf32>
    %cst_28 = arith.constant dense<0.000000e+00> : vector<8x256xf32>
    %70 = tpu.matmul %68, %69, %cst_28 {dimension_numbers = #tpu.dot_dimension_numbers<[1], [0], [0], [1], [0, 0, 1, 1], [], []>} : vector<8x36xf32>, vector<36x256xf32>, vector<8x256xf32> -> vector<8x256xf32>
    %71 = vector.shape_cast %70 : vector<8x256xf32> to vector<2x2x2x16x16xf32>
    %72 = tpu.transpose %71, [0, 3, 1, 4, 2] : vector<2x2x2x16x16xf32> -> vector<2x16x2x16x2xf32>
    %73 = vector.shape_cast %72 : vector<2x16x2x16x2xf32> to vector<1x2x32x32xf32>
    %c0_29 = arith.constant 0 : index
    %c0_30 = arith.constant 0 : index
    %c0_31 = arith.constant 0 : index
    %c0_32 = arith.constant 0 : index
    %74 = vector.load %arg4[%c0_29, %c0_30, %c0_31, %c0_32] : memref<1x2x32x32xf32, #tpu.memory_space<vmem>>, vector<1x2x32x32xf32>
    tpu.vector_store %arg4[%c0_29, %c0_30, %c0_31, %c0_32], %73 {strides = array<i32>} : memref<1x2x32x32xf32, #tpu.memory_space<vmem>>, vector<1x2x32x32xf32>,
    return
  }
  func.func @transform_0(%arg0: i32, %arg1: i32) -> (i32, i32, i32) {
    %c0_i32 = arith.constant 0 : i32
    %c0_i32_0 = arith.constant 0 : i32
    %c0_i32_1 = arith.constant 0 : i32
    return %arg0, %c0_i32, %c0_i32_0 : i32, i32, i32
  }
  func.func @transform_1(%arg0: i32, %arg1: i32) -> (i32, i32) {
    %c0_i32 = arith.constant 0 : i32
    %c0_i32_0 = arith.constant 0 : i32
    %c0_i32_1 = arith.constant 0 : i32
    return %c0_i32, %c0_i32_0 : i32, i32
  }
  func.func @transform_2(%arg0: i32, %arg1: i32) -> (i32, i32, i32, i32) {
    %c0_i32 = arith.constant 0 : i32
    %c0_i32_0 = arith.constant 0 : i32
    %c0_i32_1 = arith.constant 0 : i32
    return %arg0, %c0_i32, %arg1, %c0_i32_0 : i32, i32, i32, i32
  }
}

</mosaic_0001>

<bundles_post_ra>
// kernel: tpu_custom_call.1
= control target key start
LH: loop header
LB: loop body
LE: loop exit
PB: predicated region body
PF: predicated region fallthrough
CT: control target
= control target key end

     0   :  { %7 = vsyncpa [#allocation5], 0  ;;  %s12176_s0 = inlined_call_operand.hbm [shape: f32[2,4,256], index: 0, kind: input, shape index: {}]   ;;  %s12177_s1 = inlined_call_operand.hbm [shape: f32[8,36], index: 1, kind: input, shape index: {}]   ;;  %s12178_s2 = inlined_call_operand.hbm [shape: f32[2,2,32,32], index: 2, kind: output, shape index: {}]  }
   0x1   :  { %9 = vsyncpa [#allocation5 + $0x1], 0 }
   0x2   :  { %10 = vsyncpa [#allocation8], 0 }
   0x3   :  { %11 = vsyncpa [#allocation6], 0 }
   0x4   :  { %13 = vsyncpa [#allocation6 + $0x1], 0  ;;  %s9057_s9 = smov 0   ;;  %s9059_s10 = smov 0  }
   0x5   :  { %s9061_s11 = smov 0   ;;  %s9063_s12 = smov 0  }
   0x6   :  { %s9065_s13 = smov 0   ;;  %s9067_s14 = smov 0  }
   0x7 LB: > { %s8737_s15 = sadd.s32 4294967295, %s9005_s14   ;;  %s8738_s16 = sadd.s32 4294967294, %s9005_s14   ;;  %s9005_s14 = sphi %s9067_s14, %s19_s14   ;;  %s9001_s13 = sphi %s9065_s13, %s12466_s13   ;;  %s8997_s12 = sphi %s9063_s12, %s12465_s12   ;;  %s8993_s11 = sphi %s9061_s11, %s12464_s11   ;;  %s8989_s10 = sphi %s9059_s10, %s12463_s10   ;;  %s8985_s9 = sphi %s9057_s9, %s12462_s9  }
   0x8   : > { %p51_p0 = scmp.ne.s32.totalorder %s8989_s10, %s8985_s9  ;;  %p9091_p1 = scmp.eq.s32.totalorder %s8737_s15, 0 }
   0x9   : > { %p9095_p2 = scmp.eq.s32.totalorder %s8737_s15, 1  ;;  %p104_p3 = scmp.eq.s32.totalorder %s8738_s16, 1 }
   0xa   : > { %p9101_p4 = por %p9091_p1, %p51_p0  ;;  %p8739_p5 = scmp.ge.s32.totalorder %s9005_s14, 1 }
   0xb   : > { %p9106_p6 = por %p104_p3, %p51_p0  ;;  %p111_p7 = scmp.lt.s32.totalorder %s9005_s14, 3 }
   0xc   : > { %s12252_s19 = scalar_select %p9101_p4, 1, 0 }
   0xd   : > { %s12253_s20 = scalar_select %p9106_p6, 1, 0 }
   0xe   : > { %p9111_p8 = pnand %p8739_p5, %p111_p7  ;;  %s9007_s22 = smov [#allocation7]  }
   0xf   : > { %s124_s23 = sshll.u32 %s9007_s22, 4  ;;  %s31_s25 = sadd.s32 1, %s9001_s13  ;;  %s125_s23 = int_to_ptr.vmem [resolvable:$true] %s124_s23 }
  0x10   : > { %p8767_p10 = pneg %p9111_p8  ;;  %s38_s26 = sadd.s32 1, %s8993_s11 }
  0x11   : > { %p33_p12 = scmp.ge.s32.totalorder %s31_s25, 2  ;;  %s8878_s27 = scalar_lea.vmem %s125_s23, 128 }
  0x12   : > { %p9120_p11 = pnand %p8767_p10, %p9091_p1  ;;  %p8879_p0 = scmp.ne.s32.totalorder %s125_s23, %s8878_s27 }
  0x13   : > { %p8886_p7 = scmp.lt.s32.totalorder %s125_s23, %s125_s23  ;;  %p8887_p6 = scmp.lt.s32.totalorder %s8878_s27, %s8878_s27 }
  0x14   : > { %p8869_p13 = pneg %p9120_p11 }
  0x15   : > { %p8888_p9 = por %p8887_p6, %p8886_p7 }
  0x16   : > { %p8881_p3 = pnand %p8879_p0, %p8869_p13 }
  0x18   : > { %p8882_p5 = pneg %p8881_p3 }
  0x1a   : > { %p8889_p4 = pnand %p8888_p9, %p8882_p5 }
  0x1c   : > { %8892 = shalt.err (!%p8889_p4)
}
  0x1d   : > { %8770 = dma.hbm_to_vmem [thread:$0]  (!%p9120_p11), %s12177_s1, 128, %s125_s23, [#allocation8]  }
  0x1e   : > { %s12468_s25 = smov (%p33_p12, %s31_s25), 0  ;;  %p45_p6 = scmp.ne.s32.totalorder %s8993_s11, %s8989_s10 }
  0x1f   : > { %p46_p4 = scmp.eq.s32.totalorder %s9005_s14, 0  ;;  %s35_s30 = ssub.s32 %s9001_s13, %s12468_s25 }
  0x20   : > { %p8780_p9 = scmp.lt.s32.totalorder %s9005_s14, 2  ;;  %p36_p10 = scmp.eq.s32.totalorder %s35_s30, 0 }
  0x21   : > { %p47_p13 = por %p46_p4, %p45_p6  ;;  %p9143_p0 = por %p9095_p2, %p45_p6 }
  0x22   : > { %s135_s4 = sand.u32 1, %s8993_s11   ;;  %s8757_s7 = sshll.u32 %s9001_s13, 7 }
  0x23   : > { %s9149_s5 = scalar_select %p36_p10, %s8993_s11, %s38_s26  }
  0x24   : > { %s8742_s6 = sshll.u32 %s135_s4, 3  ;;  %s145_s16 = scalar_lea.hbm %s12176_s0, %s8757_s7 }
  0x25   : > { %s139_s22 = scalar_lea.vmem [#allocation4], %s8742_s6  ;;  %p9155_p11 = pnand %p8780_p9, %p47_p13 }
  0x26   : > { %s147_s23 = sshll.u32 %s139_s22, 4  ;;  %s136_s18 = scalar_lea.sflag [#allocation5], %s135_s4  ;;  %s148_s23 = int_to_ptr.vmem [resolvable:$true] %s147_s23 }
  0x27   : > { %p8895_p2 = pneg %p9155_p11  ;;  %s8906_s27 = scalar_lea.vmem %s148_s23, 128 }
  0x28   : > { %p8907_p12 = scmp.ne.s32.totalorder %s148_s23, %s8906_s27  ;;  %s9008_s26 = smov [#allocation4]  }
  0x29   : > { %s8911_s28 = sshll.u32 %s9008_s26, 4  ;;  %s8912_s28 = int_to_ptr.vmem [resolvable:$false] %s8911_s28 }
  0x2a   : > { %p8909_p3 = pnand %p8907_p12, %p8895_p2  ;;  %s8913_s29 = scalar_lea.vmem %s8912_s28, 256 }
  0x2b   : > { %p8914_p7 = scmp.lt.s32.totalorder %s148_s23, %s8912_s28  ;;  %p8915_p6 = scmp.lt.s32.totalorder %s8913_s29, %s8906_s27 }
  0x2c   : > { %p8910_p5 = pneg %p8909_p3 }
  0x2d   : > { %p8916_p4 = por %p8915_p6, %p8914_p7 }
  0x2f   : > { %p8917_p10 = pnand %p8916_p4, %p8910_p5 }
  0x31   : > { %8920 = shalt.err (!%p8917_p10)
}
  0x32   : > { %8774 = dma.hbm_to_vmem [thread:$0]  (!%p9155_p11), %s145_s16, 128, %s148_s23, %s136_s18  }
  0x33   : > { %156 = sbr.rel (%p9111_p8) target bundleno = 1475 (0x5c3), region = 28 }
  0x38   : > { %s9166_s30 = sand.u32 1, %s8989_s10   ;;  %p12258_p9 = scmp.ne.s32.totalorder %s12252_s19, 0 }
  0x39   : > { %s8746_s4 = sshll.u32 %s9166_s30, 3  ;;  %s159_s6 = scalar_lea.sflag [#allocation5], %s9166_s30 }
  0x3a   : > { %s162_s7 = scalar_lea.vmem [#allocation4], %s8746_s4 }
  0x3b   : > { %8972 = dma.done.wait (%p12258_p9), %s159_s6, 128  }
  0x3c   : > { %8974 = vsyncadd (%p12258_p9), %s159_s6, 4294967168 }
  0x3d   : > { %8976 = dma.done.wait (%p9091_p1), [#allocation8], 128  }
  0x3e   : > { %8978 = vsyncadd (%p9091_p1), [#allocation8], 4294967168  ;;  %vm192_vm0 = vcmask 3072   ;;  %vm194_vm1 = vcmask 134152   ;;  %v9009_v0 = vmov 0.0   ;;  %v196_v1 = vld [vmem:[%s162_s7] sm:$0xff]  ;;  %v220_v2 = vlaneseq }
  0x3f   : > { %193 = vst.msk [vmem:[#allocation2] sm:$0xf] %vm192_vm0, %v9009_v0  ;;  %494 = vmatprep.mubr.f32.mxu0 %v9009_v0  ;;  %s9010_s21 = smov 17   ;;  %vm205_vm2 = vcmask 1043592   ;;  %vm206_vm3 = vcmask 1047556   ;;  %vm201_vm4 = vcmask 138240  }
  0x40   : > { %195 = vst.msk [vmem:[#allocation2] sm:$0xf] %vm194_vm1, %v9009_v0  ;;  %198 = vrot.lane.b32.xlu0 %v196_v1, %s9010_s21  ;;  %v221_v3 = vand.u32 127, %v220_v2  ;;  %vm209_vm5 = vcmask 134144   ;;  %vm207_vm6 = vmor %vm206_vm3, %vm205_vm2  ;;  %vm211_vm7 = vcmask 265352   ;;  %vm213_vm8 = vcmask 273672  }
  0x41   : > { %s9011_s17 = smov 111   ;;  %s9012_s19 = smov 127   ;;  %vm346_vm15 = vcmask 908288   ;;  %vm388_vm0 = vcmask 777216   ;;  %vm298_vm1 = vcmask 1039360   ;;  %vm314_vm2 = vcmask 1031168  }
  0x42   : > { %v222_v7 = vadd.s32 128, %v221_v3  ;;  %v228_v8 = vand.u32 15, %v221_v3  ;;  %s9013_s8 = smov 95   ;;  %s9014_s15 = smov 126   ;;  %v223_v18 = vadd.s32 256, %v221_v3  ;;  %vm375_vm3 = vcmask 785408  }
  0x43   : > { %s9015_s16 = smov 96   ;;  %s9016_s22 = smov 94  }
  0x44   : > { %v235_v9 = vand.u32 15, %v222_v7  ;;  %vm260_vm9 = vcmp.eq.s32.totalorder %v228_v8, 0  ;;  %vm276_vm11 = vcmp.eq.s32.totalorder %v228_v8, 1  ;;  %v242_v21 = vand.u32 15, %v223_v18  ;;  %s9017_s23 = smov 112   ;;  %s9018_s24 = smov 110  }
  0x45   : > { %s9019_s18 = smov 64   ;;  %s9020_s27 = smov 80  }
  0x46   : > { %vm261_vm10 = vcmp.eq.s32.totalorder %v235_v9, 0  ;;  %vm277_vm12 = vcmp.eq.s32.totalorder %v235_v9, 1  ;;  %vm278_vm13 = vcmp.eq.s32.totalorder %v242_v21, 1  ;;  %vm262_vm14 = vcmp.eq.s32.totalorder %v242_v21, 0  ;;  %s9021_s26 = smov 32   ;;  %s9022_s28 = smov 48  }
  0x47   : > { %s9023_s29 = smov 16   ;;  %s9026_s4 = smov 2  }
  0x48   : > { %s9027_s6 = smov 4   ;;  %s9028_s7 = smov 6  }
  0x49   : > { %s9029_s21 = smov 8  }
  0xb2   : > { %v199_v4 = vpop.permute.xlu0 %198 }
  0xb3   : > { %v200_v5 = vrot.slane %v199_v4, 4 }
  0xb5   : > { %v202_v6 = vsel %vm201_vm4, %v200_v5, %v199_v4  ;;  %210 = vst.msk [vmem:[#allocation2 + $0x8] sm:$0xf] %vm209_vm5, %v200_v5  ;;  %vm401_vm4 = vcmask 769024   ;;  %vm333_vm5 = vcmask 916480  }
  0xb6   : > { %208 = vst.msk [vmem:[#allocation2] sm:$0xff] %vm207_vm6, %v202_v6  ;;  %vm362_vm6 = vcmask 900096  }
  0xb7   : > { %212 = vst.msk [vmem:[#allocation2 + $0x8] sm:$0xf] %vm211_vm7, %v9009_v0  ;;  %vm423_vm7 = vcmask 1043456  }
  0xb8   : > { %214 = vst.msk [vmem:[#allocation2 + $0x8] sm:$0xf] %vm213_vm8, %v9009_v0  ;;  %vm419_vm8 = vcmask 293888  }
  0xbd   : > { %v218_v10 = vld [vmem:[#allocation2] sm:$0xff] }
  0xbe   : > { %340 = vrot.lane.b32.xlu0 %v218_v10, %s9011_s17  ;;  %294 = vrot.lane.b32.xlu1 %v218_v10, %s9012_s19  ;;  %v271_v11 = vcombine.high %v218_v10, %v218_v10  ;;  %v273_v12 = vsel %vm260_vm9, 0.0, %v218_v10  ;;  %v290_v15 = vcombine.low %v218_v10, %v218_v10  ;;  %v285_v16 = vsel %vm276_vm11, 0.0, %v218_v10 }
  0xbf   : > { %288 = vst [vmem:[#allocation3 + $0x30] sm:$0xf] %v273_v12  ;;  %v219_v14 = vld [vmem:[#allocation2 + $0x8] sm:$0xf]  ;;  %v324_v20 = vrot.slane %v273_v12, 4  ;;  %v353_v22 = vrot.slane %v285_v16, 4 }
  0xc0   : > { %v274_v13 = vsel %vm261_vm10, 0.0, %v271_v11  ;;  %v291_v17 = vcombine.low %v219_v14, %v219_v14  ;;  %v286_v19 = vsel %vm277_vm12, 0.0, %v271_v11  ;;  %v287_v23 = vsel %vm278_vm13, 0.0, %v219_v14 }
  0xc1   : > { %289 = vst [vmem:[#allocation3] sm:$0xf] %v274_v13  ;;  %v275_v24 = vsel %vm262_vm14, 0.0, %v219_v14  ;;  %v325_v26 = vrot.slane %v274_v13, 4  ;;  %v355_v27 = vrot.slane %v287_v23, 4  ;;  %v354_v28 = vrot.slane %v286_v19, 4 }
  0xc2   : > { %384 = vrot.lane.b32.xlu0 %v218_v10, %s9013_s8  ;;  %342 = vrot.lane.b32.xlu1 %v271_v11, %s9011_s17  ;;  %v326_v25 = vrot.slane %v275_v24, 4  ;;  %vm8481_vm9 = vcmask 15360   ;;  %vm8490_vm10 = vcmask 31744   ;;  %vm8499_vm11 = vcmask 48128  }
  0xc3   : > { %vm8508_vm12 = vcmask 64512   ;;  %vm8517_vm13 = vcmask 80896   ;;  %vm8526_vm14 = vcmask 97280  }
  0xc6   : > { %308 = vrot.lane.b32.xlu0 %v285_v16, %s9014_s15  ;;  %382 = vrot.lane.b32.xlu1 %v290_v15, %s9013_s8 }
  0xca   : > { %344 = vrot.lane.b32.xlu0 %v219_v14, %s9011_s17  ;;  %296 = vrot.lane.b32.xlu1 %v291_v17, %s9012_s19  ;;  %s9030_s17 = smov 10  }
  0xce   : > { %369 = vrot.lane.b32.xlu0 %v273_v12, %s9015_s16  ;;  %310 = vrot.lane.b32.xlu1 %v286_v19, %s9014_s15 }
  0xd2   : > { %395 = vrot.lane.b32.xlu0 %v285_v16, %s9016_s22  ;;  %327 = vrot.lane.b32.xlu1 %v324_v20, %s9017_s23  ;;  %v408_v16 = vld [vmem:[#allocation7] sm:$0xff] }
  0xd6   : > { %292 = vrot.lane.b32.xlu0 %v290_v15, %s9012_s19  ;;  %356 = vrot.lane.b32.xlu1 %v353_v22, %s9018_s24  ;;  %v9024_v22 = vmov 1983009808   ;;  %s9031_s19 = smov 12  }
  0xda   : > { %312 = vrot.lane.b32.xlu0 %v287_v23, %s9014_s15  ;;  %371 = vrot.lane.b32.xlu1 %v274_v13, %s9015_s16  ;;  %s9033_s15 = smov 18  }
  0xde   : > { %373 = vrot.lane.b32.xlu0 %v275_v24, %s9015_s16  ;;  %386 = vrot.lane.b32.xlu1 %v291_v17, %s9013_s8  ;;  %s9032_s8 = smov 14  }
  0xe2   : > { %399 = vrot.lane.b32.xlu0 %v287_v23, %s9016_s22  ;;  %397 = vrot.lane.b32.xlu1 %v286_v19, %s9016_s22  ;;  %v548_v23 = vunpack.c.l.s4 %v9024_v22  ;;  %s9035_s22 = smov 22  }
  0xe6   : > { %331 = vrot.lane.b32.xlu1 %v326_v25, %s9017_s23  ;;  %329 = vrot.lane.b32.xlu0 %v325_v26, %s9017_s23  ;;  %v549_v26 = vunpack.c.0.s8 %v548_v23 }
  0xea   : > { %360 = vrot.lane.b32.xlu1 %v355_v27, %s9018_s24  ;;  %358 = vrot.lane.b32.xlu0 %v354_v28, %s9018_s24  ;;  %v551_v27 = vshrl.u32 %v220_v2, 7  ;;  %v9025_v28 = vmov 1934713408   ;;  %s9037_s24 = smov 26  }
 0x130   : > { %v341_v29 = vpop.permute.xlu0 %340  ;;  %v295_v30 = vpop.permute.xlu1 %294 }
 0x134   : > { %v385_v31 = vpop.permute.xlu0 %384  ;;  %v343_v32 = vpop.permute.xlu1 %342 }
 0x135   : > { %v347_v33 = vsel %vm346_vm15, %v341_v29, %v343_v32  ;;  %v612_v29 = vunpack.c.l.s4 %v9025_v28 }
 0x136   : > { %351 = vst [vmem:[#allocation3 + $0x48] sm:$0xf] %v347_v33  ;;  %v9230_v33 = vsub.s32 %v549_v26, %v551_v27 }
 0x138   : > { %v309_v34 = vpop.permute.xlu0 %308  ;;  %v383_v35 = vpop.permute.xlu1 %382 }
 0x139   : > { %v389_v36 = vsel %vm388_vm0, %v383_v35, %v385_v31  ;;  %v613_v35 = vunpack.c.0.s8 %v612_v29 }
 0x13a   : > { %393 = vst [vmem:[#allocation3 + $0x8] sm:$0xf0] %v389_v36 }
 0x13c   : > { %v345_v37 = vpop.permute.xlu0 %344  ;;  %v297_v38 = vpop.permute.xlu1 %296 }
 0x13d   : > { %v348_v39 = vsel %vm346_vm15, %v343_v32, %v345_v37  ;;  %v300_v40 = vsel %vm298_vm1, %v295_v30, %v297_v38  ;;  %vm8535_vm15 = vcmask 113664  }
 0x13e   : > { %352 = vst [vmem:[#allocation3 + $0x28] sm:$0xf] %v348_v39  ;;  %304 = vst [vmem:[#allocation3] sm:$0xf0] %v300_v40 }
 0x140   : > { %v370_v41 = vpop.permute.xlu0 %369  ;;  %v311_v42 = vpop.permute.xlu1 %310 }
 0x141   : > { %v315_v43 = vsel %vm314_vm2, %v309_v34, %v311_v42 }
 0x142   : > { %319 = vst [vmem:[#allocation3 + $0x18] sm:$0xf] %v315_v43 }
 0x144   : > { %v396_v44 = vpop.permute.xlu0 %395  ;;  %v328_v45 = vpop.permute.xlu1 %327 }
 0x145   : > { %v410_v15 = vld [vmem:[#allocation3] sm:$0xff] }
 0x148   : > { %v293_v46 = vpop.permute.xlu0 %292  ;;  %v357_v47 = vpop.permute.xlu1 %356 }
 0x149   : > { %v299_v48 = vsel %vm298_vm1, %v293_v46, %v295_v30  ;;  %vm8553_vm1 = vcmask 146432  }
 0x14a   : > { %303 = vst [vmem:[#allocation3 + $0x30] sm:$0xf0] %v299_v48 }
 0x14c   : > { %v313_v49 = vpop.permute.xlu0 %312  ;;  %v372_v50 = vpop.permute.xlu1 %371 }
 0x14d   : > { %v316_v51 = vsel %vm314_vm2, %v311_v42, %v313_v49  ;;  %v376_v52 = vsel %vm375_vm3, %v370_v41, %v372_v50  ;;  %v9239_v42 = vsub.s32 %v613_v35, %v551_v27  ;;  %vm8562_vm2 = vcmask 162816  }
 0x14e   : > { %320 = vst [vmem:[#allocation3 + $0x10] sm:$0xf] %v316_v51  ;;  %380 = vst [vmem:[#allocation3 + $0x8] sm:$0xf] %v376_v52 }
 0x150   : > { %v374_v53 = vpop.permute.xlu0 %373  ;;  %v387_v54 = vpop.permute.xlu1 %386 }
 0x151   : > { %v377_v55 = vsel %vm375_vm3, %v372_v50, %v374_v53  ;;  %v390_v56 = vsel %vm388_vm0, %v385_v31, %v387_v54  ;;  %v409_v17 = vld [vmem:[#allocation3 + $0x30] sm:$0xff]  ;;  %vm8544_vm0 = vcmask 130048   ;;  %vm8571_vm3 = vcmask 179200  }
 0x152   : > { %381 = vst [vmem:[#allocation3 + $0x20] sm:$0xf] %v377_v55  ;;  %394 = vst [vmem:[#allocation3 + $0x20] sm:$0xf0] %v390_v56 }
 0x154   : > { %v400_v57 = vpop.permute.xlu0 %399  ;;  %v398_v58 = vpop.permute.xlu1 %397 }
 0x155   : > { %v402_v59 = vsel %vm401_vm4, %v396_v44, %v398_v58  ;;  %v403_v60 = vsel %vm401_vm4, %v398_v58, %v400_v57  ;;  %v415_v10 = vld [vmem:[#allocation3 + $0x8] sm:$0xff]  ;;  %vm8580_vm4 = vcmask 195584  }
 0x156   : > { %406 = vst [vmem:[#allocation3 + $0x40] sm:$0xf] %v402_v59  ;;  %407 = vst [vmem:[#allocation3 + $0x38] sm:$0xf] %v403_v60 }
 0x158   : > { %v332_v61 = vpop.permute.xlu1 %331  ;;  %v330_v62 = vpop.permute.xlu0 %329 }
 0x159   : > { %v334_v63 = vsel %vm333_vm5, %v328_v45, %v330_v62  ;;  %v335_v1 = vsel %vm333_vm5, %v330_v62, %v332_v61  ;;  %v416_v9 = vld [vmem:[#allocation3 + $0x20] sm:$0xff]  ;;  %vm8589_vm5 = vcmask 211968  }
 0x15a   : > { %338 = vst [vmem:[#allocation3 + $0x18] sm:$0xf0] %v334_v63  ;;  %339 = vst [vmem:[#allocation3 + $0x10] sm:$0xf0] %v335_v1 }
 0x15c   : > { %v361_v3 = vpop.permute.xlu1 %360  ;;  %v359_v4 = vpop.permute.xlu0 %358 }
 0x15d   : > { %v363_v5 = vsel %vm362_vm6, %v357_v47, %v359_v4  ;;  %v364_v6 = vsel %vm362_vm6, %v359_v4, %v361_v3  ;;  %v418_v7 = vld [vmem:[#allocation3 + $0x38] sm:$0xf]  ;;  %v417_v8 = vld [vmem:[#allocation3 + $0x40] sm:$0xf]  ;;  %vm8598_vm6 = vcmask 228352  }
 0x15e   : > { %367 = vst [vmem:[#allocation3 + $0x48] sm:$0xf0] %v363_v5  ;;  %368 = vst [vmem:[#allocation3 + $0x28] sm:$0xf0] %v364_v6  ;;  %8749 = vmatprep.subr.msk.mxu0 %vm423_vm7, %v418_v7 }
 0x15f   : > { %8750 = vmatpush1.msk.msra.mxu0 %vm423_vm7, %v417_v8  ;;  %vm8607_vm7 = vcmask 244736  }
 0x160   : > { %454 = vmatprep.subr.mxu0 %v416_v9 }
 0x161   : > { %455 = vmatpush1.msra.mxu0 %v415_v10  ;;  %v412_v13 = vld [vmem:[#allocation3 + $0x10] sm:$0xff]  ;;  %v411_v14 = vld [vmem:[#allocation3 + $0x18] sm:$0xff] }
 0x165   : > { %v414_v11 = vld [vmem:[#allocation3 + $0x28] sm:$0xff] }
 0x166   : > { %v413_v12 = vld [vmem:[#allocation3 + $0x48] sm:$0xff]  ;;  %456 = vmatprep.subr.mxu0 %v414_v11 }
 0x167   : > { %457 = vmatpush1.msra.mxu0 %v413_v12 }
 0x168   : > { %458 = vmatprep.subr.mxu0 %v412_v13 }
 0x169   : > { %459 = vmatpush1.msra.mxu0 %v411_v14 }
 0x16a   : > { %460 = vmatprep.subr.mxu0 %v410_v15 }
 0x16b   : > { %461 = vmatpush1.msra.mxu0 %v409_v17 }
 0x16c   : > { %8751 = vmatmul.mubr.msk.f32.vlgmr.msra.gmra.mxu0 %vm419_vm8, %v408_v16  ;;  %vm8616_vm8 = vcmask 261120  }
 0x22c   : > { %v9200_v18 = vpop.f32.mrf.mxu0 }
 0x22d   : > { %505 = vrot.lane.b32.xlu0 %v9200_v18, %s9015_s16  ;;  %502 = vrot.lane.b32.xlu1 %v9200_v18, %s9017_s23 }
 0x22e   : > { %v9210_v19 = vpop.f32.mrf.mxu0 }
 0x231   : > { %511 = vrot.lane.b32.xlu0 %v9200_v18, %s9019_s18  ;;  %508 = vrot.lane.b32.xlu1 %v9200_v18, %s9020_s27 }
 0x235   : > { %517 = vrot.lane.b32.xlu0 %v9200_v18, %s9021_s26  ;;  %514 = vrot.lane.b32.xlu1 %v9200_v18, %s9022_s28 }
 0x239   : > { %520 = vrot.lane.b32.xlu1 %v9200_v18, %s9023_s29  ;;  %524 = vrot.lane.b32.xlu0 %v9210_v19, %s9017_s23  ;;  %s9036_s23 = smov 24  }
 0x23d   : > { %527 = vrot.lane.b32.xlu1 %v9210_v19, %s9015_s16  ;;  %530 = vrot.lane.b32.xlu0 %v9210_v19, %s9020_s27  ;;  %s9034_s16 = smov 20   ;;  %s9039_s27 = smov 30  }
 0x241   : > { %533 = vrot.lane.b32.xlu1 %v9210_v19, %s9019_s18  ;;  %536 = vrot.lane.b32.xlu0 %v9210_v19, %s9022_s28  ;;  %s9038_s18 = smov 28  }
 0x245   : > { %539 = vrot.lane.b32.xlu1 %v9210_v19, %s9021_s26  ;;  %542 = vrot.lane.b32.xlu0 %v9210_v19, %s9023_s29  ;;  %s8748_s26 = sshll.u32 %s9166_s30, 6 }
 0x246   : > { %s12060_s28 = scalar_lea.vmem [#allocation9], %s8748_s26 }
 0x29f   : > { %v9224_v20 = vpop.permute.xlu0 %505  ;;  %v9226_v21 = vpop.permute.xlu1 %502 }
 0x2a0   : > { %v545_v34 = vcombine.low %v9200_v18, %v9224_v20  ;;  %v546_v11 = vcombine.high %v9200_v18, %v9224_v20 }
 0x2a2   : > { %v553_v2 = vrot.slane %v545_v34, %v9230_v33  ;;  %v560_v20 = vrot.slane %v546_v11, %v9230_v33 }
 0x2a3   : > { %v512_v24 = vpop.permute.xlu0 %511  ;;  %v509_v25 = vpop.permute.xlu1 %508 }
 0x2a4   : > { %v561_v30 = vcombine.low %v9226_v21, %v509_v25  ;;  %v562_v6 = vcombine.high %v9226_v21, %v509_v25 }
 0x2a6   : > { %v569_v36 = vrot.slane %v561_v30, %v9230_v33  ;;  %v576_v21 = vrot.slane %v562_v6, %v9230_v33 }
 0x2a7   : > { %v518_v31 = vpop.permute.xlu0 %517  ;;  %v515_v32 = vpop.permute.xlu1 %514 }
 0x2a8   : > { %v577_v37 = vcombine.low %v512_v24, %v518_v31  ;;  %v609_v46 = vcombine.low %v553_v2, %v569_v36  ;;  %v578_v7 = vcombine.high %v512_v24, %v518_v31  ;;  %v610_v8 = vcombine.high %v553_v2, %v569_v36 }
 0x2a9   : > { %v625_v34 = vcombine.low %v560_v20, %v576_v21 }
 0x2aa   : > { %v585_v43 = vrot.slane %v577_v37, %v9230_v33  ;;  %v617_v52 = vrot.slane %v609_v46, %v9239_v42  ;;  %v592_v23 = vrot.slane %v578_v7, %v9230_v33  ;;  %v624_v24 = vrot.slane %v610_v8, %v9239_v42 }
 0x2ab   : > { %v521_v38 = vpop.permute.xlu1 %520  ;;  %v9235_v39 = vpop.permute.xlu0 %524 }
 0x2ac   : > { %v593_v40 = vcombine.low %v515_v32, %v521_v38  ;;  %v594_v3 = vcombine.high %v515_v32, %v521_v38 }
 0x2ae   : > { %v601_v41 = vrot.slane %v593_v40, %v9230_v33  ;;  %v608_v12 = vrot.slane %v594_v3, %v9230_v33 }
 0x2af   : > { %v528_v44 = vpop.permute.xlu1 %527  ;;  %v531_v45 = vpop.permute.xlu0 %530 }
 0x2b0   : > { %v641_v47 = vcombine.low %v585_v43, %v601_v41  ;;  %v681_v48 = vcombine.low %v9210_v19, %v528_v44  ;;  %v697_v49 = vcombine.low %v9235_v39, %v531_v45  ;;  %v642_v4 = vcombine.high %v585_v43, %v601_v41 }
 0x2b1   : > { %v682_v25 = vcombine.high %v9210_v19, %v528_v44  ;;  %v698_v26 = vcombine.high %v9235_v39, %v531_v45  ;;  %v657_v28 = vcombine.low %v592_v23, %v608_v12  ;;  %v633_v41 = vrot.slane %v625_v34, %v9239_v42 }
 0x2b2   : > { %v649_v53 = vrot.slane %v641_v47, %v9239_v42  ;;  %v689_v56 = vrot.slane %v681_v48, %v9230_v33  ;;  %v705_v57 = vrot.slane %v697_v49, %v9230_v33  ;;  %v656_v14 = vrot.slane %v642_v4, %v9239_v42 }
 0x2b3   : > { %v534_v50 = vpop.permute.xlu1 %533  ;;  %v537_v51 = vpop.permute.xlu0 %536  ;;  %v696_v35 = vrot.slane %v682_v25, %v9230_v33  ;;  %v712_v19 = vrot.slane %v698_v26, %v9230_v33  ;;  %v665_v40 = vrot.slane %v657_v28, %v9239_v42  ;;  %v658_v46 = vcombine.high %v592_v23, %v608_v12 }
 0x2b4   : > { %v673_v54 = vcombine.low %v617_v52, %v649_v53  ;;  %v674_v55 = vcombine.high %v617_v52, %v649_v53  ;;  %v745_v62 = vcombine.low %v689_v56, %v705_v57  ;;  %v746_v18 = vcombine.high %v689_v56, %v705_v57 }
 0x2b5   : > { %v675_v27 = vcombine.low %v624_v24, %v656_v14  ;;  %v676_v31 = vcombine.high %v624_v24, %v656_v14  ;;  %v761_v2 = vcombine.low %v696_v35, %v712_v19  ;;  %v677_v43 = vcombine.low %v633_v41, %v665_v40 }
 0x2b6   : > { %817 = vxpose.xlu1.b32.start [1/2] (short) (narrow) %v673_v54, 16  ;;  %849 = vxpose.xlu0.b32.start [1/2] (short) (narrow) %v674_v55, 16  ;;  %v753_v9 = vrot.slane %v745_v62, %v9239_v42  ;;  %v760_v36 = vrot.slane %v746_v18, %v9239_v42  ;;  %v678_v44 = vcombine.high %v633_v41, %v665_v40 }
 0x2b7   : > { %v540_v58 = vpop.permute.xlu1 %539  ;;  %v543_v59 = vpop.permute.xlu0 %542  ;;  %v769_v47 = vrot.slane %v761_v2, %v9239_v42  ;;  %v626_v48 = vcombine.high %v560_v20, %v576_v21  ;;  %v672_v52 = vrot.slane %v658_v46, %v9239_v42  ;;  %v762_v53 = vcombine.high %v696_v35, %v712_v19 }
 0x2b8   : > { %v713_v60 = vcombine.low %v534_v50, %v540_v58  ;;  %v729_v61 = vcombine.low %v537_v51, %v543_v59  ;;  %v714_v13 = vcombine.high %v534_v50, %v540_v58  ;;  %v730_v15 = vcombine.high %v537_v51, %v543_v59 }
 0x2b9   : > { %v640_v54 = vrot.slane %v626_v48, %v9239_v42  ;;  %v776_v58 = vrot.slane %v762_v53, %v9239_v42 }
 0x2ba   : > { %v721_v63 = vrot.slane %v713_v60, %v9230_v33  ;;  %v737_v1 = vrot.slane %v729_v61, %v9230_v33  ;;  %v728_v29 = vrot.slane %v714_v13, %v9230_v33  ;;  %v744_v30 = vrot.slane %v730_v15, %v9230_v33 }
 0x2bb   : > { %v679_v55 = vcombine.low %v640_v54, %v672_v52  ;;  %v680_v56 = vcombine.high %v640_v54, %v672_v52 }
 0x2bc   : > { %v777_v5 = vcombine.low %v721_v63, %v737_v1  ;;  %v778_v16 = vcombine.high %v721_v63, %v737_v1  ;;  %v793_v37 = vcombine.low %v728_v29, %v744_v30  ;;  %v794_v49 = vcombine.high %v728_v29, %v744_v30 }
 0x2be   : > { %v785_v10 = vrot.slane %v777_v5, %v9239_v42  ;;  %v792_v32 = vrot.slane %v778_v16, %v9239_v42  ;;  %v801_v45 = vrot.slane %v793_v37, %v9239_v42  ;;  %v808_v57 = vrot.slane %v794_v49, %v9239_v42 }
 0x2c0   : > { %v810_v17 = vcombine.high %v753_v9, %v785_v10  ;;  %v809_v22 = vcombine.low %v753_v9, %v785_v10  ;;  %v811_v38 = vcombine.low %v760_v36, %v792_v32  ;;  %v812_v39 = vcombine.high %v760_v36, %v792_v32 }
 0x2c1   : > { %v813_v50 = vcombine.low %v769_v47, %v801_v45  ;;  %v814_v51 = vcombine.high %v769_v47, %v801_v45  ;;  %v815_v59 = vcombine.low %v776_v58, %v808_v57  ;;  %v816_v60 = vcombine.high %v776_v58, %v808_v57 }
 0x2c2   : > { %850 = vxpose.xlu0.b32.end [2/2] (short) (narrow) %v810_v17, 16  ;;  %818 = vxpose.xlu1.b32.end [2/2] (short) (narrow) %v809_v22, 16 }
 0x2c6   : > { %881 = vxpose.xlu0.b32.start [1/2] (short) (narrow) %v675_v27, 16  ;;  %913 = vxpose.xlu1.b32.start [1/2] (short) (narrow) %v676_v31, 16 }
 0x2ca   : > { %882 = vxpose.xlu0.b32.end [2/2] (short) (narrow) %v811_v38, 16  ;;  %914 = vxpose.xlu1.b32.end [2/2] (short) (narrow) %v812_v39, 16 }
 0x2ce   : > { %945 = vxpose.xlu0.b32.start [1/2] (short) (narrow) %v677_v43, 16  ;;  %977 = vxpose.xlu1.b32.start [1/2] (short) (narrow) %v678_v44, 16 }
 0x2d2   : > { %946 = vxpose.xlu0.b32.end [2/2] (short) (narrow) %v813_v50, 16  ;;  %978 = vxpose.xlu1.b32.end [2/2] (short) (narrow) %v814_v51, 16 }
 0x2d6   : > { %1009 = vxpose.xlu0.b32.start [1/2] (short) (narrow) %v679_v55, 16  ;;  %1041 = vxpose.xlu1.b32.start [1/2] (short) (narrow) %v680_v56, 16 }
 0x2da   : > { %1010 = vxpose.xlu0.b32.end [2/2] (short) (narrow) %v815_v59, 16  ;;  %1042 = vxpose.xlu1.b32.end [2/2] (short) (narrow) %v816_v60, 16 }
 0x33a   : > { %v9277_v61 = vpop.trf.xlu0  ;;  %v9279_v62 = vpop.trf.xlu1 }
 0x33b   : > { %v1095_v63 = vrot.slane %v9277_v61, %v9230_v33  ;;  %v1080_v1 = vrot.slane %v9279_v62, %v9230_v33 }
 0x33d   : > { %v1104_v3 = vcombine.high %v1080_v1, %v1095_v63  ;;  %v1103_v4 = vcombine.low %v1080_v1, %v1095_v63 }
 0x33e   : > { %v866_v5 = vpop.trf.xlu0  ;;  %v834_v6 = vpop.trf.xlu1 }
 0x33f   : > { %v1154_v7 = vcombine.high %v866_v5, %v9009_v0  ;;  %v9287_v8 = vrot.slane %v866_v5, %v9230_v33  ;;  %v1139_v9 = vcombine.high %v834_v6, %v9009_v0  ;;  %v9291_v10 = vrot.slane %v834_v6, %v9230_v33 }
 0x340   : > { %v1118_v11 = vrot.slane %v1104_v3, %v9239_v42  ;;  %v1111_v12 = vrot.slane %v1103_v4, %v9239_v42 }
 0x341   : > { %v9296_v13 = vrot.slane %v1154_v7, %v9230_v33  ;;  %v9299_v14 = vrot.slane %v1139_v9, %v9230_v33  ;;  %v1169_v15 = vcombine.low %v9291_v10, %v9287_v8  ;;  %v1170_v16 = vcombine.high %v9291_v10, %v9287_v8 }
 0x342   : > { %1665 = vxpose.xlu1.b32.start.end [1/1] (short) (narrow) %v1118_v11, 16  ;;  %1601 = vxpose.xlu0.b32.start.end [1/1] (short) (narrow) %v1111_v12, 16  ;;  %v9305_v17 = vpop.trf.xlu0  ;;  %v9307_v22 = vpop.trf.xlu1  ;;  %v1135_v26 = vcombine.high %v1111_v12, %v9009_v0  ;;  %v1136_v38 = vcombine.high %v1118_v11, %v9009_v0  ;;  %v1088_v12 = vcombine.high %v9277_v61, %v9009_v0 }
 0x343   : > { %v1185_v21 = vcombine.low %v9299_v14, %v9296_v13  ;;  %v1186_v23 = vcombine.high %v9299_v14, %v9296_v13  ;;  %v1212_v24 = vrot.slane %v9305_v17, %v9230_v33  ;;  %v1227_v25 = vrot.slane %v9307_v22, %v9230_v33 }
 0x345   : > { %v1235_v27 = vcombine.low %v1212_v24, %v1227_v25  ;;  %v1236_v34 = vcombine.high %v1212_v24, %v1227_v25  ;;  %v1073_v24 = vcombine.high %v9279_v62, %v9009_v0  ;;  %v1205_v62 = vcombine.high %v9305_v17, %v9009_v0 }
 0x346   : > { %v898_v18 = vpop.trf.xlu0  ;;  %v930_v20 = vpop.trf.xlu1 }
 0x347   : > { %1633 = vxpose.xlu0.b32.start.end [1/1] (short) (narrow) %v1135_v26, 16  ;;  %v1271_v28 = vcombine.high %v898_v18, %v9009_v0  ;;  %v9320_v29 = vrot.slane %v898_v18, %v9230_v33  ;;  %v1286_v30 = vcombine.high %v930_v20, %v9009_v0  ;;  %v9324_v31 = vrot.slane %v930_v20, %v9230_v33 }
 0x348   : > { %v1243_v32 = vrot.slane %v1235_v27, %v9239_v42  ;;  %v1250_v45 = vrot.slane %v1236_v34, %v9239_v42  ;;  %v1087_v20 = vrot.slane %v1073_v24, %v9230_v33  ;;  %v1102_v27 = vrot.slane %v1088_v12, %v9230_v33 }
 0x349   : > { %v9328_v35 = vrot.slane %v1271_v28, %v9230_v33  ;;  %v9331_v19 = vrot.slane %v1286_v30, %v9230_v33  ;;  %v1301_v36 = vcombine.low %v9320_v29, %v9324_v31  ;;  %v1302_v37 = vcombine.high %v9320_v29, %v9324_v31 }
 0x34a   : > { %2113 = vxpose.xlu1.b32.start.end [1/1] (short) (narrow) %v1243_v32, 16  ;;  %v9338_v39 = vpop.trf.xlu0  ;;  %v9340_v40 = vpop.trf.xlu1  ;;  %v1267_v46 = vcombine.high %v1243_v32, %v9009_v0  ;;  %v1268_v5 = vcombine.high %v1250_v45, %v9009_v0  ;;  %v1119_v61 = vcombine.low %v1087_v20, %v1102_v27  ;;  %v1220_v32 = vcombine.high %v9307_v22, %v9009_v0 }
 0x34b   : > { %v1317_v2 = vcombine.low %v9328_v35, %v9331_v19  ;;  %v1318_v41 = vcombine.high %v9328_v35, %v9331_v19  ;;  %v1344_v43 = vrot.slane %v9338_v39, %v9230_v33  ;;  %v1359_v44 = vrot.slane %v9340_v40, %v9230_v33 }
 0x34c   : > { %1697 = vxpose.xlu0.b32.start.end [1/1] (short) (narrow) %v1136_v38, 16  ;;  %v1127_v34 = vrot.slane %v1119_v61, %v9239_v42  ;;  %v1337_v22 = vcombine.high %v9338_v39, %v9009_v0 }
 0x34d   : > { %v1367_v49 = vcombine.low %v1344_v43, %v1359_v44  ;;  %v1368_v55 = vcombine.high %v1344_v43, %v1359_v44  ;;  %v1120_v43 = vcombine.high %v1087_v20, %v1102_v27  ;;  %v1219_v44 = vrot.slane %v1205_v62, %v9230_v33 }
 0x34e   : > { %v962_v47 = vpop.trf.xlu0  ;;  %v994_v48 = vpop.trf.xlu1  ;;  %v1137_v17 = vcombine.high %v1127_v34, %v9009_v0  ;;  %v1184_v62 = vrot.slane %v1170_v16, %v9239_v42 }
 0x34f   : > { %2177 = vxpose.xlu1.b32.start.end [1/1] (short) (narrow) %v1250_v45, 16  ;;  %v1403_v50 = vcombine.high %v962_v47, %v9009_v0  ;;  %v9354_v51 = vrot.slane %v962_v47, %v9230_v33  ;;  %v1418_v52 = vcombine.high %v994_v48, %v9009_v0  ;;  %v9358_v53 = vrot.slane %v994_v48, %v9230_v33 }
 0x350   : > { %v1375_v54 = vrot.slane %v1367_v49, %v9239_v42  ;;  %v1382_v7 = vrot.slane %v1368_v55, %v9239_v42  ;;  %v1234_v45 = vrot.slane %v1220_v32, %v9230_v33  ;;  %v1352_v48 = vcombine.high %v9340_v40, %v9009_v0 }
 0x351   : > { %2145 = vxpose.xlu0.b32.start.end [1/1] (short) (narrow) %v1267_v46, 16  ;;  %v9362_v56 = vrot.slane %v1403_v50, %v9230_v33  ;;  %v9365_v57 = vrot.slane %v1418_v52, %v9230_v33  ;;  %v1433_v58 = vcombine.low %v9354_v51, %v9358_v53  ;;  %v1434_v59 = vcombine.high %v9354_v51, %v9358_v53 }
 0x352   : > { %v1025_v60 = vpop.trf.xlu0  ;;  %v1057_v63 = vpop.trf.xlu1  ;;  %v1399_v11 = vcombine.high %v1375_v54, %v9009_v0  ;;  %v1400_v18 = vcombine.high %v1382_v7, %v9009_v0  ;;  %v1134_v46 = vrot.slane %v1120_v43, %v9239_v42  ;;  %v1251_v47 = vcombine.low %v1219_v44, %v1234_v45 }
 0x353   : > { %v1449_v1 = vcombine.low %v9362_v56, %v9365_v57  ;;  %v1450_v3 = vcombine.high %v9362_v56, %v9365_v57  ;;  %v1476_v4 = vrot.slane %v1025_v60, %v9230_v33  ;;  %v1491_v6 = vrot.slane %v1057_v63, %v9230_v33 }
 0x354   : > { %2625 = vxpose.xlu1.b32.start.end [1/1] (short) (narrow) %v1375_v54, 16  ;;  %v1259_v49 = vrot.slane %v1251_v47, %v9239_v42  ;;  %v1252_v50 = vcombine.high %v1219_v44, %v1234_v45  ;;  %v1351_v52 = vrot.slane %v1337_v22, %v9230_v33  ;;  %v1366_v54 = vrot.slane %v1352_v48, %v9230_v33 }
 0x355   : > { %v1499_v9 = vcombine.low %v1476_v4, %v1491_v6  ;;  %v1500_v26 = vcombine.high %v1476_v4, %v1491_v6  ;;  %v1138_v55 = vcombine.high %v1134_v46, %v9009_v0  ;;  %v1469_v40 = vcombine.high %v1025_v60, %v9009_v0 }
 0x356   : > { %2209 = vxpose.xlu0.b32.start.end [1/1] (short) (narrow) %v1268_v5, 16  ;;  %v1266_v4 = vrot.slane %v1252_v50, %v9239_v42  ;;  %v1383_v5 = vcombine.low %v1351_v52, %v1366_v54  ;;  %v1269_v39 = vcombine.high %v1259_v49, %v9009_v0  ;;  %v1484_v6 = vcombine.high %v1057_v63, %v9009_v0  ;;  %v1026_v10 = vpop.trf.xlu0  ;;  %v1058_v16 = vpop.trf.xlu1 }
 0x357   : > { %v1507_v25 = vrot.slane %v1499_v9, %v9239_v42  ;;  %v1514_v28 = vrot.slane %v1500_v26, %v9239_v42  ;;  %v1384_v9 = vcombine.high %v1351_v52, %v1366_v54  ;;  %v1542_v43 = vrot.slane %v1026_v10, %v9230_v33 }
 0x358   : > { %v1498_v12 = vrot.slane %v1484_v6, %v9230_v33  ;;  %v1270_v24 = vcombine.high %v1266_v4, %v9009_v0  ;;  %v1557_v44 = vrot.slane %v1058_v16, %v9230_v33  ;;  %v1448_v31 = vrot.slane %v1434_v59, %v9239_v42 }
 0x359   : > { %2689 = vxpose.xlu1.b32.start.end [1/1] (short) (narrow) %v1382_v7, 16  ;;  %v1531_v30 = vcombine.high %v1507_v25, %v9009_v0  ;;  %v1532_v38 = vcombine.high %v1514_v28, %v9009_v0  ;;  %v1391_v7 = vrot.slane %v1383_v5, %v9239_v42  ;;  %v1193_v51 = vrot.slane %v1185_v21, %v9239_v42 }
 0x35a   : > { %v1565_v29 = vcombine.low %v1542_v43, %v1557_v44  ;;  %v1466_v47 = vcombine.high %v1448_v31, %v9009_v0  ;;  %v1200_v59 = vrot.slane %v1186_v23, %v9239_v42 }
 0x35b   : > { %2657 = vxpose.xlu0.b32.start.end [1/1] (short) (narrow) %v1399_v11, 16  ;;  %v1483_v11 = vrot.slane %v1469_v40, %v9230_v33  ;;  %v1401_v60 = vcombine.high %v1391_v7, %v9009_v0  ;;  %v1203_v21 = vcombine.high %v1193_v51, %v9009_v0 }
 0x35c   : > { %v1204_v6 = vcombine.high %v1200_v59, %v9009_v0 }
 0x35d   : > { %v1515_v26 = vcombine.low %v1483_v11, %v1498_v12 }
 0x35e   : > { %3137 = vxpose.xlu1.b32.start.end [1/1] (short) (narrow) %v1507_v25, 16  ;;  %v1398_v25 = vrot.slane %v1384_v9, %v9239_v42 }
 0x35f   : > { %v1523_v63 = vrot.slane %v1515_v26, %v9239_v42 }
 0x360   : > { %2721 = vxpose.xlu0.b32.start.end [1/1] (short) (narrow) %v1400_v18, 16  ;;  %v1516_v18 = vcombine.high %v1483_v11, %v1498_v12  ;;  %v1402_v20 = vcombine.high %v1398_v25, %v9009_v0 }
 0x362   : > { %v1530_v27 = vrot.slane %v1516_v18, %v9239_v42 }
 0x363   : > { %3201 = vxpose.xlu1.b32.start.end [1/1] (short) (narrow) %v1514_v28, 16  ;;  %v1533_v28 = vcombine.high %v1523_v63, %v9009_v0 }
 0x364   : > { %v1534_v61 = vcombine.high %v1530_v27, %v9009_v0 }
 0x365   : > { %3169 = vxpose.xlu0.b32.start.end [1/1] (short) (narrow) %v1531_v30, 16  ;;  %v1177_v30 = vrot.slane %v1169_v15, %v9239_v42  ;;  %v1202_v15 = vcombine.high %v1184_v62, %v9009_v0 }
 0x367   : > { %v1201_v32 = vcombine.high %v1177_v30, %v9009_v0 }
 0x368   : > { %1729 = vxpose.xlu1.b32.start.end [1/1] (short) (narrow) %v1127_v34, 16  ;;  %v1309_v34 = vrot.slane %v1301_v36, %v9239_v42  ;;  %v1441_v36 = vrot.slane %v1433_v58, %v9239_v42  ;;  %v1566_v58 = vcombine.high %v1542_v43, %v1557_v44 }
 0x36a   : > { %3233 = vxpose.xlu0.b32.start.end [1/1] (short) (narrow) %v1532_v38, 16  ;;  %v1316_v38 = vrot.slane %v1302_v37, %v9239_v42  ;;  %v1333_v8 = vcombine.high %v1309_v34, %v9009_v0  ;;  %v1465_v37 = vcombine.high %v1441_v36, %v9009_v0 }
 0x36c   : > { %v1334_v45 = vcombine.high %v1316_v38, %v9009_v0 }
 0x36d   : > { %1793 = vxpose.xlu1.b32.start.end [1/1] (short) (narrow) %v1134_v46, 16  ;;  %v1573_v46 = vrot.slane %v1565_v29, %v9239_v42 }
 0x36f   : > { %1761 = vxpose.xlu0.b32.start.end [1/1] (short) (narrow) %v1137_v17, 16  ;;  %v1580_v17 = vrot.slane %v1566_v58, %v9239_v42  ;;  %v1597_v22 = vcombine.high %v1573_v46, %v9009_v0 }
 0x371   : > { %v1598_v53 = vcombine.high %v1580_v17, %v9009_v0 }
 0x372   : > { %2241 = vxpose.xlu1.b32.start.end [1/1] (short) (narrow) %v1259_v49, 16 }
 0x374   : > { %1825 = vxpose.xlu0.b32.start.end [1/1] (short) (narrow) %v1138_v55, 16 }
 0x377   : > { %2305 = vxpose.xlu1.b32.start.end [1/1] (short) (narrow) %v1266_v4, 16 }
 0x379   : > { %2273 = vxpose.xlu0.b32.start.end [1/1] (short) (narrow) %v1269_v39, 16  ;;  %v1325_v39 = vrot.slane %v1317_v2, %v9239_v42 }
 0x37b   : > { %v1335_v35 = vcombine.high %v1325_v39, %v9009_v0 }
 0x37c   : > { %2753 = vxpose.xlu1.b32.start.end [1/1] (short) (narrow) %v1391_v7, 16  ;;  %v1332_v7 = vrot.slane %v1318_v41, %v9239_v42 }
 0x37e   : > { %2337 = vxpose.xlu0.b32.start.end [1/1] (short) (narrow) %v1270_v24, 16 }
 0x381   : > { %2817 = vxpose.xlu1.b32.start.end [1/1] (short) (narrow) %v1398_v25, 16  ;;  %v1535_v25 = vcombine.high %v1026_v10, %v9009_v0 }
 0x383   : > { %2785 = vxpose.xlu0.b32.start.end [1/1] (short) (narrow) %v1401_v60, 16  ;;  %v1549_v10 = vrot.slane %v1535_v25, %v9230_v33 }
 0x386   : > { %3265 = vxpose.xlu1.b32.start.end [1/1] (short) (narrow) %v1523_v63, 16  ;;  %v1550_v63 = vcombine.high %v1058_v16, %v9009_v0 }
 0x388   : > { %2849 = vxpose.xlu0.b32.start.end [1/1] (short) (narrow) %v1402_v20, 16  ;;  %v1564_v16 = vrot.slane %v1550_v63, %v9230_v33 }
 0x38b   : > { %3329 = vxpose.xlu1.b32.start.end [1/1] (short) (narrow) %v1530_v27, 16 }
 0x38d   : > { %3297 = vxpose.xlu0.b32.start.end [1/1] (short) (narrow) %v1533_v28, 16 }
 0x390   : > { %1857 = vxpose.xlu1.b32.start.end [1/1] (short) (narrow) %v1177_v30, 16 }
 0x392   : > { %3361 = vxpose.xlu0.b32.start.end [1/1] (short) (narrow) %v1534_v61, 16  ;;  %v1457_v61 = vrot.slane %v1449_v1, %v9239_v42 }
 0x395   : > { %1921 = vxpose.xlu1.b32.start.end [1/1] (short) (narrow) %v1184_v62, 16 }
 0x397   : > { %1889 = vxpose.xlu0.b32.start.end [1/1] (short) (narrow) %v1201_v32, 16 }
 0x39a   : > { %2369 = vxpose.xlu1.b32.start.end [1/1] (short) (narrow) %v1309_v34, 16 }
 0x39c   : > { %1953 = vxpose.xlu0.b32.start.end [1/1] (short) (narrow) %v1202_v15, 16 }
 0x39f   : > { %2433 = vxpose.xlu1.b32.start.end [1/1] (short) (narrow) %v1316_v38, 16 }
 0x3a1   : > { %2401 = vxpose.xlu0.b32.start.end [1/1] (short) (narrow) %v1333_v8, 16 }
 0x3a4   : > { %2881 = vxpose.xlu1.b32.start.end [1/1] (short) (narrow) %v1441_v36, 16 }
 0x3a6   : > { %2465 = vxpose.xlu0.b32.start.end [1/1] (short) (narrow) %v1334_v45, 16 }
 0x3a9   : > { %2945 = vxpose.xlu1.b32.start.end [1/1] (short) (narrow) %v1448_v31, 16 }
 0x3ab   : > { %2913 = vxpose.xlu0.b32.start.end [1/1] (short) (narrow) %v1465_v37, 16  ;;  %v1581_v37 = vcombine.low %v1549_v10, %v1564_v16 }
 0x3ae   : > { %3393 = vxpose.xlu1.b32.start.end [1/1] (short) (narrow) %v1573_v46, 16  ;;  %v1582_v46 = vcombine.high %v1549_v10, %v1564_v16 }
 0x3b0   : > { %2977 = vxpose.xlu0.b32.start.end [1/1] (short) (narrow) %v1466_v47, 16  ;;  %v1336_v47 = vcombine.high %v1332_v7, %v9009_v0  ;;  %v9539_v57 = vrot.slane %v1582_v46, %v9239_v42 }
 0x3b3   : > { %3457 = vxpose.xlu1.b32.start.end [1/1] (short) (narrow) %v1580_v17, 16  ;;  %v1464_v17 = vrot.slane %v1450_v3, %v9239_v42 }
 0x3b5   : > { %3425 = vxpose.xlu0.b32.start.end [1/1] (short) (narrow) %v1597_v22, 16  ;;  %v9536_v56 = vcombine.high %v1464_v17, %v9009_v0 }
 0x3b8   : > { %1985 = vxpose.xlu1.b32.start.end [1/1] (short) (narrow) %v1193_v51, 16 }
 0x3be   : > { %v1617_v48 = vpop.trf.xlu0  ;;  %v1681_v49 = vpop.trf.xlu1  ;;  %2049 = vxpose.xlu1.b32.start.end [1/1] (short) (narrow) %v1200_v59, 16  ;;  %3489 = vxpose.xlu0.b32.start.end [1/1] (short) (narrow) %v1598_v53, 16 }
 0x3bf   : > { %v3649_v50 = vcombine.low %v1617_v48, %v1681_v49  ;;  %v3650_v52 = vcombine.high %v1617_v48, %v1681_v49 }
 0x3c1   : > { %v3664_v12 = vrot.slane %v3650_v52, %v9230_v33  ;;  %v3657_v58 = vrot.slane %v3649_v50, %v9230_v33 }
 0x3c2   : > { %v1618_v54 = vpop.trf.xlu0  ;;  %v1682_v55 = vpop.trf.xlu1 }
 0x3c3   : > { %v3921_v4 = vcombine.low %v1618_v54, %v1682_v55  ;;  %v3922_v5 = vcombine.high %v1618_v54, %v1682_v55  ;;  %v1467_v54 = vcombine.high %v1457_v61, %v9009_v0  ;;  %v1589_v55 = vrot.slane %v1581_v37, %v9239_v42 }
 0x3c5   : > { %v9493_v30 = vrot.slane %v3921_v4, %v9230_v33  ;;  %v9500_v62 = vrot.slane %v3922_v5, %v9230_v33 }
 0x3c6   : > { %v1649_v40 = vpop.trf.xlu0  ;;  %2017 = vxpose.xlu0.b32.start.end [1/1] (short) (narrow) %v1203_v21, 16  ;;  %v9472_v13 = vpop.trf.xlu1  ;;  %2497 = vxpose.xlu1.b32.start.end [1/1] (short) (narrow) %v1325_v39, 16 }
 0x3ca   : > { %v1650_v14 = vpop.trf.xlu0  ;;  %v9474_v23 = vpop.trf.xlu1 }
 0x3ce   : > { %v1713_v9 = vpop.trf.xlu0  ;;  %2081 = vxpose.xlu0.b32.start.end [1/1] (short) (narrow) %v1204_v6, 16  ;;  %v2193_v11 = vpop.trf.xlu1  ;;  %2561 = vxpose.xlu1.b32.start.end [1/1] (short) (narrow) %v1332_v7, 16 }
 0x3cf   : > { %v3666_v2 = vcombine.high %v1649_v40, %v1713_v9  ;;  %v3665_v32 = vcombine.low %v1649_v40, %v1713_v9  ;;  %v4193_v22 = vcombine.low %v9472_v13, %v2193_v11  ;;  %v4194_v51 = vcombine.high %v9472_v13, %v2193_v11 }
 0x3d1   : > { %v3680_v24 = vrot.slane %v3666_v2, %v9230_v33  ;;  %v3673_v45 = vrot.slane %v3665_v32, %v9230_v33  ;;  %v4201_v3 = vrot.slane %v4193_v22, %v9230_v33  ;;  %v4208_v4 = vrot.slane %v4194_v51, %v9230_v33 }
 0x3d2   : > { %v1714_v26 = vpop.trf.xlu0  ;;  %v9484_v60 = vpop.trf.xlu1 }
 0x3d3   : > { %v3729_v18 = vcombine.low %v3664_v12, %v3680_v24  ;;  %v3730_v20 = vcombine.high %v3664_v12, %v3680_v24  ;;  %v3937_v19 = vcombine.low %v1650_v14, %v1714_v26  ;;  %v3938_v41 = vcombine.high %v1650_v14, %v1714_v26 }
 0x3d4   : > { %v4465_v27 = vcombine.low %v9474_v23, %v9484_v60  ;;  %v4466_v28 = vcombine.high %v9474_v23, %v9484_v60  ;;  %v3713_v53 = vcombine.low %v3657_v58, %v3673_v45  ;;  %v3714_v59 = vcombine.high %v3657_v58, %v3673_v45 }
 0x3d5   : > { %v9503_v34 = vrot.slane %v3937_v19, %v9230_v33  ;;  %v9506_v15 = vrot.slane %v3938_v41, %v9230_v33  ;;  %v3737_v13 = vrot.slane %v3729_v18, %v9239_v42  ;;  %v3744_v14 = vrot.slane %v3730_v20, %v9239_v42 }
 0x3d6   : > { %v2161_v38 = vpop.trf.xlu0  ;;  %2529 = vxpose.xlu0.b32.start.end [1/1] (short) (narrow) %v1335_v35, 16  ;;  %v9508_v8 = vpop.trf.xlu1  ;;  %3009 = vxpose.xlu1.b32.start.end [1/1] (short) (narrow) %v1457_v61, 16  ;;  %v3721_v39 = vrot.slane %v3713_v53, %v9239_v42  ;;  %v3728_v40 = vrot.slane %v3714_v59, %v9239_v42  ;;  %v9552_v7 = vrot.slane %v4465_v27, %v9230_v33 }
 0x3d7   : > { %v3985_v1 = vcombine.low %v9493_v30, %v9503_v34  ;;  %v3986_v36 = vcombine.high %v9493_v30, %v9503_v34  ;;  %v4001_v43 = vcombine.low %v9500_v62, %v9506_v15  ;;  %v4002_v44 = vcombine.high %v9500_v62, %v9506_v15 }
 0x3d8   : > { %v4480_v60 = vrot.slane %v4466_v28, %v9230_v33  ;;  %v5969_v35 = vrot.slane %v3737_v13, %v9230_v33  ;;  %v6001_v19 = vrot.slane %v3744_v14, %v9230_v33  ;;  %v9579_v51 = vrot.slane %v3728_v40, %v9230_v33 }
 0x3d9   : > { %v9609_v30 = vrot.slane %v4002_v44, %v9239_v42 }
 0x3da   : > { %v2162_v29 = vpop.trf.xlu0  ;;  %v9521_v31 = vpop.trf.xlu1 }
 0x3de   : > { %v2225_v48 = vpop.trf.xlu0  ;;  %2593 = vxpose.xlu0.b32.start.end [1/1] (short) (narrow) %v1336_v47, 16  ;;  %v9531_v49 = vpop.trf.xlu1  ;;  %3073 = vxpose.xlu1.b32.start.end [1/1] (short) (narrow) %v1464_v17, 16  ;;  %v1599_v47 = vcombine.high %v1589_v55, %v9009_v0 }
 0x3df   : > { %v4209_v52 = vcombine.low %v2161_v38, %v2225_v48  ;;  %v4210_v50 = vcombine.high %v2161_v38, %v2225_v48  ;;  %v3993_v38 = vrot.slane %v3985_v1, %v9239_v42  ;;  %v9576_v1 = vrot.slane %v3721_v39, %v9230_v33 }
 0x3e0   : > { %v4738_v62 = vcombine.high %v9508_v8, %v9531_v49 }
 0x3e1   : > { %v4217_v5 = vrot.slane %v4209_v52, %v9230_v33  ;;  %v4224_v21 = vrot.slane %v4210_v50, %v9230_v33  ;;  %v9586_v52 = vcombine.high %v9539_v57, %v9009_v0  ;;  %v4000_v50 = vrot.slane %v3986_v36, %v9239_v42 }
 0x3e2   : > { %v2226_v23 = vpop.trf.xlu0  ;;  %v9549_v6 = vpop.trf.xlu1  ;;  %v4009_v0 = vrot.slane %v4001_v43, %v9239_v42  ;;  %v9612_v34 = vrot.slane %v3993_v38, %v9230_v33  ;;  %v4737_v36 = vcombine.low %v9508_v8, %v9531_v49 }
 0x3e3   : > { %v4257_v9 = vcombine.low %v4201_v3, %v4217_v5  ;;  %v4273_v11 = vcombine.low %v4208_v4, %v4224_v21  ;;  %v4274_v2 = vcombine.high %v4208_v4, %v4224_v21  ;;  %v4481_v12 = vcombine.low %v2162_v29, %v2226_v23 }
 0x3e4   : > { %v4482_v24 = vcombine.high %v2162_v29, %v2226_v23  ;;  %v5009_v25 = vcombine.low %v9521_v31, %v9549_v6  ;;  %v5010_v26 = vcombine.high %v9521_v31, %v9549_v6  ;;  %v4258_v63 = vcombine.high %v4201_v3, %v4217_v5 }
 0x3e5   : > { %v4281_v18 = vrot.slane %v4273_v11, %v9239_v42  ;;  %v4288_v20 = vrot.slane %v4274_v2, %v9239_v42  ;;  %v4489_v41 = vrot.slane %v4481_v12, %v9230_v33  ;;  %v4265_v28 = vrot.slane %v4257_v9, %v9239_v42 }
 0x3e6   : > { %v4496_v27 = vrot.slane %v4482_v24, %v9230_v33  ;;  %v2673_v61 = vpop.trf.xlu0  ;;  %3041 = vxpose.xlu0.b32.start.end [1/1] (short) (narrow) %v1467_v54, 16  ;;  %v9565_v32 = vpop.trf.xlu1  ;;  %3521 = vxpose.xlu1.b32.start.end [1/1] (short) (narrow) %v1589_v55, 16  ;;  %v4272_v58 = vrot.slane %v4258_v63, %v9239_v42  ;;  %v6137_v13 = vrot.slane %v4000_v50, %v9230_v33 }
 0x3e7   : > { %v5985_v10 = vrot.slane %v4281_v18, %v9230_v33  ;;  %v6017_v16 = vrot.slane %v4288_v20, %v9230_v33  ;;  %v4529_v45 = vcombine.low %v9552_v7, %v4489_v41  ;;  %v4530_v29 = vcombine.high %v9552_v7, %v4489_v41 }
 0x3e8   : > { %v4545_v37 = vcombine.low %v4480_v60, %v4496_v27  ;;  %v4546_v46 = vcombine.high %v4480_v60, %v4496_v27  ;;  %v9593_v54 = vrot.slane %v4265_v28, %v9230_v33  ;;  %v9617_v4 = vrot.slane %v4272_v58, %v9230_v33 }
 0x3e9   : > { %v6026_v17 = vcombine.high %v5969_v35, %v5985_v10  ;;  %v6058_v22 = vcombine.high %v6001_v19, %v6017_v16  ;;  %v4537_v53 = vrot.slane %v4529_v45, %v9239_v42  ;;  %v6025_v21 = vcombine.low %v5969_v35, %v5985_v10 }
 0x3ea   : > { %v2674_v59 = vpop.trf.xlu0  ;;  %v9582_v48 = vpop.trf.xlu1  ;;  %v6057_v40 = vcombine.low %v6001_v19, %v6017_v16  ;;  %v5889_v7 = vcombine.low %v9576_v1, %v9593_v54  ;;  %v9634_v9 = vrot.slane %v4009_v0, %v9230_v33  ;;  %v4745_v8 = vrot.slane %v4737_v36, %v9230_v33 }
 0x3eb   : > { %v9596_v55 = vrot.slane %v6026_v17, %v9239_v42  ;;  %v9599_v3 = vrot.slane %v6058_v22, %v9239_v42  ;;  %v9626_v15 = vrot.slane %v4537_v53, %v9230_v33  ;;  %v9638_v49 = vrot.slane %v6025_v21, %v9239_v42 }
 0x3ec   : > { %v4553_v11 = vrot.slane %v4545_v37, %v9239_v42  ;;  %v4560_v2 = vrot.slane %v4546_v46, %v9239_v42  ;;  %v5921_v12 = vcombine.low %v9579_v51, %v9617_v4  ;;  %v4752_v24 = vrot.slane %v4738_v62, %v9230_v33 }
 0x3ed   : > { %v6091_v5 = vcombine.low %v9596_v55, %v9599_v3  ;;  %12259 = vst [vmem:[#allocation13_spill] sm:$0xff] %v9638_v49  ;;  %v9653_v60 = vrot.slane %v5009_v25, %v9230_v33  ;;  %v6161_v35 = vcombine.low %v9612_v34, %v9626_v15  ;;  %v9663_v19 = vrot.slane %v5010_v26, %v9230_v33 }
 0x3ee   : > { %v2737_v44 = vpop.trf.xlu0  ;;  %3105 = vxpose.xlu0.b32.start.end [1/1] (short) (narrow) %v9536_v56, 16  ;;  %v3217_v39 = vpop.trf.xlu1  ;;  %3585 = vxpose.xlu1.b32.start.end [1/1] (short) (narrow) %v9539_v57, 16  ;;  %v9641_v56 = vrot.slane %v6057_v40, %v9239_v42  ;;  %v4544_v57 = vrot.slane %v4530_v29, %v9239_v42  ;;  %v9668_v25 = vrot.slane %v5889_v7, %v9239_v42 }
 0x3ef   : > { %v4753_v14 = vcombine.low %v2673_v61, %v2737_v44  ;;  %v4754_v23 = vcombine.high %v2673_v61, %v2737_v44  ;;  %v6257_v45 = vrot.slane %v4553_v11, %v9230_v33  ;;  %v6289_v31 = vrot.slane %v4560_v2, %v9230_v33 }
 0x3f0   : > { %12260 = vst [vmem:[#allocation14_spill] sm:$0xff] %v9641_v56  ;;  %12261 = vst [vmem:[#allocation15_spill] sm:$0xff] %v9668_v25  ;;  %v6153_v16 = vrot.slane %v4544_v57, %v9230_v33  ;;  %v9676_v6 = vrot.slane %v5921_v12, %v9239_v42  ;;  %v5281_v26 = vcombine.low %v9565_v32, %v3217_v39 }
 0x3f1   : > { %v4761_v41 = vrot.slane %v4753_v14, %v9230_v33  ;;  %v4768_v27 = vrot.slane %v4754_v23, %v9230_v33  ;;  %v5282_v29 = vcombine.high %v9565_v32, %v3217_v39  ;;  %v6162_v62 = vcombine.high %v9612_v34, %v9626_v15 }
 0x3f2   : > { %v2738_v63 = vpop.trf.xlu0  ;;  %v3218_v18 = vpop.trf.xlu1  ;;  %12262 = vst [vmem:[#allocation16_spill] sm:$0xff] %v9676_v6  ;;  %v6193_v21 = vcombine.low %v6137_v13, %v6153_v16  ;;  %v6194_v44 = vcombine.high %v6137_v13, %v6153_v16  ;;  %v6273_v39 = vrot.slane %v9609_v30, %v9230_v33  ;;  %v5289_v40 = vrot.slane %v5281_v26, %v9230_v33 }
 0x3f3   : > { %v5025_v61 = vcombine.low %v2674_v59, %v2738_v63  ;;  %v5026_v38 = vcombine.high %v2674_v59, %v2738_v63  ;;  %v5553_v28 = vcombine.low %v9582_v48, %v3218_v18  ;;  %v5554_v10 = vcombine.high %v9582_v48, %v3218_v18 }
 0x3f4   : > { %v4801_v22 = vcombine.low %v4745_v8, %v4761_v41  ;;  %v4802_v53 = vcombine.high %v4745_v8, %v4761_v41  ;;  %v4817_v59 = vcombine.low %v4752_v24, %v4768_v27  ;;  %v4818_v48 = vcombine.high %v4752_v24, %v4768_v27 }
 0x3f5   : > { %v9681_v37 = vrot.slane %v5025_v61, %v9230_v33  ;;  %v9684_v46 = vrot.slane %v5026_v38, %v9230_v33  ;;  %v5296_v14 = vrot.slane %v5282_v29, %v9230_v33  ;;  %v5954_v8 = vcombine.high %v9668_v25, %v9676_v6 }
 0x3f6   : > { %v3185_v58 = vpop.trf.xlu0  ;;  %3553 = vxpose.xlu0.b32.start.end [1/1] (short) (narrow) %v1599_v47, 16  ;;  %v9686_v17 = vpop.trf.xlu1  ;;  %v9697_v47 = vrot.slane %v6161_v35, %v9239_v42  ;;  %v9710_v57 = vrot.slane %v6193_v21, %v9239_v42  ;;  %v9713_v11 = vrot.slane %v6162_v62, %v9239_v42  ;;  %v9716_v34 = vrot.slane %v6194_v44, %v9239_v42 }
 0x3f7   : > { %v5073_v50 = vcombine.low %v9653_v60, %v9681_v37  ;;  %v5074_v32 = vcombine.high %v9653_v60, %v9681_v37  ;;  %v5089_v0 = vcombine.low %v9663_v19, %v9684_v46  ;;  %v5090_v36 = vcombine.high %v9663_v19, %v9684_v46 }
 0x3f8   : > { %12263 = vst [vmem:[#allocation17_spill] sm:$0xff] %v9697_v47  ;;  %12264 = vst [vmem:[#allocation18_spill] sm:$0xff] %v9710_v57  ;;  %v6297_v30 = vcombine.low %v9634_v9, %v6257_v45  ;;  %v4809_v15 = vrot.slane %v4801_v22, %v9239_v42  ;;  %v4816_v13 = vrot.slane %v4802_v53, %v9239_v42 }
 0x3f9   : > { %v4825_v2 = vrot.slane %v4817_v59, %v9239_v42  ;;  %v4832_v12 = vrot.slane %v4818_v48, %v9239_v42  ;;  %v6329_v35 = vcombine.low %v6273_v39, %v6289_v31  ;;  %v6298_v38 = vcombine.high %v9634_v9, %v6257_v45 }
 0x3fa   : > { %v3186_v23 = vpop.trf.xlu0  ;;  %v9705_v7 = vpop.trf.xlu1  ;;  %v9728_v18 = vrot.slane %v6297_v30, %v9239_v42  ;;  %v6330_v16 = vcombine.high %v6273_v39, %v6289_v31  ;;  %v5561_v29 = vrot.slane %v5553_v28, %v9230_v33  ;;  %v9740_v22 = vrot.slane %v5554_v10, %v9230_v33 }
 0x3fb   : > { %v9746_v48 = vrot.slane %v6298_v38, %v9239_v42  ;;  %v9754_v45 = vrot.slane %v4809_v15, %v9230_v33  ;;  %v9757_v28 = vrot.slane %v4816_v13, %v9230_v33 }
 0x3fc   : > { %12265 = vst [vmem:[#allocation19_spill] sm:$0xff] %v9728_v18  ;;  %v9749_v21 = vrot.slane %v6330_v16, %v9239_v42 }
 0x3fd   : > { %12267 = vst [vmem:[#allocation21_spill] sm:$0xff] %v9746_v48 }
 0x3fe   : > { %v3249_v41 = vpop.trf.xlu0  ;;  %3617 = vxpose.xlu0.b32.start.end [1/1] (short) (narrow) %v9586_v52, 16  ;;  %v9731_v27 = vpop.trf.xlu1  ;;  %v9743_v52 = vrot.slane %v6329_v35, %v9239_v42  ;;  %12268 = vst [vmem:[#allocation22_spill] sm:$0xff] %v9749_v21 }
 0x3ff   : > { %v5297_v53 = vcombine.low %v3185_v58, %v3249_v41  ;;  %v5298_v59 = vcombine.high %v3185_v58, %v3249_v41  ;;  %v3681_v19 = vcombine.low %v9686_v17, %v9731_v27  ;;  %v3682_v46 = vcombine.high %v9686_v17, %v9731_v27 }
 0x400   : > { %12266 = vst [vmem:[#allocation20_spill] sm:$0xff] %v9743_v52 }
 0x401   : > { %v5305_v10 = vrot.slane %v5297_v53, %v9230_v33  ;;  %v5312_v31 = vrot.slane %v5298_v59, %v9230_v33 }
 0x402   : > { %v3250_v58 = vpop.trf.xlu0  ;;  %v9761_v62 = vpop.trf.xlu1 }
 0x403   : > { %v5345_v13 = vcombine.low %v5289_v40, %v5305_v10  ;;  %v5346_v35 = vcombine.high %v5289_v40, %v5305_v10  ;;  %v5361_v41 = vcombine.low %v5296_v14, %v5312_v31  ;;  %v5362_v38 = vcombine.high %v5296_v14, %v5312_v31 }
 0x404   : > { %v5569_v16 = vcombine.low %v3186_v23, %v3250_v58  ;;  %v5570_v53 = vcombine.high %v3186_v23, %v3250_v58  ;;  %v3953_v59 = vcombine.low %v9705_v7, %v9761_v62  ;;  %v3954_v9 = vcombine.high %v9705_v7, %v9761_v62 }
 0x405   : > { %v5353_v26 = vrot.slane %v5345_v13, %v9239_v42  ;;  %v5360_v61 = vrot.slane %v5346_v35, %v9239_v42  ;;  %v5369_v30 = vrot.slane %v5361_v41, %v9239_v42  ;;  %v5376_v15 = vrot.slane %v5362_v38, %v9239_v42 }
 0x406   : > { %v5081_v40 = vrot.slane %v5073_v50, %v9239_v42  ;;  %v5088_v14 = vrot.slane %v5074_v32, %v9239_v42  ;;  %v5577_v23 = vrot.slane %v5569_v16, %v9230_v33  ;;  %v5584_v7 = vrot.slane %v5570_v53, %v9230_v33  ;;  %v1777_v10 = vpop.trf.xlu0  ;;  %v9789_v31 = vpop.trf.xlu1 }
 0x407   : > { %v9792_v58 = vrot.slane %v5353_v26, %v9230_v33  ;;  %v9795_v62 = vrot.slane %v5360_v61, %v9230_v33  ;;  %v9798_v50 = vrot.slane %v5369_v30, %v9230_v33  ;;  %v9801_v13 = vrot.slane %v5376_v15, %v9230_v33 }
 0x408   : > { %v5617_v60 = vcombine.low %v5561_v29, %v5577_v23  ;;  %v5618_v37 = vcombine.high %v5561_v29, %v5577_v23  ;;  %v5633_v32 = vcombine.low %v9740_v22, %v5584_v7  ;;  %v5634_v35 = vcombine.high %v9740_v22, %v5584_v7 }
 0x409   : > { %v9806_v41 = vrot.slane %v4825_v2, %v9230_v33  ;;  %v9809_v26 = vrot.slane %v4832_v12, %v9230_v33  ;;  %v5890_v61 = vcombine.high %v9576_v1, %v9593_v54  ;;  %v5922_v30 = vcombine.high %v9579_v51, %v9617_v4 }
 0x40a   : > { %v5625_v15 = vrot.slane %v5617_v60, %v9239_v42  ;;  %v5632_v29 = vrot.slane %v5618_v37, %v9239_v42  ;;  %v1778_v38 = vpop.trf.xlu0  ;;  %v9817_v16 = vpop.trf.xlu1  ;;  %v6977_v2 = vcombine.low %v9754_v45, %v9792_v58  ;;  %v7009_v12 = vcombine.low %v9757_v28, %v9795_v62 }
 0x40b   : > { %v5097_v1 = vrot.slane %v5089_v0, %v9239_v42  ;;  %v5104_v51 = vrot.slane %v5090_v36, %v9239_v42  ;;  %v7113_v54 = vcombine.low %v9806_v41, %v9798_v50  ;;  %v7145_v4 = vcombine.low %v9809_v26, %v9801_v13 }
 0x40c   : > { %v9836_v22 = vrot.slane %v5081_v40, %v9230_v33  ;;  %v9839_v53 = vrot.slane %v5088_v14, %v9230_v33  ;;  %v9842_v23 = vrot.slane %v5625_v15, %v9230_v33  ;;  %v9845_v0 = vrot.slane %v5632_v29, %v9230_v33 }
 0x40d   : > { %v5641_v36 = vrot.slane %v5633_v32, %v9239_v42  ;;  %v5648_v40 = vrot.slane %v5634_v35, %v9239_v42  ;;  %v9854_v14 = vrot.slane %v6977_v2, %v9239_v42  ;;  %v9857_v37 = vrot.slane %v7009_v12, %v9239_v42 }
 0x40e   : > { %v1841_v7 = vpop.trf.xlu0  ;;  %v2321_v60 = vpop.trf.xlu1  ;;  %v7249_v15 = vcombine.low %v9836_v22, %v9842_v23  ;;  %v7281_v29 = vcombine.low %v9839_v53, %v9845_v0  ;;  %v9864_v27 = vrot.slane %v7113_v54, %v9239_v42  ;;  %v9867_v32 = vrot.slane %v7145_v4, %v9239_v42 }
 0x40f   : > { %12269 = vst [vmem:[#allocation23_spill] sm:$0xff] %v9854_v14  ;;  %12270 = vst [vmem:[#allocation24_spill] sm:$0xff] %v9857_v37  ;;  %v3697_v39 = vcombine.low %v1777_v10, %v1841_v7  ;;  %v3698_v17 = vcombine.high %v1777_v10, %v1841_v7  ;;  %v9870_v35 = vrot.slane %v5097_v1, %v9230_v33 }
 0x410   : > { %12271 = vst [vmem:[#allocation25_spill] sm:$0xff] %v9864_v27  ;;  %12272 = vst [vmem:[#allocation26_spill] sm:$0xff] %v9867_v32  ;;  %v9873_v2 = vrot.slane %v5104_v51, %v9230_v33  ;;  %8009 = vrot.lane.b32.xlu1 %v5954_v8, %s9026_s4  ;;  %v9880_v10 = vrot.slane %v5890_v61, %v9239_v42  ;;  %v9883_v12 = vrot.slane %v5922_v30, %v9239_v42 }
 0x411   : > { %v3689_v54 = vrot.slane %v3681_v19, %v9230_v33  ;;  %v3696_v1 = vrot.slane %v3682_v46, %v9230_v33  ;;  %v9888_v4 = vrot.slane %v3953_v59, %v9230_v33  ;;  %v9891_v51 = vrot.slane %v3954_v9, %v9230_v33 }
 0x412   : > { %v9894_v7 = vrot.slane %v5641_v36, %v9230_v33  ;;  %v1842_v8 = vpop.trf.xlu0  ;;  %v9896_v63 = vpop.trf.xlu1  ;;  %v7042_v61 = vcombine.high %v9854_v14, %v9857_v37  ;;  %v7114_v30 = vcombine.high %v9806_v41, %v9798_v50  ;;  %v7146_v19 = vcombine.high %v9809_v26, %v9801_v13 }
 0x413   : > { %v9905_v59 = vrot.slane %v5648_v40, %v9230_v33  ;;  %v3705_v9 = vrot.slane %v3697_v39, %v9230_v33  ;;  %v3712_v46 = vrot.slane %v3698_v17, %v9230_v33  ;;  %v7178_v36 = vcombine.high %v9864_v27, %v9867_v32 }
 0x414   : > { %v3969_v44 = vcombine.low %v1778_v38, %v1842_v8  ;;  %v3970_v24 = vcombine.high %v1778_v38, %v1842_v8  ;;  %v4497_v20 = vcombine.low %v9817_v16, %v9896_v63  ;;  %v4498_v50 = vcombine.high %v9817_v16, %v9896_v63  ;;  %8017 = vrot.lane.b32.xlu1 %v7042_v61, %s9026_s4 }
 0x415   : > { %v4225_v13 = vcombine.low %v9789_v31, %v2321_v60  ;;  %v4226_v41 = vcombine.high %v9789_v31, %v2321_v60  ;;  %v9931_v16 = vrot.slane %v7114_v30, %v9239_v42  ;;  %v9934_v31 = vrot.slane %v7146_v19, %v9239_v42 }
 0x416   : > { %v9923_v38 = vrot.slane %v3969_v44, %v9230_v33  ;;  %v9926_v40 = vrot.slane %v3970_v24, %v9230_v33  ;;  %v2289_v17 = vpop.trf.xlu0  ;;  %v9928_v63 = vpop.trf.xlu1  ;;  %v3745_v60 = vcombine.low %v3689_v54, %v3705_v9  ;;  %v3746_v8 = vcombine.high %v3689_v54, %v3705_v9 }
 0x417   : > { %v3761_v61 = vcombine.low %v3696_v1, %v3712_v46  ;;  %v3762_v39 = vcombine.high %v3696_v1, %v3712_v46  ;;  %v9946_v19 = vrot.slane %v7249_v15, %v9239_v42  ;;  %v9949_v54 = vrot.slane %v7281_v29, %v9239_v42 }
 0x418   : > { %8019 = vrot.lane.b32.xlu1 %v7178_v36, %s9026_s4  ;;  %v7250_v1 = vcombine.high %v9836_v22, %v9842_v23  ;;  %v7282_v9 = vcombine.high %v9839_v53, %v9845_v0  ;;  %v4233_v46 = vrot.slane %v4225_v13, %v9230_v33  ;;  %v4240_v26 = vrot.slane %v4226_v41, %v9230_v33 }
 0x419   : > { %12273 = vst [vmem:[#allocation27_spill] sm:$0xff] %v9946_v19  ;;  %12274 = vst [vmem:[#allocation28_spill] sm:$0xff] %v9949_v54  ;;  %v7179_v15 = vcombine.low %v9931_v16, %v9934_v31  ;;  %v7385_v23 = vcombine.low %v9870_v35, %v9894_v7  ;;  %v3753_v0 = vrot.slane %v3745_v60, %v9239_v42 }
 0x41a   : > { %v2290_v24 = vpop.trf.xlu0  ;;  %v9957_v30 = vpop.trf.xlu1  ;;  %v9966_v22 = vrot.slane %v7250_v1, %v9239_v42  ;;  %v9969_v53 = vrot.slane %v7282_v9, %v9239_v42  ;;  %v3760_v13 = vrot.slane %v3746_v8, %v9239_v42  ;;  %v3769_v41 = vrot.slane %v3761_v61, %v9239_v42 }
 0x41b   : > { %v3776_v44 = vrot.slane %v3762_v39, %v9239_v42  ;;  %v9984_v9 = vrot.slane %v7385_v23, %v9239_v42  ;;  %v7417_v60 = vcombine.low %v9873_v2, %v9905_v59  ;;  %v7386_v36 = vcombine.high %v9870_v35, %v9894_v7 }
 0x41c   : > { %12275 = vst [vmem:[#allocation29_spill] sm:$0xff] %v9966_v22  ;;  %12276 = vst [vmem:[#allocation30_spill] sm:$0xff] %v9969_v53  ;;  %8043 = vrot.lane.b32.xlu1 %v6091_v5, %s9027_s6  ;;  %v7418_v5 = vcombine.high %v9873_v2, %v9905_v59  ;;  %v10001_v29 = vrot.slane %v4497_v20, %v9230_v33  ;;  %v10004_v8 = vrot.slane %v4498_v50, %v9230_v33 }
 0x41d   : > { %12277 = vst [vmem:[#allocation31_spill] sm:$0xff] %v9984_v9  ;;  %v10008_v35 = vrot.slane %v7417_v60, %v9239_v42  ;;  %v10011_v2 = vrot.slane %v7386_v36, %v9239_v42  ;;  %v10019_v59 = vrot.slane %v3753_v0, %v9230_v33  ;;  %v10022_v50 = vrot.slane %v3760_v13, %v9230_v33 }
 0x41e   : > { %v2353_v61 = vpop.trf.xlu0  ;;  %v9990_v39 = vpop.trf.xlu1  ;;  %v10014_v7 = vrot.slane %v7418_v5, %v9239_v42  ;;  %v12281_v0 = vcombine.high %v9596_v55, %v9599_v3 }
 0x41f   : > { %v4241_v43 = vcombine.low %v2289_v17, %v2353_v61  ;;  %v4242_v6 = vcombine.high %v2289_v17, %v2353_v61  ;;  %12278 = vst [vmem:[#allocation32_spill] sm:$0xff] %v10008_v35  ;;  %12279 = vst [vmem:[#allocation33_spill] sm:$0xff] %v10011_v2 }
 0x420   : > { %8051 = vrot.lane.b32.xlu1 %v7179_v15, %s9027_s6  ;;  %12280 = vst [vmem:[#allocation34_spill] sm:$0xff] %v10014_v7 }
 0x421   : > { %v4249_v17 = vrot.slane %v4241_v43, %v9230_v33  ;;  %v4256_v15 = vrot.slane %v4242_v6, %v9230_v33 }
 0x422   : > { %v2354_v60 = vpop.trf.xlu0  ;;  %v10026_v61 = vpop.trf.xlu1 }
 0x423   : > { %v4289_v20 = vcombine.low %v4233_v46, %v4249_v17  ;;  %v4290_v23 = vcombine.high %v4233_v46, %v4249_v17  ;;  %v4305_v43 = vcombine.low %v4240_v26, %v4256_v15  ;;  %v4306_v1 = vcombine.high %v4240_v26, %v4256_v15 }
 0x424   : > { %v4513_v6 = vcombine.low %v2290_v24, %v2354_v60  ;;  %v4514_v32 = vcombine.high %v2290_v24, %v2354_v60  ;;  %8075 = vrot.lane.b32.xlu1 %v12281_v0, %s9028_s7  ;;  %v10049_v17 = vrot.slane %v3769_v41, %v9230_v33  ;;  %v10052_v15 = vrot.slane %v3776_v44, %v9230_v33 }
 0x425   : > { %v4297_v13 = vrot.slane %v4289_v20, %v9239_v42  ;;  %v4304_v46 = vrot.slane %v4290_v23, %v9239_v42  ;;  %v4313_v26 = vrot.slane %v4305_v43, %v9239_v42  ;;  %v4320_v24 = vrot.slane %v4306_v1, %v9239_v42 }
 0x426   : > { %v4521_v60 = vrot.slane %v4513_v6, %v9230_v33  ;;  %v4528_v5 = vrot.slane %v4514_v32, %v9230_v33  ;;  %v10056_v55 = vpop.trf.xlu0  ;;  %v10058_v3 = vpop.trf.xlu1 }
 0x427   : > { %v10061_v23 = vrot.slane %v4297_v13, %v9230_v33  ;;  %v10064_v20 = vrot.slane %v4304_v46, %v9230_v33  ;;  %v10067_v41 = vrot.slane %v4313_v26, %v9230_v33  ;;  %v10070_v44 = vrot.slane %v4320_v24, %v9230_v33 }
 0x428   : > { %v4561_v1 = vcombine.low %v10001_v29, %v4521_v60  ;;  %v4562_v32 = vcombine.high %v10001_v29, %v4521_v60  ;;  %v4577_v0 = vcombine.low %v10004_v8, %v4528_v5  ;;  %v4578_v43 = vcombine.high %v10004_v8, %v4528_v5 }
 0x429   : > { %v12282_v13 = vcombine.high %v9931_v16, %v9934_v31  ;;  %v6041_v6 = vcombine.low %v10049_v17, %v10067_v41  ;;  %v6073_v46 = vcombine.low %v10052_v15, %v10070_v44  ;;  %v12283_v26 = vcombine.high %v9754_v45, %v9792_v58 }
 0x42a   : > { %v12284_v8 = vcombine.high %v9757_v28, %v9795_v62  ;;  %v10096_v16 = vpop.trf.xlu0  ;;  %v10098_v31 = vpop.trf.xlu1  ;;  %v5955_v24 = vcombine.low %v9880_v10, %v9883_v12  ;;  %v5905_v45 = vcombine.low %v10019_v59, %v10061_v23  ;;  %v5937_v58 = vcombine.low %v10022_v50, %v10064_v20 }
 0x42b   : > { %8083 = vrot.lane.b32.xlu1 %v12282_v13, %s9028_s7  ;;  %v10088_v29 = vrot.slane %v12283_v26, %v9239_v42  ;;  %v12285_v28 = vcombine.low %v9888_v4, %v9923_v38  ;;  %v12286_v13 = vcombine.high %v9888_v4, %v9923_v38  ;;  %v10121_v60 = vrot.slane %v6041_v6, %v9239_v42 }
 0x42c   : > { %v10094_v5 = vrot.slane %v12284_v8, %v9239_v42  ;;  %v12287_v8 = vcombine.high %v9638_v49, %v9641_v56  ;;  %v10124_v36 = vrot.slane %v6073_v46, %v9239_v42  ;;  %v12289_v4 = vcombine.high %v9891_v51, %v9926_v40 }
 0x42d   : > { %v4025_v62 = vrot.slane %v12285_v28, %v9239_v42  ;;  %v4032_v26 = vrot.slane %v12286_v13, %v9239_v42  ;;  %v12288_v28 = vcombine.low %v9891_v51, %v9926_v40  ;;  %v4769_v13 = vcombine.low %v9928_v63, %v9990_v39 }
 0x42e   : > { %8011 = vrot.lane.b32.xlu0 %v12287_v8, %s9026_s4  ;;  %v4048_v38 = vrot.slane %v12289_v4, %v9239_v42  ;;  %v4770_v6 = vcombine.high %v9928_v63, %v9990_v39  ;;  %v4569_v8 = vrot.slane %v4561_v1, %v9239_v42  ;;  %v4576_v46 = vrot.slane %v4562_v32, %v9239_v42  ;;  %v2865_v40 = vpop.trf.xlu0  ;;  %v10146_v4 = vpop.trf.xlu1 }
 0x42f   : > { %v4041_v27 = vrot.slane %v12288_v28, %v9239_v42  ;;  %v6093_v56 = vcombine.low %v10121_v60, %v10124_v36  ;;  %v7043_v28 = vcombine.low %v10088_v29, %v10094_v5  ;;  %v4585_v49 = vrot.slane %v4577_v0, %v9239_v42 }
 0x430   : > { %v4592_v51 = vrot.slane %v4578_v43, %v9239_v42  ;;  %v10149_v37 = vrot.slane %v5905_v45, %v9239_v42  ;;  %v10152_v63 = vrot.slane %v5937_v58, %v9239_v42  ;;  %v10155_v39 = vrot.slane %v4025_v62, %v9230_v33 }
 0x431   : > { %v10158_v1 = vrot.slane %v4032_v26, %v9230_v33  ;;  %v4785_v32 = vcombine.low %v10056_v55, %v2865_v40  ;;  %v7044_v0 = vcombine.high %v10088_v29, %v10094_v5  ;;  %v10165_v43 = vrot.slane %v4041_v27, %v9230_v33  ;;  %8107 = vrot.lane.b32.xlu1 %v6093_v56, %s9029_s21 }
 0x432   : > { %8041 = vrot.lane.b32.xlu0 %v5955_v24, %s9027_s6  ;;  %v10168_v45 = vrot.slane %v4048_v38, %v9230_v33  ;;  %v10171_v58 = vrot.slane %v4769_v13, %v9230_v33  ;;  %v10174_v62 = vrot.slane %v4770_v6, %v9230_v33  ;;  %v10178_v24 = vrot.slane %v4569_v8, %v9230_v33  ;;  %v2866_v8 = vpop.trf.xlu0 }
 0x433   : > { %v10181_v29 = vrot.slane %v4576_v46, %v9230_v33  ;;  %v12290_v27 = vcombine.low %v9957_v30, %v10026_v61  ;;  %v12291_v26 = vcombine.high %v9957_v30, %v10026_v61  ;;  %v10196_v56 = vrot.slane %v4585_v49, %v9230_v33  ;;  %v10202_v46 = vpop.trf.xlu1 }
 0x434   : > { %v10199_v13 = vrot.slane %v4592_v51, %v9230_v33  ;;  %v4786_v6 = vcombine.high %v10056_v55, %v2865_v40  ;;  %v4793_v14 = vrot.slane %v4785_v32, %v9230_v33  ;;  %v6042_v30 = vcombine.high %v10049_v17, %v10067_v41 }
 0x435   : > { %v10187_v5 = vrot.slane %v12290_v27, %v9230_v33  ;;  %v10193_v38 = vrot.slane %v12291_v26, %v9230_v33  ;;  %v5957_v27 = vcombine.low %v10149_v37, %v10152_v63  ;;  %v6074_v49 = vcombine.high %v10052_v15, %v10070_v44 }
 0x436   : > { %8049 = vrot.lane.b32.xlu0 %v7043_v28, %s9027_s6  ;;  %v5906_v61 = vcombine.high %v10019_v59, %v10061_v23  ;;  %v5057_v55 = vcombine.low %v10096_v16, %v2866_v8  ;;  %v5058_v51 = vcombine.high %v10096_v16, %v2866_v8  ;;  %v5585_v40 = vcombine.low %v10098_v31, %v10202_v46 }
 0x437   : > { %v5586_v32 = vcombine.high %v10098_v31, %v10202_v46  ;;  %v5313_v28 = vcombine.low %v10058_v3, %v10146_v4  ;;  %v5938_v59 = vcombine.high %v10022_v50, %v10064_v20  ;;  %v4800_v23 = vrot.slane %v4786_v6, %v9230_v33  ;;  %v3313_v31 = vpop.trf.xlu0  ;;  %v10237_v26 = vpop.trf.xlu1 }
 0x438   : > { %v5314_v41 = vcombine.high %v10058_v3, %v10146_v4  ;;  %v10232_v44 = vrot.slane %v5057_v55, %v9230_v33  ;;  %v10235_v16 = vrot.slane %v5058_v51, %v9230_v33  ;;  %v4833_v8 = vcombine.low %v10171_v58, %v4793_v14 }
 0x439   : > { %v12292_v50 = vcombine.high %v9880_v10, %v9883_v12  ;;  %v10245_v20 = vrot.slane %v6042_v30, %v9239_v42  ;;  %v10248_v3 = vrot.slane %v6074_v49, %v9239_v42  ;;  %v10251_v4 = vrot.slane %v5906_v61, %v9239_v42 }
 0x43a   : > { %v6313_v12 = vcombine.low %v10165_v43, %v10196_v56  ;;  %v6345_v30 = vcombine.low %v10168_v45, %v10199_v13  ;;  %v6177_v49 = vcombine.low %v10155_v39, %v10178_v24  ;;  %v6209_v61 = vcombine.low %v10158_v1, %v10181_v29 }
 0x43b   : > { %8073 = vrot.lane.b32.xlu0 %v12292_v50, %s9028_s7  ;;  %v4834_v51 = vcombine.high %v10171_v58, %v4793_v14  ;;  %v4849_v50 = vcombine.low %v10174_v62, %v4800_v23  ;;  %v4850_v15 = vcombine.high %v10174_v62, %v4800_v23  ;;  %v3314_v17 = vpop.trf.xlu0  ;;  %v10272_v10 = vpop.trf.xlu1  ;;  %v10275_v55 = vrot.slane %v5938_v59, %v9239_v42 }
 0x43c   : > { %v10279_v46 = vrot.slane %v6313_v12, %v9239_v42  ;;  %v10282_v6 = vrot.slane %v6345_v30, %v9239_v42  ;;  %v10285_v14 = vrot.slane %v6177_v49, %v9239_v42  ;;  %v10288_v58 = vrot.slane %v6209_v61, %v9239_v42 }
 0x43d   : > { %v4841_v62 = vrot.slane %v4833_v8, %v9239_v42  ;;  %v5321_v23 = vrot.slane %v5313_v28, %v9230_v33  ;;  %v5328_v59 = vrot.slane %v5314_v41, %v9230_v33  ;;  %v4848_v8 = vrot.slane %v4834_v51, %v9239_v42 }
 0x43e   : > { %12293 = vst [vmem:[#allocation35_spill] sm:$0xff] %v10279_v46  ;;  %12294 = vst [vmem:[#allocation36_spill] sm:$0xff] %v10282_v6  ;;  %v6178_v41 = vcombine.high %v10155_v39, %v10178_v24  ;;  %v6210_v12 = vcombine.high %v10158_v1, %v10181_v29  ;;  %v4864_v49 = vrot.slane %v4850_v15, %v9239_v42 }
 0x43f   : > { %8081 = vrot.lane.b32.xlu0 %v7044_v0, %s9028_s7  ;;  %12295 = vst [vmem:[#allocation37_spill] sm:$0xff] %v10285_v14  ;;  %12296 = vst [vmem:[#allocation38_spill] sm:$0xff] %v10288_v58  ;;  %v3377_v28 = vpop.trf.xlu0  ;;  %v10304_v25 = vpop.trf.xlu1  ;;  %v4857_v0 = vrot.slane %v4849_v50, %v9239_v42  ;;  %v5593_v51 = vrot.slane %v5585_v40, %v9230_v33  ;;  %v10325_v24 = vrot.slane %v4841_v62, %v9230_v33 }
 0x440   : > { %v5329_v58 = vcombine.low %v3313_v31, %v3377_v28  ;;  %v5330_v61 = vcombine.high %v3313_v31, %v3377_v28  ;;  %v10317_v14 = vrot.slane %v6178_v41, %v9239_v42  ;;  %v10320_v39 = vrot.slane %v6210_v12, %v9239_v42 }
 0x441   : > { %v5600_v29 = vrot.slane %v5586_v32, %v9230_v33  ;;  %v10331_v40 = vrot.slane %v4848_v8, %v9230_v33 }
 0x442   : > { %12297 = vst [vmem:[#allocation39_spill] sm:$0xff] %v10317_v14  ;;  %12298 = vst [vmem:[#allocation40_spill] sm:$0xff] %v10320_v39  ;;  %v5337_v15 = vrot.slane %v5329_v58, %v9230_v33  ;;  %v12302_v39 = vcombine.high %v10193_v38, %v10235_v16 }
 0x443   : > { %8105 = vrot.lane.b32.xlu0 %v5957_v27, %s9029_s21  ;;  %v5344_v27 = vrot.slane %v5330_v61, %v9230_v33  ;;  %v3378_v31 = vpop.trf.xlu0  ;;  %v10333_v50 = vpop.trf.xlu1 }
 0x444   : > { %v5377_v32 = vcombine.low %v5321_v23, %v5337_v15  ;;  %v5378_v41 = vcombine.high %v5321_v23, %v5337_v15  ;;  %v5601_v61 = vcombine.low %v3314_v17, %v3378_v31  ;;  %v5602_v30 = vcombine.high %v3314_v17, %v3378_v31 }
 0x445   : > { %v5393_v58 = vcombine.low %v5328_v59, %v5344_v27  ;;  %v5394_v1 = vcombine.high %v5328_v59, %v5344_v27  ;;  %v4057_v8 = vcombine.low %v10272_v10, %v10333_v50  ;;  %v4058_v6 = vcombine.high %v10272_v10, %v10333_v50 }
 0x446   : > { %v5385_v12 = vrot.slane %v5377_v32, %v9239_v42  ;;  %v5392_v46 = vrot.slane %v5378_v41, %v9239_v42  ;;  %v10350_v23 = vrot.slane %v4857_v0, %v9230_v33  ;;  %v10353_v59 = vrot.slane %v4864_v49, %v9230_v33 }
 0x447   : > { %v5401_v28 = vrot.slane %v5393_v58, %v9239_v42  ;;  %v5408_v62 = vrot.slane %v5394_v1, %v9239_v42  ;;  %v5609_v17 = vrot.slane %v5601_v61, %v9230_v33  ;;  %v5616_v15 = vrot.slane %v5602_v30, %v9230_v33  ;;  %v10357_v27 = vpop.trf.xlu0  ;;  %v10359_v10 = vpop.trf.xlu1 }
 0x448   : > { %v10362_v31 = vrot.slane %v5385_v12, %v9230_v33  ;;  %v10365_v50 = vrot.slane %v5392_v46, %v9230_v33  ;;  %v5136_v14 = vrot.slane %v12302_v39, %v9239_v42 }
 0x449   : > { %v10368_v0 = vrot.slane %v5401_v28, %v9230_v33  ;;  %v10371_v49 = vrot.slane %v5408_v62, %v9230_v33  ;;  %v5649_v1 = vcombine.low %v5593_v51, %v5609_v17  ;;  %v5650_v32 = vcombine.high %v5593_v51, %v5609_v17 }
 0x44a   : > { %v5665_v41 = vcombine.low %v5600_v29, %v5616_v15  ;;  %v5666_v30 = vcombine.high %v5600_v29, %v5616_v15  ;;  %v6993_v46 = vcombine.low %v10325_v24, %v10362_v31  ;;  %v7025_v28 = vcombine.low %v10331_v40, %v10365_v50 }
 0x44b   : > { %v7129_v58 = vcombine.low %v10350_v23, %v10368_v0  ;;  %v7161_v12 = vcombine.low %v10353_v59, %v10371_v49  ;;  %v12299_v62 = vcombine.low %v10187_v5, %v10232_v44  ;;  %v12300_v51 = vcombine.high %v10187_v5, %v10232_v44  ;;  %v1906_v7 = vpop.trf.xlu0  ;;  %v10397_v2 = vpop.trf.xlu1 }
 0x44c   : > { %v12301_v17 = vcombine.low %v10193_v38, %v10235_v16  ;;  %v10402_v5 = vrot.slane %v6993_v46, %v9239_v42  ;;  %v10405_v44 = vrot.slane %v7025_v28, %v9239_v42  ;;  %v5664_v39 = vrot.slane %v5650_v32, %v9239_v42 }
 0x44d   : > { %v5113_v61 = vrot.slane %v12299_v62, %v9239_v42  ;;  %v5120_v29 = vrot.slane %v12300_v51, %v9239_v42  ;;  %v7137_v62 = vrot.slane %v7129_v58, %v9239_v42  ;;  %v7169_v21 = vrot.slane %v7161_v12, %v9239_v42 }
 0x44e   : > { %v5129_v15 = vrot.slane %v12301_v17, %v9239_v42  ;;  %v3785_v51 = vcombine.low %v10237_v26, %v10304_v25  ;;  %v5657_v17 = vrot.slane %v5649_v1, %v9239_v42  ;;  %v7045_v12 = vcombine.low %v10402_v5, %v10405_v44 }
 0x44f   : > { %v7181_v58 = vcombine.low %v7137_v62, %v7169_v21  ;;  %v10420_v28 = vrot.slane %v5113_v61, %v9230_v33  ;;  %v10423_v1 = vrot.slane %v5120_v29, %v9230_v33  ;;  %v5673_v38 = vrot.slane %v5665_v41, %v9239_v42  ;;  %v1969_v16 = vpop.trf.xlu0  ;;  %v2449_v53 = vpop.trf.xlu1 }
 0x450   : > { %v5680_v48 = vrot.slane %v5666_v30, %v9239_v42  ;;  %v10428_v32 = vrot.slane %v5129_v15, %v9230_v33  ;;  %v10431_v22 = vrot.slane %v5136_v14, %v9230_v33  ;;  %v3786_v46 = vcombine.high %v10237_v26, %v10304_v25  ;;  %8113 = vrot.lane.b32.xlu0 %v7045_v12, %s9029_s21 }
 0x451   : > { %8115 = vrot.lane.b32.xlu1 %v7181_v58, %s9029_s21  ;;  %v12303_v61 = vcombine.high %v10165_v43, %v10196_v56  ;;  %v10443_v30 = vrot.slane %v3785_v51, %v9230_v33  ;;  %v10446_v29 = vrot.slane %v5657_v17, %v9230_v33  ;;  %v10449_v14 = vrot.slane %v4057_v8, %v9230_v33 }
 0x452   : > { %v10452_v15 = vrot.slane %v4058_v6, %v9230_v33  ;;  %v10456_v25 = vrot.slane %v5664_v39, %v9230_v33  ;;  %v7130_v43 = vcombine.high %v10350_v23, %v10368_v0  ;;  %v7162_v56 = vcombine.high %v10353_v59, %v10371_v49 }
 0x453   : > { %v10440_v41 = vrot.slane %v12303_v61, %v9239_v42  ;;  %v6994_v26 = vcombine.high %v10325_v24, %v10362_v31  ;;  %v10465_v8 = vrot.slane %v5673_v38, %v9230_v33  ;;  %v10468_v6 = vrot.slane %v5680_v48, %v9230_v33  ;;  %v1970_v17 = vpop.trf.xlu0  ;;  %v10471_v39 = vpop.trf.xlu1 }
 0x454   : > { %v3801_v51 = vcombine.low %v10357_v27, %v1969_v16  ;;  %v7026_v23 = vcombine.high %v10331_v40, %v10365_v50  ;;  %v3802_v0 = vcombine.high %v10357_v27, %v1969_v16  ;;  %v4329_v59 = vcombine.low %v10359_v10, %v2449_v53 }
 0x455   : > { %v12304_v24 = vcombine.high %v10121_v60, %v10124_v36  ;;  %v7182_v48 = vcombine.high %v7137_v62, %v7169_v21  ;;  %v7046_v31 = vcombine.high %v10402_v5, %v10405_v44  ;;  %v4073_v49 = vcombine.low %v1906_v7, %v1970_v17 }
 0x456   : > { %v4074_v38 = vcombine.high %v1906_v7, %v1970_v17  ;;  %v4601_v58 = vcombine.low %v10397_v2, %v10471_v39  ;;  %v4602_v40 = vcombine.high %v10397_v2, %v10471_v39  ;;  %v12305_v27 = vcombine.high %v10149_v37, %v10152_v63 }
 0x457   : > { %8139 = vrot.lane.b32.xlu1 %v12304_v24, %s9030_s17  ;;  %v4330_v36 = vcombine.high %v10359_v10, %v2449_v53  ;;  %v10493_v21 = vrot.slane %v7130_v43, %v9239_v42  ;;  %v10496_v60 = vrot.slane %v7162_v56, %v9239_v42  ;;  %v10499_v7 = vrot.slane %v6994_v26, %v9239_v42  ;;  %v2417_v37 = vpop.trf.xlu0  ;;  %v10508_v63 = vpop.trf.xlu1 }
 0x458   : > { %8137 = vrot.lane.b32.xlu0 %v12305_v27, %s9030_s17  ;;  %v3809_v50 = vrot.slane %v3801_v51, %v9230_v33  ;;  %v10503_v62 = vrot.slane %v4073_v49, %v9230_v33  ;;  %v10506_v5 = vrot.slane %v4074_v38, %v9230_v33  ;;  %v10511_v53 = vrot.slane %v7026_v23, %v9239_v42 }
 0x459   : > { %v3800_v10 = vrot.slane %v3786_v46, %v9230_v33  ;;  %v3816_v44 = vrot.slane %v3802_v0, %v9230_v33  ;;  %v10516_v16 = vrot.slane %v4329_v59, %v9230_v33  ;;  %v12306_v12 = vcombine.high %v10168_v45, %v10199_v13 }
 0x45a   : > { %v4121_v43 = vcombine.low %v10449_v14, %v10503_v62  ;;  %v7401_v51 = vcombine.low %v10428_v32, %v10465_v8  ;;  %v7433_v45 = vcombine.low %v10431_v22, %v10468_v6  ;;  %v7265_v13 = vcombine.low %v10420_v28, %v10446_v29 }
 0x45b   : > { %8147 = vrot.lane.b32.xlu1 %v7182_v48, %s9030_s17  ;;  %v10523_v61 = vrot.slane %v12306_v12, %v9239_v42  ;;  %v7297_v17 = vcombine.low %v10423_v1, %v10456_v25  ;;  %v3849_v23 = vcombine.low %v10443_v30, %v3809_v50  ;;  %v4344_v0 = vrot.slane %v4330_v36, %v9230_v33  ;;  %v10544_v59 = vpop.trf.xlu0  ;;  %v10546_v24 = vpop.trf.xlu1 }
 0x45c   : > { %8145 = vrot.lane.b32.xlu0 %v7046_v31, %s9030_s17  ;;  %v7183_v48 = vcombine.low %v10493_v21, %v10496_v60  ;;  %v7047_v31 = vcombine.low %v10499_v7, %v10511_v53  ;;  %v12307_v49 = vcombine.low %v10245_v20, %v10248_v3  ;;  %v10557_v38 = vrot.slane %v7401_v51, %v9239_v42 }
 0x45d   : > { %v10560_v27 = vrot.slane %v7433_v45, %v9239_v42  ;;  %v10563_v36 = vrot.slane %v7265_v13, %v9239_v42  ;;  %v10566_v12 = vrot.slane %v7297_v17, %v9239_v42  ;;  %v3850_v26 = vcombine.high %v10443_v30, %v3809_v50 }
 0x45e   : > { %v3865_v46 = vcombine.low %v3800_v10, %v3816_v44  ;;  %v3866_v56 = vcombine.high %v3800_v10, %v3816_v44  ;;  %v7184_v51 = vcombine.high %v10493_v21, %v10496_v60  ;;  %v7266_v21 = vcombine.high %v10420_v28, %v10446_v29 }
 0x45f   : > { %8171 = vrot.lane.b32.xlu1 %v12307_v49, %s9031_s19  ;;  %v12308_v49 = vcombine.low %v10251_v4, %v10275_v55  ;;  %v2481_v50 = vpop.trf.xlu0  ;;  %v10583_v10 = vpop.trf.xlu1  ;;  %v7298_v60 = vcombine.high %v10423_v1, %v10456_v25  ;;  %v3857_v17 = vrot.slane %v3849_v23, %v9239_v42  ;;  %v7048_v30 = vcombine.high %v10499_v7, %v10511_v53 }
 0x460   : > { %v4345_v13 = vcombine.low %v2417_v37, %v2481_v50  ;;  %v4346_v45 = vcombine.high %v2417_v37, %v2481_v50  ;;  %v3864_v44 = vrot.slane %v3850_v26, %v9239_v42  ;;  %v10600_v28 = vrot.slane %v7266_v21, %v9239_v42 }
 0x461   : > { %8169 = vrot.lane.b32.xlu0 %v12308_v49, %s9031_s19  ;;  %v7402_v49 = vcombine.high %v10428_v32, %v10465_v8  ;;  %v10603_v1 = vrot.slane %v7298_v60, %v9239_v42  ;;  %v7434_v29 = vcombine.high %v10431_v22, %v10468_v6  ;;  %v3873_v25 = vrot.slane %v3865_v46, %v9239_v42 }
 0x462   : > { %12309 = vst [vmem:[#allocation41_spill] sm:$0xff] %v10600_v28  ;;  %v3880_v37 = vrot.slane %v3866_v56, %v9239_v42  ;;  %v4353_v23 = vrot.slane %v4345_v13, %v9230_v33  ;;  %v4360_v7 = vrot.slane %v4346_v45, %v9230_v33  ;;  %v4609_v53 = vrot.slane %v4601_v58, %v9230_v33  ;;  %v12330_v56 = vld [vmem:[#allocation33_spill] sm:$0xff] }
 0x463   : > { %8179 = vrot.lane.b32.xlu1 %v7183_v48, %s9031_s19  ;;  %12310 = vst [vmem:[#allocation42_spill] sm:$0xff] %v10603_v1  ;;  %v10619_v26 = vrot.slane %v4602_v40, %v9230_v33  ;;  %v2482_v48 = vpop.trf.xlu0  ;;  %v12311_v2 = vcombine.high %v10245_v20, %v10248_v3  ;;  %v12321_v6 = vcombine.low %v9713_v11, %v9716_v34 }
 0x464   : > { %v4393_v45 = vcombine.low %v10516_v16, %v4353_v23  ;;  %v4394_v13 = vcombine.high %v10516_v16, %v4353_v23  ;;  %v4409_v58 = vcombine.low %v4344_v0, %v4360_v7  ;;  %v4410_v50 = vcombine.high %v4344_v0, %v4360_v7 }
 0x465   : > { %8177 = vrot.lane.b32.xlu0 %v7047_v31, %s9031_s19  ;;  %v10621_v31 = vpop.trf.xlu1  ;;  %v4617_v39 = vcombine.low %v10544_v59, %v2482_v48  ;;  %v4618_v40 = vcombine.high %v10544_v59, %v2482_v48  ;;  %v12312_v16 = vcombine.high %v10251_v4, %v10275_v55  ;;  %v4129_v59 = vrot.slane %v4121_v43, %v9239_v42 }
 0x466   : > { %v5145_v21 = vcombine.low %v10546_v24, %v10621_v31  ;;  %v5146_v60 = vcombine.high %v10546_v24, %v10621_v31  ;;  %v4401_v0 = vrot.slane %v4393_v45, %v9239_v42  ;;  %v4408_v20 = vrot.slane %v4394_v13, %v9239_v42 }
 0x467   : > { %8203 = vrot.lane.b32.xlu1 %v12311_v2, %s9032_s8  ;;  %v4417_v3 = vrot.slane %v4409_v58, %v9239_v42  ;;  %v4424_v23 = vrot.slane %v4410_v50, %v9239_v42  ;;  %v12313_v24 = vcombine.high %v10449_v14, %v10503_v62  ;;  %v4625_v4 = vrot.slane %v4617_v39, %v9230_v33  ;;  %v10657_v48 = vpop.trf.xlu0 }
 0x468   : > { %v4632_v55 = vrot.slane %v4618_v40, %v9230_v33  ;;  %v12314_v45 = vcombine.low %v10452_v15, %v10506_v5  ;;  %v12315_v43 = vcombine.high %v10452_v15, %v10506_v5  ;;  %v10670_v14 = vrot.slane %v4401_v0, %v9230_v33 }
 0x469   : > { %8201 = vrot.lane.b32.xlu0 %v12312_v16, %s9032_s8  ;;  %v4136_v7 = vrot.slane %v12313_v24, %v9239_v42  ;;  %v10659_v31 = vpop.trf.xlu1  ;;  %v10673_v62 = vrot.slane %v4408_v20, %v9230_v33  ;;  %v4665_v50 = vcombine.low %v4609_v53, %v4625_v4  ;;  %v4666_v2 = vcombine.high %v4609_v53, %v4625_v4 }
 0x46a   : > { %v4145_v13 = vrot.slane %v12314_v45, %v9239_v42  ;;  %v4152_v58 = vrot.slane %v12315_v43, %v9239_v42  ;;  %v4681_v39 = vcombine.low %v10619_v26, %v4632_v55  ;;  %v4682_v40 = vcombine.high %v10619_v26, %v4632_v55 }
 0x46b   : > { %8211 = vrot.lane.b32.xlu1 %v7184_v51, %s9032_s8  ;;  %v6529_v16 = vrot.slane %v4417_v3, %v9230_v33  ;;  %v6561_v15 = vrot.slane %v4424_v23, %v9230_v33  ;;  %v4873_v5 = vcombine.low %v10508_v63, %v10583_v10  ;;  %v10684_v0 = vrot.slane %v3857_v17, %v9230_v33  ;;  %v2930_v20 = vpop.trf.xlu0 }
 0x46c   : > { %v10687_v51 = vrot.slane %v3864_v44, %v9230_v33  ;;  %v4874_v53 = vcombine.high %v10508_v63, %v10583_v10  ;;  %v6545_v3 = vrot.slane %v3880_v37, %v9230_v33  ;;  %v10696_v23 = vrot.slane %v4129_v59, %v9230_v33 }
 0x46d   : > { %8209 = vrot.lane.b32.xlu0 %v7048_v30, %s9032_s8  ;;  %v10691_v26 = vpop.trf.xlu1  ;;  %v6513_v30 = vrot.slane %v3873_v25, %v9230_v33  ;;  %v10699_v24 = vrot.slane %v4136_v7, %v9230_v33  ;;  %v12316_v17 = vcombine.high %v9697_v47, %v9710_v57  ;;  %v10706_v63 = vrot.slane %v4145_v13, %v9230_v33 }
 0x46e   : > { %v10709_v10 = vrot.slane %v4152_v58, %v9230_v33  ;;  %v12317_v44 = vcombine.high %v9946_v19, %v9949_v54  ;;  %v6433_v25 = vcombine.low %v10684_v0, %v10670_v14  ;;  %v6465_v37 = vcombine.low %v10687_v51, %v10673_v62 }
 0x46f   : > { %8013 = vrot.lane.b32.xlu1 %v12316_v17, %s9026_s4  ;;  %v10720_v59 = vrot.slane %v4873_v5, %v9230_v33  ;;  %v6569_v7 = vcombine.low %v6513_v30, %v6529_v16  ;;  %v6601_v4 = vcombine.low %v6545_v3, %v6561_v15  ;;  %v10726_v55 = vrot.slane %v7402_v49, %v9239_v42  ;;  %v2993_v58 = vpop.trf.xlu0 }
 0x470   : > { %v10729_v45 = vrot.slane %v4874_v53, %v9230_v33  ;;  %v4673_v13 = vrot.slane %v4665_v50, %v9239_v42  ;;  %v4680_v43 = vrot.slane %v4666_v2, %v9239_v42  ;;  %v10739_v5 = vrot.slane %v7434_v29, %v9239_v42 }
 0x471   : > { %8021 = vrot.lane.b32.xlu0 %v12317_v44, %s9026_s4  ;;  %12318 = vst [vmem:[#allocation43_spill] sm:$0xff] %v10726_v55  ;;  %v10733_v17 = vpop.trf.xlu1  ;;  %v4689_v32 = vrot.slane %v4681_v39, %v9239_v42  ;;  %v4696_v8 = vrot.slane %v4682_v40, %v9239_v42  ;;  %v4889_v49 = vcombine.low %v10657_v48, %v2993_v58 }
 0x472   : > { %12319 = vst [vmem:[#allocation44_spill] sm:$0xff] %v10739_v5  ;;  %v4890_v53 = vcombine.high %v10657_v48, %v2993_v58  ;;  %v12320_v50 = vcombine.high %v9728_v18, %v9743_v52  ;;  %v10750_v2 = vrot.slane %v5145_v21, %v9230_v33  ;;  %v10753_v22 = vrot.slane %v5146_v60, %v9230_v33 }
 0x473   : > { %v10760_v29 = vrot.slane %v6433_v25, %v9239_v42  ;;  %v10763_v48 = vrot.slane %v6465_v37, %v9239_v42  ;;  %v10766_v39 = vrot.slane %v6569_v7, %v9239_v42  ;;  %v10769_v21 = vrot.slane %v6601_v4, %v9239_v42 }
 0x474   : > { %8015 = vrot.lane.b32.xlu1 %v12320_v50, %s9026_s4  ;;  %v6570_v40 = vcombine.high %v6513_v30, %v6529_v16  ;;  %v6602_v60 = vcombine.high %v6545_v3, %v6561_v15  ;;  %v10772_v44 = vrot.slane %v4673_v13, %v9230_v33  ;;  %v10775_v58 = vrot.slane %v4680_v43, %v9230_v33  ;;  %v2994_v50 = vpop.trf.xlu0  ;;  %v12324_v43 = vld [vmem:[#allocation30_spill] sm:$0xff] }
 0x475   : > { %8045 = vrot.lane.b32.xlu0 %v12321_v6, %s9027_s6  ;;  %v10777_v25 = vpop.trf.xlu1  ;;  %v6434_v37 = vcombine.high %v10684_v0, %v10670_v14  ;;  %v6466_v7 = vcombine.high %v10687_v51, %v10673_v62  ;;  %v10784_v4 = vrot.slane %v4689_v32, %v9230_v33  ;;  %v10787_v16 = vrot.slane %v4696_v8, %v9230_v33  ;;  %v12323_v51 = vld [vmem:[#allocation29_spill] sm:$0xff] }
 0x476   : > { %v4897_v15 = vrot.slane %v4889_v49, %v9230_v33  ;;  %v4904_v30 = vrot.slane %v4890_v53, %v9230_v33  ;;  %v12322_v3 = vcombine.high %v9984_v9, %v10008_v35  ;;  %v5161_v13 = vcombine.low %v2930_v20, %v2994_v50  ;;  %v12331_v35 = vld [vmem:[#allocation34_spill] sm:$0xff] }
 0x477   : > { %v5162_v14 = vcombine.high %v2930_v20, %v2994_v50  ;;  %v5689_v62 = vcombine.low %v10691_v26, %v10777_v25  ;;  %v5690_v0 = vcombine.high %v10691_v26, %v10777_v25  ;;  %v12325_v32 = vcombine.low %v12323_v51, %v12324_v43 }
 0x478   : > { %8023 = vrot.lane.b32.xlu1 %v12322_v3, %s9026_s4  ;;  %v5417_v8 = vcombine.low %v10659_v31, %v10733_v17  ;;  %v5418_v49 = vcombine.high %v10659_v31, %v10733_v17  ;;  %v10808_v53 = vrot.slane %v6570_v40, %v9239_v42  ;;  %v10811_v20 = vrot.slane %v6602_v60, %v9239_v42  ;;  %v3441_v50 = vpop.trf.xlu0  ;;  %s8758_s4 = sshll.u32 %s8997_s12, 10 }
 0x479   : > { %8053 = vrot.lane.b32.xlu0 %v12325_v32, %s9027_s6  ;;  %v10814_v6 = vrot.slane %v5161_v13, %v9230_v33  ;;  %v10817_v26 = vrot.slane %v5162_v14, %v9230_v33  ;;  %v10819_v25 = vpop.trf.xlu1  ;;  %v10822_v3 = vrot.slane %v6434_v37, %v9239_v42  ;;  %v10825_v31 = vrot.slane %v6466_v7, %v9239_v42  ;;  %v12326_v14 = vld [vmem:[#allocation21_spill] sm:$0xff]  ;;  %v12327_v32 = vld [vmem:[#allocation22_spill] sm:$0xff] }
 0x47a   : > { %v4937_v17 = vcombine.low %v10720_v59, %v4897_v15  ;;  %v4938_v40 = vcombine.high %v10720_v59, %v4897_v15  ;;  %v4953_v60 = vcombine.low %v10729_v45, %v4904_v30  ;;  %v4954_v13 = vcombine.high %v10729_v45, %v4904_v30 }
 0x47b   : > { %v12328_v46 = vcombine.low %v12326_v14, %v12327_v32  ;;  %v12329_v45 = vcombine.high %v9713_v11, %v9716_v34  ;;  %v5425_v7 = vrot.slane %v5417_v8, %v9230_v33  ;;  %v5432_v30 = vrot.slane %v5418_v49, %v9230_v33 }
 0x47c   : > { %v3442_v59 = vpop.trf.xlu0  ;;  %v4945_v15 = vrot.slane %v4937_v17, %v9239_v42  ;;  %v12332_v8 = vcombine.low %v12330_v56, %v12331_v35  ;;  %v4952_v34 = vrot.slane %v4938_v40, %v9239_v42  ;;  %v4961_v54 = vrot.slane %v4953_v60, %v9239_v42 }
 0x47d   : > { %8047 = vrot.lane.b32.xlu1 %v12328_v46, %s9027_s6  ;;  %8077 = vrot.lane.b32.xlu0 %v12329_v45, %s9028_s7  ;;  %v6497_v46 = vcombine.low %v10760_v29, %v10763_v48  ;;  %v10856_v37 = vpop.trf.xlu1  ;;  %v4968_v45 = vrot.slane %v4954_v13, %v9239_v42  ;;  %v10878_v17 = vrot.slane %v5689_v62, %v9230_v33 }
 0x47e   : > { %v12333_v49 = vcombine.high %v12323_v51, %v12324_v43  ;;  %v6873_v11 = vcombine.low %v10709_v10, %v10787_v16  ;;  %v6705_v40 = vcombine.low %v10696_v23, %v10772_v44  ;;  %v6737_v60 = vcombine.low %v10699_v24, %v10775_v58 }
 0x47f   : > { %v10903_v19 = vrot.slane %v4945_v15, %v9230_v33  ;;  %v10906_v52 = vrot.slane %v5690_v0, %v9230_v33  ;;  %v12334_v9 = vcombine.high %v12326_v14, %v12327_v32  ;;  %v10929_v14 = vrot.slane %v4961_v54, %v9230_v33 }
 0x480   : > { %v3505_v13 = vpop.trf.xlu0  ;;  %v10920_v15 = vrot.slane %v6705_v40, %v9239_v42  ;;  %v10923_v0 = vrot.slane %v6737_v60, %v9239_v42 }
 0x481   : > { %8055 = vrot.lane.b32.xlu1 %v12332_v8, %s9027_s6  ;;  %8085 = vrot.lane.b32.xlu0 %v12333_v49, %s9028_s7  ;;  %v6841_v8 = vcombine.low %v10706_v63, %v10784_v4  ;;  %v10892_v62 = vpop.trf.xlu1  ;;  %v5433_v18 = vcombine.low %v3441_v50, %v3505_v13  ;;  %v5434_v57 = vcombine.high %v3441_v50, %v3505_v13 }
 0x482   : > { %v10917_v49 = vrot.slane %v6873_v11, %v9239_v42  ;;  %12337 = vst [vmem:[#allocation21_spill] sm:$0xff] %v10920_v15  ;;  %12338 = vst [vmem:[#allocation22_spill] sm:$0xff] %v10923_v0  ;;  %v10926_v50 = vrot.slane %v4952_v34, %v9230_v33  ;;  %v3817_v15 = vcombine.low %v10819_v25, %v10892_v62 }
 0x483   : > { %v10914_v43 = vrot.slane %v6841_v8, %v9239_v42  ;;  %v5448_v32 = vrot.slane %v5434_v57, %v9230_v33  ;;  %v12339_v57 = vcombine.high %v12330_v56, %v12331_v35  ;;  %v12340_v35 = vcombine.low %v10750_v2, %v10814_v6 }
 0x484   : > { %12336 = vst [vmem:[#allocation30_spill] sm:$0xff] %v10917_v49 }
 0x485   : > { %8079 = vrot.lane.b32.xlu1 %v12334_v9, %s9028_s7  ;;  %8233 = vrot.lane.b32.xlu0 %v6497_v46, %s9023_s29  ;;  %12335 = vst [vmem:[#allocation29_spill] sm:$0xff] %v10914_v43  ;;  %v5441_v9 = vrot.slane %v5433_v18, %v9230_v33  ;;  %v3506_v46 = vpop.trf.xlu0  ;;  %v10933_v8 = vpop.trf.xlu1  ;;  %v5497_v18 = vcombine.low %v5432_v30, %v5448_v32 }
 0x486   : > { %v5498_v51 = vcombine.high %v5432_v30, %v5448_v32  ;;  %v5705_v47 = vcombine.low %v3442_v59, %v3506_v46  ;;  %v5706_v11 = vcombine.high %v3442_v59, %v3506_v46  ;;  %v4089_v40 = vcombine.low %v10856_v37, %v10933_v8 }
 0x487   : > { %v5481_v60 = vcombine.low %v5425_v7, %v5441_v9  ;;  %v5482_v13 = vcombine.high %v5425_v7, %v5441_v9  ;;  %v4090_v34 = vcombine.high %v10856_v37, %v10933_v8  ;;  %v5505_v7 = vrot.slane %v5497_v18, %v9239_v42 }
 0x488   : > { %v5512_v30 = vrot.slane %v5498_v51, %v9239_v42  ;;  %v10956_v9 = vrot.slane %v4968_v45, %v9230_v33  ;;  %v5217_v56 = vrot.slane %v12340_v35, %v9239_v42  ;;  %v5713_v59 = vrot.slane %v5705_v47, %v9230_v33 }
 0x489   : > { %8087 = vrot.lane.b32.xlu1 %v12339_v57, %s9028_s7  ;;  %v5489_v0 = vrot.slane %v5481_v60, %v9239_v42  ;;  %v5496_v54 = vrot.slane %v5482_v13, %v9239_v42  ;;  %v5720_v37 = vrot.slane %v5706_v11, %v9230_v33  ;;  %v2033_v32 = vpop.trf.xlu0  ;;  %v10964_v46 = vpop.trf.xlu1  ;;  %v10973_v45 = vrot.slane %v5505_v7, %v9230_v33  ;;  %s12121_s7 = scalar_lea.hbm %s12178_s2, %s8758_s4 }
 0x48a   : > { %v10976_v60 = vrot.slane %v5512_v30, %v9230_v33  ;;  %v12341_v47 = vcombine.low %v10766_v39, %v10769_v21  ;;  %v5753_v11 = vcombine.low %v10878_v17, %v5713_v59  ;;  %v5754_v13 = vcombine.high %v10878_v17, %v5713_v59 }
 0x48b   : > { %v10967_v8 = vrot.slane %v5489_v0, %v9230_v33  ;;  %v10970_v51 = vrot.slane %v5496_v54, %v9230_v33  ;;  %v5769_v0 = vcombine.low %v10906_v52, %v5720_v37  ;;  %v5770_v54 = vcombine.high %v10906_v52, %v5720_v37 }
 0x48c   : > { %v7657_v18 = vcombine.low %v10929_v14, %v10973_v45  ;;  %v7689_v57 = vcombine.low %v10956_v9, %v10976_v60  ;;  %v12342_v17 = vcombine.high %v10750_v2, %v10814_v6  ;;  %v12343_v52 = vcombine.low %v10753_v22, %v10817_v26 }
 0x48d   : > { %8235 = vrot.lane.b32.xlu1 %v12341_v47, %s9023_s29  ;;  %v7521_v7 = vcombine.low %v10903_v19, %v10967_v8  ;;  %v7553_v30 = vcombine.low %v10926_v50, %v10970_v51  ;;  %v12344_v37 = vcombine.high %v10753_v22, %v10817_v26  ;;  %v2034_v49 = vpop.trf.xlu0  ;;  %v11008_v43 = vpop.trf.xlu1  ;;  %v3818_v22 = vcombine.high %v10819_v25, %v10892_v62 }
 0x48e   : > { %v5224_v35 = vrot.slane %v12342_v17, %v9239_v42  ;;  %v5233_v59 = vrot.slane %v12343_v52, %v9239_v42  ;;  %v11011_v1 = vrot.slane %v7657_v18, %v9239_v42  ;;  %v7697_v2 = vrot.slane %v7689_v57, %v9239_v42 }
 0x48f   : > { %v5240_v47 = vrot.slane %v12344_v37, %v9239_v42  ;;  %v11015_v6 = vrot.slane %v7521_v7, %v9239_v42  ;;  %v11018_v17 = vrot.slane %v7553_v30, %v9239_v42  ;;  %v5761_v26 = vrot.slane %v5753_v11, %v9239_v42 }
 0x490   : > { %v11028_v37 = vrot.slane %v5217_v56, %v9230_v33  ;;  %v5768_v57 = vrot.slane %v5754_v13, %v9239_v42  ;;  %v7721_v7 = vcombine.low %v11011_v1, %v7697_v2  ;;  %v11035_v25 = vrot.slane %v5224_v35, %v9230_v33 }
 0x491   : > { %v7585_v30 = vcombine.low %v11015_v6, %v11018_v17  ;;  %v11038_v62 = vrot.slane %v5233_v59, %v9230_v33  ;;  %v5777_v11 = vrot.slane %v5769_v0, %v9239_v42  ;;  %v5784_v18 = vrot.slane %v5770_v54, %v9239_v42  ;;  %v2097_v52 = vpop.trf.xlu0  ;;  %v2577_v56 = vpop.trf.xlu1 }
 0x492   : > { %v11043_v28 = vrot.slane %v5240_v47, %v9230_v33  ;;  %v11046_v13 = vrot.slane %v3817_v15, %v9230_v33  ;;  %v3833_v5 = vcombine.low %v2033_v32, %v2097_v52  ;;  %v3834_v55 = vcombine.high %v2033_v32, %v2097_v52  ;;  %8243 = vrot.lane.b32.xlu1 %v7721_v7, %s9023_s29 }
 0x493   : > { %v11050_v35 = vrot.slane %v3818_v22, %v9230_v33  ;;  %v11053_v59 = vrot.slane %v5761_v26, %v9230_v33  ;;  %v11056_v0 = vrot.slane %v4089_v40, %v9230_v33  ;;  %v11059_v54 = vrot.slane %v4090_v34, %v9230_v33  ;;  %8241 = vrot.lane.b32.xlu0 %v7585_v30, %s9023_s29 }
 0x494   : > { %v11063_v15 = vrot.slane %v5768_v57, %v9230_v33  ;;  %v7658_v32 = vcombine.high %v10929_v14, %v10973_v45  ;;  %v7690_v47 = vcombine.high %v10956_v9, %v10976_v60  ;;  %v7522_v22 = vcombine.high %v10903_v19, %v10967_v8 }
 0x495   : > { %v11072_v40 = vrot.slane %v5777_v11, %v9230_v33  ;;  %v11075_v34 = vrot.slane %v5784_v18, %v9230_v33  ;;  %v4361_v26 = vcombine.low %v10964_v46, %v2577_v56  ;;  %v2098_v52 = vpop.trf.xlu0  ;;  %v11078_v57 = vpop.trf.xlu1  ;;  %v7554_v14 = vcombine.high %v10926_v50, %v10970_v51 }
 0x496   : > { %v3841_v45 = vrot.slane %v3833_v5, %v9230_v33  ;;  %v3848_v9 = vrot.slane %v3834_v55, %v9230_v33  ;;  %v4362_v19 = vcombine.high %v10964_v46, %v2577_v56  ;;  %v12345_v8 = vcombine.high %v10766_v39, %v10769_v21 }
 0x497   : > { %v7722_v60 = vcombine.high %v11011_v1, %v7697_v2  ;;  %v4105_v18 = vcombine.low %v2034_v49, %v2098_v52  ;;  %v4106_v7 = vcombine.high %v2034_v49, %v2098_v52  ;;  %v4633_v30 = vcombine.low %v11008_v43, %v11078_v57 }
 0x498   : > { %8267 = vrot.lane.b32.xlu1 %v12345_v8, %s9033_s15  ;;  %v12346_v55 = vcombine.high %v10760_v29, %v10763_v48  ;;  %v7586_v50 = vcombine.high %v11015_v6, %v11018_v17  ;;  %v11101_v39 = vrot.slane %v7658_v32, %v9239_v42  ;;  %v11104_v1 = vrot.slane %v7690_v47, %v9239_v42 }
 0x499   : > { %v11107_v21 = vrot.slane %v7522_v22, %v9239_v42  ;;  %v11110_v49 = vrot.slane %v4361_v26, %v9230_v33  ;;  %v11113_v46 = vrot.slane %v4105_v18, %v9230_v33  ;;  %v11116_v29 = vrot.slane %v4106_v7, %v9230_v33  ;;  %v2545_v48 = vpop.trf.xlu0  ;;  %v11118_v51 = vpop.trf.xlu1 }
 0x49a   : > { %8265 = vrot.lane.b32.xlu0 %v12346_v55, %s9033_s15  ;;  %v11121_v2 = vrot.slane %v7554_v14, %v9239_v42  ;;  %v3881_v6 = vcombine.low %v11046_v13, %v3841_v45  ;;  %v3882_v17 = vcombine.high %v11046_v13, %v3841_v45  ;;  %v3897_v11 = vcombine.low %v11050_v35, %v3848_v9 }
 0x49b   : > { %v11127_v56 = vrot.slane %v4362_v19, %v9230_v33  ;;  %v4153_v32 = vcombine.low %v11056_v0, %v11113_v46  ;;  %v7929_v13 = vcombine.low %v11038_v62, %v11072_v40  ;;  %v7961_v52 = vcombine.low %v11043_v28, %v11075_v34 }
 0x49c   : > { %8275 = vrot.lane.b32.xlu1 %v7722_v60, %s9033_s15  ;;  %v7793_v14 = vcombine.low %v11028_v37, %v11053_v59  ;;  %v7825_v45 = vcombine.low %v11035_v25, %v11063_v15  ;;  %v3898_v19 = vcombine.high %v11050_v35, %v3848_v9  ;;  %v7723_v18 = vcombine.low %v11101_v39, %v11104_v1 }
 0x49d   : > { %v11148_v8 = vpop.trf.xlu0  ;;  %v11150_v60 = vpop.trf.xlu1  ;;  %v7587_v7 = vcombine.low %v11107_v21, %v11121_v2  ;;  %v11163_v35 = vrot.slane %v7929_v13, %v9239_v42  ;;  %v11166_v9 = vrot.slane %v7961_v52, %v9239_v42  ;;  %v3889_v55 = vrot.slane %v3881_v6, %v9239_v42 }
 0x49e   : > { %8273 = vrot.lane.b32.xlu0 %v7586_v50, %s9033_s15  ;;  %v12347_v50 = vcombine.low %v10808_v53, %v10811_v20  ;;  %v11169_v26 = vrot.slane %v7793_v14, %v9239_v42  ;;  %v11172_v22 = vrot.slane %v7825_v45, %v9239_v42  ;;  %v11176_v47 = vrot.slane %v3882_v17, %v9239_v42 }
 0x49f   : > { %12348 = vst [vmem:[#allocation33_spill] sm:$0xff] %v11163_v35  ;;  %12349 = vst [vmem:[#allocation34_spill] sm:$0xff] %v11166_v9  ;;  %v3905_v5 = vrot.slane %v3897_v11, %v9239_v42  ;;  %v12352_v13 = vcombine.low %v10822_v3, %v10825_v31  ;;  %v7588_v52 = vcombine.high %v11107_v21, %v11121_v2 }
 0x4a0   : > { %8299 = vrot.lane.b32.xlu1 %v12347_v50, %s9034_s16  ;;  %12350 = vst [vmem:[#allocation45_spill] sm:$0xff] %v11169_v26  ;;  %12351 = vst [vmem:[#allocation46_spill] sm:$0xff] %v11172_v22  ;;  %v12354_v2 = vcombine.high %v10699_v24, %v10775_v58  ;;  %v12355_v6 = vcombine.high %v10706_v63, %v10784_v4  ;;  %v12356_v14 = vcombine.high %v10709_v10, %v10787_v16 }
 0x4a1   : > { %v2609_v11 = vpop.trf.xlu0  ;;  %v11193_v50 = vpop.trf.xlu1  ;;  %v7794_v10 = vcombine.high %v11028_v37, %v11053_v59 }
 0x4a2   : > { %8297 = vrot.lane.b32.xlu0 %v12352_v13, %s9034_s16  ;;  %v12353_v13 = vcombine.high %v10696_v23, %v10772_v44  ;;  %v11205_v45 = vrot.slane %v12354_v2, %v9239_v42  ;;  %v11211_v17 = vrot.slane %v12355_v6, %v9239_v42  ;;  %v11217_v22 = vrot.slane %v12356_v14, %v9239_v42 }
 0x4a3   : > { %v3912_v23 = vrot.slane %v3898_v19, %v9239_v42  ;;  %v11221_v44 = vrot.slane %v4633_v30, %v9230_v33  ;;  %v4377_v24 = vcombine.low %v2545_v48, %v2609_v11  ;;  %v4378_v58 = vcombine.high %v2545_v48, %v2609_v11 }
 0x4a4   : > { %v11199_v21 = vrot.slane %v12353_v13, %v9239_v42  ;;  %8307 = vrot.lane.b32.xlu1 %v7723_v18, %s9034_s16  ;;  %v11234_v30 = vrot.slane %v3889_v55, %v9230_v33  ;;  %v12357_v48 = vcombine.high %v11008_v43, %v11078_v57  ;;  %v11245_v14 = vrot.slane %v3905_v5, %v9230_v33 }
 0x4a5   : > { %v4385_v18 = vrot.slane %v4377_v24, %v9230_v33  ;;  %v4161_v6 = vrot.slane %v4153_v32, %v9239_v42  ;;  %v2610_v11 = vpop.trf.xlu0  ;;  %v3090_v13 = vpop.trf.xlu1  ;;  %v12358_v5 = vcombine.high %v10808_v53, %v10811_v20 }
 0x4a6   : > { %8305 = vrot.lane.b32.xlu0 %v7587_v7, %s9034_s16  ;;  %v11240_v19 = vrot.slane %v12357_v48, %v9230_v33  ;;  %v4392_v7 = vrot.slane %v4378_v58, %v9230_v33  ;;  %v4649_v32 = vcombine.low %v11148_v8, %v2610_v11  ;;  %v4650_v48 = vcombine.high %v11148_v8, %v2610_v11 }
 0x4a7   : > { %v4425_v43 = vcombine.low %v11110_v49, %v4385_v18  ;;  %v4426_v57 = vcombine.high %v11110_v49, %v4385_v18  ;;  %v5177_v63 = vcombine.low %v11150_v60, %v3090_v13  ;;  %v5178_v4 = vcombine.high %v11150_v60, %v3090_v13 }
 0x4a8   : > { %v4441_v24 = vcombine.low %v11127_v56, %v4392_v7  ;;  %v4442_v58 = vcombine.high %v11127_v56, %v4392_v7  ;;  %8331 = vrot.lane.b32.xlu1 %v12358_v5, %s9035_s22  ;;  %v12359_v49 = vcombine.high %v10822_v3, %v10825_v31  ;;  %v12360_v8 = vcombine.high %v11056_v0, %v11113_v46 }
 0x4a9   : > { %v4433_v56 = vrot.slane %v4425_v43, %v9239_v42  ;;  %v4440_v18 = vrot.slane %v4426_v57, %v9239_v42  ;;  %v12361_v60 = vcombine.low %v11059_v54, %v11116_v29  ;;  %v4657_v3 = vrot.slane %v4649_v32, %v9230_v33  ;;  %v3057_v13 = vpop.trf.xlu0  ;;  %v11282_v43 = vpop.trf.xlu1 }
 0x4aa   : > { %8329 = vrot.lane.b32.xlu0 %v12359_v49, %s9035_s22  ;;  %v4449_v53 = vrot.slane %v4441_v24, %v9239_v42  ;;  %v4456_v20 = vrot.slane %v4442_v58, %v9239_v42  ;;  %v4168_v7 = vrot.slane %v12360_v8, %v9239_v42  ;;  %v4664_v31 = vrot.slane %v4650_v48, %v9230_v33 }
 0x4ab   : > { %v4177_v11 = vrot.slane %v12361_v60, %v9239_v42  ;;  %v12362_v57 = vcombine.high %v11059_v54, %v11116_v29  ;;  %v11289_v0 = vrot.slane %v4433_v56, %v9230_v33  ;;  %v12363_v5 = vcombine.high %v11101_v39, %v11104_v1 }
 0x4ac   : > { %v11292_v46 = vrot.slane %v4449_v53, %v9230_v33  ;;  %v11295_v58 = vrot.slane %v4456_v20, %v9230_v33  ;;  %v11302_v32 = vrot.slane %v4440_v18, %v9230_v33  ;;  %v4697_v54 = vcombine.low %v11221_v44, %v4657_v3 }
 0x4ad   : > { %v4184_v24 = vrot.slane %v12362_v57, %v9239_v42  ;;  %8339 = vrot.lane.b32.xlu1 %v12363_v5, %s9035_s22  ;;  %v4698_v29 = vcombine.high %v11221_v44, %v4657_v3  ;;  %v4713_v48 = vcombine.low %v11240_v19, %v4664_v31  ;;  %v11309_v49 = vrot.slane %v3912_v23, %v9230_v33  ;;  %v11326_v23 = vpop.trf.xlu0  ;;  %v11328_v53 = vpop.trf.xlu1  ;;  %v12368_v57 = vld [vmem:[#allocation38_spill] sm:$0xff] }
 0x4ae   : > { %8337 = vrot.lane.b32.xlu0 %v7588_v52, %s9035_s22  ;;  %v4905_v56 = vcombine.low %v11118_v51, %v11193_v50  ;;  %v4906_v39 = vcombine.high %v11118_v51, %v11193_v50  ;;  %v4714_v1 = vcombine.high %v11240_v19, %v4664_v31  ;;  %v11318_v18 = vrot.slane %v11176_v47, %v9230_v33  ;;  %v12364_v47 = vld [vmem:[#allocation35_spill] sm:$0xff]  ;;  %v12365_v19 = vld [vmem:[#allocation36_spill] sm:$0xff]  ;;  %v12367_v31 = vld [vmem:[#allocation37_spill] sm:$0xff] }
 0x4af   : > { %v11321_v44 = vrot.slane %v4161_v6, %v9230_v33  ;;  %v11324_v52 = vrot.slane %v4168_v7, %v9230_v33  ;;  %v6585_v20 = vcombine.low %v11245_v14, %v11292_v46  ;;  %v11333_v51 = vrot.slane %v4177_v11, %v9230_v33 }
 0x4b0   : > { %v11336_v50 = vrot.slane %v4184_v24, %v9230_v33  ;;  %v12366_v6 = vcombine.low %v12364_v47, %v12365_v19  ;;  %v6617_v8 = vcombine.low %v11309_v49, %v11295_v58  ;;  %v6449_v7 = vcombine.low %v11234_v30, %v11289_v0 }
 0x4b1   : > { %v4705_v60 = vrot.slane %v4697_v54, %v9239_v42  ;;  %v4712_v3 = vrot.slane %v4698_v29, %v9239_v42  ;;  %v4721_v11 = vrot.slane %v4713_v48, %v9239_v42  ;;  %v12369_v24 = vcombine.low %v12367_v31, %v12368_v57  ;;  %v3601_v16 = vpop.trf.xlu1 }
 0x4b2   : > { %8111 = vrot.lane.b32.xlu1 %v12366_v6, %s9029_s21  ;;  %v6481_v5 = vcombine.low %v11318_v18, %v11302_v32  ;;  %v4913_v6 = vrot.slane %v4905_v56, %v9230_v33  ;;  %v4920_v2 = vrot.slane %v4906_v39, %v9230_v33  ;;  %v4728_v55 = vrot.slane %v4714_v1, %v9239_v42 }
 0x4b3   : > { %8109 = vrot.lane.b32.xlu0 %v12369_v24, %s9029_s21  ;;  %v11362_v54 = vrot.slane %v7794_v10, %v9239_v42  ;;  %v11365_v29 = vrot.slane %v5177_v63, %v9230_v33  ;;  %v11368_v48 = vrot.slane %v5178_v4, %v9230_v33  ;;  %v3121_v24 = vpop.trf.xlu0  ;;  %v11371_v56 = vrot.slane %v6585_v20, %v9239_v42 }
 0x4b4   : > { %v12371_v39 = vcombine.high %v11035_v25, %v11063_v15  ;;  %v4921_v37 = vcombine.low %v3057_v13, %v3121_v24  ;;  %v4922_v59 = vcombine.high %v3057_v13, %v3121_v24  ;;  %v12373_v63 = vcombine.low %v10557_v38, %v10560_v27 }
 0x4b5   : > { %12370 = vst [vmem:[#allocation35_spill] sm:$0xff] %v11362_v54  ;;  %v11384_v4 = vrot.slane %v6617_v8, %v9239_v42  ;;  %v11387_v10 = vrot.slane %v6449_v7, %v9239_v42  ;;  %v11390_v20 = vrot.slane %v4705_v60, %v9230_v33  ;;  %v11393_v25 = vrot.slane %v4712_v3, %v9230_v33  ;;  %v3602_v26 = vpop.trf.xlu1  ;;  %v12399_v54 = vld [vmem:[#allocation42_spill] sm:$0xff] }
 0x4b6   : > { %v11377_v1 = vrot.slane %v12371_v39, %v9239_v42  ;;  %8119 = vrot.lane.b32.xlu1 %v12373_v63, %s9029_s21  ;;  %v11396_v15 = vrot.slane %v4721_v11, %v9230_v33  ;;  %v12374_v13 = vcombine.low %v10563_v36, %v10566_v12  ;;  %v11403_v8 = vrot.slane %v6481_v5, %v9239_v42 }
 0x4b7   : > { %v11406_v7 = vrot.slane %v4728_v55, %v9230_v33  ;;  %v4929_v60 = vrot.slane %v4921_v37, %v9230_v33  ;;  %v4936_v24 = vrot.slane %v4922_v59, %v9230_v33  ;;  %v6586_v3 = vcombine.high %v11245_v14, %v11292_v46  ;;  %v3122_v63 = vpop.trf.xlu0 }
 0x4b8   : > { %12372 = vst [vmem:[#allocation36_spill] sm:$0xff] %v11377_v1  ;;  %8117 = vrot.lane.b32.xlu0 %v12374_v13, %s9029_s21  ;;  %v5449_v11 = vcombine.low %v11282_v43, %v3601_v16  ;;  %v5450_v39 = vcombine.high %v11282_v43, %v3601_v16  ;;  %v6618_v5 = vcombine.high %v11309_v49, %v11295_v58  ;;  %v12393_v49 = vld [vmem:[#allocation26_spill] sm:$0xff]  ;;  %v12398_v1 = vld [vmem:[#allocation41_spill] sm:$0xff] }
 0x4b9   : > { %v6450_v55 = vcombine.high %v11234_v30, %v11289_v0  ;;  %v4969_v13 = vcombine.low %v4913_v6, %v4929_v60  ;;  %v4970_v9 = vcombine.high %v4913_v6, %v4929_v60  ;;  %v4985_v37 = vcombine.low %v4920_v2, %v4936_v24 }
 0x4ba   : > { %v4986_v35 = vcombine.high %v4920_v2, %v4936_v24  ;;  %v12375_v14 = vcombine.high %v12364_v47, %v12365_v19  ;;  %v5193_v46 = vcombine.low %v11326_v23, %v3122_v63  ;;  %v5194_v16 = vcombine.high %v11326_v23, %v3122_v63  ;;  %v8010_v19 = vpop.permute.xlu1 %8009  ;;  %v12392_v23 = vld [vmem:[#allocation25_spill] sm:$0xff]  ;;  %v12395_v2 = vld [vmem:[#allocation43_spill] sm:$0xff] }
 0x4bb   : > { %v5721_v43 = vcombine.low %v11328_v53, %v3602_v26  ;;  %v5722_v58 = vcombine.high %v11328_v53, %v3602_v26  ;;  %v12376_v30 = vcombine.high %v12367_v31, %v12368_v57  ;;  %v4977_v47 = vrot.slane %v4969_v13, %v9239_v42  ;;  %v3569_v53 = vpop.trf.xlu0 }
 0x4bc   : > { %8143 = vrot.lane.b32.xlu1 %v12375_v14, %s9030_s17  ;;  %v4984_v26 = vrot.slane %v4970_v9, %v9239_v42  ;;  %v11441_v31 = vrot.slane %v6586_v3, %v9239_v42  ;;  %v11446_v6 = vrot.slane %v5449_v11, %v9230_v33  ;;  %v11449_v59 = vrot.slane %v5450_v39, %v9230_v33 }
 0x4bd   : > { %8141 = vrot.lane.b32.xlu0 %v12376_v30, %s9030_s17  ;;  %v12377_v60 = vcombine.high %v10557_v38, %v10560_v27  ;;  %v11456_v9 = vrot.slane %v6618_v5, %v9239_v42  ;;  %v11459_v24 = vrot.slane %v6450_v55, %v9239_v42  ;;  %v4993_v3 = vrot.slane %v4985_v37, %v9239_v42  ;;  %v12379_v27 = vld [vmem:[#allocation15_spill] sm:$0xff]  ;;  %v12380_v5 = vld [vmem:[#allocation16_spill] sm:$0xff] }
 0x4be   : > { %v5000_v63 = vrot.slane %v4986_v35, %v9239_v42  ;;  %v11464_v11 = vrot.slane %v5193_v46, %v9230_v33  ;;  %v11467_v39 = vrot.slane %v5194_v16, %v9230_v33  ;;  %v12378_v38 = vcombine.high %v10563_v36, %v10566_v12 }
 0x4bf   : > { %v12381_v13 = vcombine.low %v12379_v27, %v12380_v5  ;;  %v12382_v37 = vcombine.high %v11038_v62, %v11072_v40  ;;  %v12383_v36 = vcombine.high %v11043_v28, %v11075_v34  ;;  %v11494_v46 = vrot.slane %v4977_v47, %v9230_v33  ;;  %v3570_v62 = vpop.trf.xlu0  ;;  %v8018_v40 = vpop.permute.xlu1 %8017 }
 0x4c0   : > { %8151 = vrot.lane.b32.xlu1 %v12377_v60, %s9030_s17  ;;  %v11497_v16 = vrot.slane %v4984_v26, %v9230_v33  ;;  %v11500_v30 = vrot.slane %v5721_v43, %v9230_v33  ;;  %v12385_v60 = vld [vmem:[#allocation23_spill] sm:$0xff]  ;;  %v12388_v34 = vcombine.low %v10440_v41, %v10523_v61  ;;  %v11522_v26 = vrot.slane %v4993_v3, %v9230_v33 }
 0x4c1   : > { %8149 = vrot.lane.b32.xlu0 %v12378_v38, %s9030_s17  ;;  %v11477_v55 = vsel %vm8481_vm9, %v12381_v13, %v8010_v19  ;;  %v11485_v14 = vrot.slane %v12382_v37, %v9239_v42  ;;  %v11491_v12 = vrot.slane %v12383_v36, %v9239_v42  ;;  %v11503_v19 = vrot.slane %v5722_v58, %v9230_v33  ;;  %v12386_v38 = vld [vmem:[#allocation24_spill] sm:$0xff]  ;;  %v12389_v36 = vld [vmem:[#allocation39_spill] sm:$0xff]  ;;  %s8626_s17 = scalar_lea.sflag [#allocation6], %s9166_s30 }
 0x4c2   : > { %v12387_v27 = vcombine.low %v12385_v60, %v12386_v38  ;;  %v11525_v5 = vrot.slane %v5000_v63, %v9230_v33  ;;  %v5241_v13 = vcombine.low %v11365_v29, %v11464_v11  ;;  %v6721_v63 = vcombine.low %v11321_v44, %v11390_v20 }
 0x4c3   : > { %12384 = vst [vmem:[#allocation37_spill] sm:$0xff] %v11491_v12  ;;  %v3633_v47 = vpop.trf.xlu0  ;;  %v6857_v38 = vcombine.low %v11333_v51, %v11396_v15  ;;  %v6889_v3 = vcombine.low %v11336_v50, %v11406_v7  ;;  %v12394_v57 = vcombine.low %v12392_v23, %v12393_v49  ;;  %v12400_v12 = vcombine.low %v12398_v1, %v12399_v54 }
 0x4c4   : > { %v11509_v28 = vsel %vm8481_vm9, %v12387_v27, %v8018_v40  ;;  %8175 = vrot.lane.b32.xlu1 %v12388_v34, %s9031_s19  ;;  %v12390_v40 = vld [vmem:[#allocation40_spill] sm:$0xff]  ;;  %v6753_v27 = vcombine.low %v11324_v52, %v11393_v25  ;;  %v5465_v35 = vcombine.low %v3569_v53, %v3633_v47  ;;  %v5466_v43 = vcombine.high %v3569_v53, %v3633_v47 }
 0x4c5   : > { %v12391_v60 = vcombine.low %v12389_v36, %v12390_v40  ;;  %v12396_v34 = vld [vmem:[#allocation44_spill] sm:$0xff]  ;;  %v11560_v37 = vrot.slane %v6721_v63, %v9239_v42  ;;  %v11570_v49 = vrot.slane %v6857_v38, %v9239_v42  ;;  %v11573_v23 = vrot.slane %v6889_v3, %v9239_v42 }
 0x4c6   : > { %v12397_v58 = vcombine.low %v12395_v2, %v12396_v34  ;;  %v11567_v53 = vrot.slane %v6753_v27, %v9239_v42  ;;  %v5480_v47 = vrot.slane %v5466_v43, %v9230_v33  ;;  %v6754_v63 = vcombine.high %v11324_v52, %v11393_v25 }
 0x4c7   : > { %8173 = vrot.lane.b32.xlu0 %v12391_v60, %s9031_s19  ;;  %v8020_v60 = vpop.permute.xlu1 %8019  ;;  %v3634_v27 = vpop.trf.xlu0  ;;  %v12401_v38 = vcombine.high %v10440_v41, %v10523_v61 }
 0x4c8   : > { %v8487_v0 = vsel %vm8481_vm9, %v12394_v57, %v8020_v60  ;;  %8183 = vrot.lane.b32.xlu1 %v12397_v58, %s9031_s19  ;;  %v6722_v57 = vcombine.high %v11321_v44, %v11390_v20  ;;  %v5473_v58 = vrot.slane %v5465_v35, %v9230_v33  ;;  %v5529_v35 = vcombine.low %v11449_v59, %v5480_v47 }
 0x4c9   : > { %v5530_v43 = vcombine.high %v11449_v59, %v5480_v47  ;;  %v5737_v3 = vcombine.low %v3570_v62, %v3634_v27  ;;  %v12402_v44 = vcombine.high %v12389_v36, %v12390_v40 }
 0x4ca   : > { %v5513_v52 = vcombine.low %v11446_v6, %v5473_v58  ;;  %v5514_v25 = vcombine.high %v11446_v6, %v5473_v58  ;;  %v11604_v20 = vrot.slane %v6722_v57, %v9239_v42  ;;  %v11607_v6 = vrot.slane %v6754_v63, %v9239_v42 }
 0x4cb   : > { %8181 = vrot.lane.b32.xlu0 %v12400_v12, %s9031_s19  ;;  %v8044_v60 = vpop.permute.xlu1 %8043  ;;  %v5738_v12 = vcombine.high %v3570_v62, %v3634_v27  ;;  %v5537_v41 = vrot.slane %v5529_v35, %v9239_v42  ;;  %v5544_v61 = vrot.slane %v5530_v43, %v9239_v42  ;;  %v5249_v62 = vrot.slane %v5241_v13, %v9239_v42  ;;  %v8012_v40 = vpop.permute.xlu0 %8011 }
 0x4cc   : > { %8207 = vrot.lane.b32.xlu1 %v12401_v38, %s9032_s8  ;;  %v5521_v59 = vrot.slane %v5513_v52, %v9239_v42  ;;  %v5528_v58 = vrot.slane %v5514_v25, %v9239_v42  ;;  %v5745_v47 = vrot.slane %v5737_v3, %v9230_v33  ;;  %v6775_v63 = vcombine.low %v11604_v20, %v11607_v6 }
 0x4cd   : > { %v5752_v36 = vrot.slane %v5738_v12, %v9230_v33  ;;  %v11628_v13 = vrot.slane %v5544_v61, %v9230_v33  ;;  %v12403_v12 = vcombine.high %v12395_v2, %v12396_v34  ;;  %v12404_v43 = vcombine.high %v12398_v1, %v12399_v54 }
 0x4ce   : > { %v11619_v27 = vrot.slane %v5521_v59, %v9230_v33  ;;  %v11622_v38 = vrot.slane %v5528_v58, %v9230_v33  ;;  %v5785_v3 = vcombine.low %v11500_v30, %v5745_v47  ;;  %v5786_v52 = vcombine.high %v11500_v30, %v5745_v47  ;;  %v12405_v59 = vld [vmem:[#allocation13_spill] sm:$0xff]  ;;  %v12406_v58 = vld [vmem:[#allocation14_spill] sm:$0xff] }
 0x4cf   : > { %8205 = vrot.lane.b32.xlu0 %v12402_v44, %s9032_s8  ;;  %v8052_v57 = vpop.permute.xlu1 %8051  ;;  %v11625_v44 = vrot.slane %v5537_v41, %v9230_v33  ;;  %v5801_v25 = vcombine.low %v11503_v19, %v5752_v36  ;;  %v5802_v35 = vcombine.high %v11503_v19, %v5752_v36  ;;  %v12407_v41 = vcombine.low %v12405_v59, %v12406_v58 }
 0x4d0   : > { %8215 = vrot.lane.b32.xlu1 %v12403_v12, %s9032_s8  ;;  %v8496_v34 = vsel %vm8490_vm10, %v8487_v0, %v8052_v57  ;;  %v7705_v61 = vcombine.low %v11525_v5, %v11628_v13  ;;  %v12408_v19 = vcombine.high %v11365_v29, %v11464_v11  ;;  %v5793_v1 = vrot.slane %v5785_v3, %v9239_v42 }
 0x4d1   : > { %v8483_v2 = vsel %vm8481_vm9, %v12407_v41, %v8012_v40  ;;  %v7673_v30 = vcombine.low %v11522_v26, %v11625_v44  ;;  %v5800_v47 = vrot.slane %v5786_v52, %v9239_v42  ;;  %v5809_v36 = vrot.slane %v5801_v25, %v9239_v42  ;;  %v11658_v40 = vpop.permute.xlu0 %8041 }
 0x4d2   : > { %v5256_v54 = vrot.slane %v12408_v19, %v9239_v42  ;;  %v12409_v57 = vcombine.low %v11368_v48, %v11467_v39  ;;  %v12410_v29 = vcombine.low %v11371_v56, %v11384_v4  ;;  %v7713_v3 = vrot.slane %v7705_v61, %v9239_v42 }
 0x4d3   : > { %8213 = vrot.lane.b32.xlu0 %v12404_v43, %s9032_s8  ;;  %v8076_v0 = vpop.permute.xlu1 %8075  ;;  %v8492_v43 = vsel %vm8490_vm10, %v8483_v2, %v8044_v60  ;;  %v7681_v11 = vrot.slane %v7673_v30, %v9239_v42  ;;  %v12411_v52 = vcombine.high %v11368_v48, %v11467_v39  ;;  %v5816_v59 = vrot.slane %v5802_v35, %v9239_v42  ;;  %s9040_s8 = smov [#allocation9]  }
 0x4d4   : > { %v5265_v12 = vrot.slane %v12409_v57, %v9239_v42  ;;  %8363 = vrot.lane.b32.xlu1 %v12410_v29, %s9036_s23  ;;  %v7760_v58 = vrot.slane %v5793_v1, %v9230_v33  ;;  %v7792_v60 = vrot.slane %v5800_v47, %v9230_v33  ;;  %v12412_v41 = vcombine.low %v11387_v10, %v11403_v8 }
 0x4d5   : > { %v5272_v25 = vrot.slane %v12411_v52, %v9239_v42  ;;  %v8501_v2 = vsel %vm8499_vm11, %v8492_v43, %v8076_v0  ;;  %v7725_v30 = vcombine.low %v7681_v11, %v7713_v3  ;;  %v7537_v61 = vcombine.low %v11494_v46, %v11619_v27  ;;  %v11690_v1 = vpop.permute.xlu0 %8049 }
 0x4d6   : > { %v7569_v48 = vcombine.low %v11497_v16, %v11622_v38  ;;  %v7744_v39 = vrot.slane %v5249_v62, %v9230_v33  ;;  %v7776_v35 = vrot.slane %v5256_v54, %v9230_v33  ;;  %v7896_v19 = vrot.slane %v5809_v36, %v9230_v33 }
 0x4d7   : > { %8361 = vrot.lane.b32.xlu0 %v12412_v41, %s9036_s23  ;;  %v8084_v47 = vpop.permute.xlu1 %8083  ;;  %v12413_v0 = vcombine.high %v11318_v18, %v11302_v32  ;;  %v7545_v29 = vrot.slane %v7537_v61, %v9239_v42  ;;  %v7674_v54 = vcombine.high %v11522_v26, %v11625_v44  ;;  %v7880_v36 = vrot.slane %v5265_v12, %v9230_v33 }
 0x4d8   : > { %v8505_v43 = vsel %vm8499_vm11, %v8496_v34, %v8084_v47  ;;  %8371 = vrot.lane.b32.xlu1 %v7725_v30, %s9036_s23  ;;  %v7577_v62 = vrot.slane %v7569_v48, %v9239_v42  ;;  %v7912_v52 = vrot.slane %v5272_v25, %v9230_v33  ;;  %v6639_v32 = vcombine.low %v11441_v31, %v11456_v9 }
 0x4d9   : > { %v11696_v57 = vrot.slane %v12413_v0, %v9239_v42  ;;  %v7706_v18 = vcombine.high %v11525_v5, %v11628_v13  ;;  %v7928_v34 = vrot.slane %v5816_v59, %v9230_v33  ;;  %v7809_v30 = vcombine.low %v7744_v39, %v7760_v58  ;;  %v11711_v47 = vpop.permute.xlu0 %8073 }
 0x4da   : > { %v7589_v41 = vcombine.low %v7545_v29, %v7577_v62  ;;  %v7841_v61 = vcombine.low %v7776_v35, %v7792_v60  ;;  %v7726_v0 = vcombine.high %v7681_v11, %v7713_v3  ;;  %v7538_v26 = vcombine.high %v11494_v46, %v11619_v27 }
 0x4db   : > { %v8108_v48 = vpop.permute.xlu1 %8107  ;;  %v7945_v44 = vcombine.low %v7880_v36, %v7896_v19  ;;  %v12414_v12 = vcombine.high %v11333_v51, %v11396_v15  ;;  %v12415_v5 = vcombine.high %v11371_v56, %v11384_v4  ;;  %v11728_v13 = vrot.slane %v7674_v54, %v9239_v42 }
 0x4dc   : > { %8369 = vrot.lane.b32.xlu0 %v7589_v41, %s9036_s23  ;;  %v8510_v33 = vsel %vm8508_vm12, %v8501_v2, %v8108_v48  ;;  %v11731_v46 = vrot.slane %v7809_v30, %v9239_v42  ;;  %v11734_v51 = vrot.slane %v7706_v18, %v9239_v42  ;;  %v7570_v15 = vcombine.high %v11497_v16, %v11622_v38 }
 0x4dd   : > { %v11719_v25 = vrot.slane %v12414_v12, %v9239_v42  ;;  %8395 = vrot.lane.b32.xlu1 %v12415_v5, %s9037_s24  ;;  %v11739_v27 = vrot.slane %v7841_v61, %v9239_v42  ;;  %v11742_v11 = vrot.slane %v7945_v44, %v9239_v42  ;;  %v7977_v56 = vcombine.low %v7912_v52, %v7928_v34  ;;  %v11746_v2 = vpop.permute.xlu0 %8081 }
 0x4de   : > { %v6890_v4 = vcombine.high %v11336_v50, %v11406_v7  ;;  %v7810_v3 = vcombine.high %v7744_v39, %v7760_v58  ;;  %v7842_v59 = vcombine.high %v7776_v35, %v7792_v60  ;;  %v7946_v38 = vcombine.high %v7880_v36, %v7896_v19 }
 0x4df   : > { %v8116_v54 = vpop.permute.xlu1 %8115  ;;  %v7861_v18 = vcombine.low %v11731_v46, %v11739_v27  ;;  %v7862_v16 = vcombine.high %v11731_v46, %v11739_v27  ;;  %v7978_v41 = vcombine.high %v7912_v52, %v7928_v34  ;;  %v12416_v30 = vcombine.high %v11387_v10, %v11403_v8 }
 0x4e0   : > { %v8514_v50 = vsel %vm8508_vm12, %v8505_v43, %v8116_v54  ;;  %v7590_v7 = vcombine.high %v7545_v29, %v7577_v62  ;;  %v11759_v58 = vrot.slane %v7977_v56, %v9239_v42  ;;  %v11762_v60 = vrot.slane %v6890_v4, %v9239_v42 }
 0x4e1   : > { %8393 = vrot.lane.b32.xlu0 %v12416_v30, %s9037_s24  ;;  %8403 = vrot.lane.b32.xlu1 %v7726_v0, %s9037_s24  ;;  %v11765_v39 = vrot.slane %v7810_v3, %v9239_v42  ;;  %v11768_v35 = vrot.slane %v7842_v59, %v9239_v42  ;;  %v11771_v10 = vrot.slane %v7946_v38, %v9239_v42  ;;  %v8106_v62 = vpop.permute.xlu0 %8105 }
 0x4e2   : > { %v7997_v8 = vcombine.low %v11742_v11, %v11759_v58  ;;  %v7998_v19 = vcombine.high %v11742_v11, %v11759_v58  ;;  %v11778_v43 = vrot.slane %v7978_v41, %v9239_v42  ;;  %v6776_v29 = vcombine.high %v11604_v20, %v11607_v6 }
 0x4e3   : > { %v8140_v36 = vpop.permute.xlu1 %8139  ;;  %v6911_v52 = vcombine.low %v11719_v25, %v11762_v60  ;;  %v7863_v34 = vcombine.low %v11765_v39, %v11768_v35  ;;  %v6912_v61 = vcombine.high %v11719_v25, %v11762_v60  ;;  %v7864_v48 = vcombine.high %v11765_v39, %v11768_v35 }
 0x4e4   : > { %v8519_v0 = vsel %vm8517_vm13, %v8510_v33, %v8140_v36  ;;  %v7999_v44 = vcombine.low %v11771_v10, %v11778_v43  ;;  %v8000_v12 = vcombine.high %v11771_v10, %v11778_v43  ;;  %v6503_v5 = vcombine.low %v11459_v24, %v11696_v57 }
 0x4e5   : > { %8401 = vrot.lane.b32.xlu0 %v7590_v7, %s9037_s24  ;;  %8427 = vrot.lane.b32.xlu1 %v6639_v32, %s9038_s18  ;;  %v7727_v56 = vcombine.low %v11728_v13, %v11734_v51  ;;  %v7552_v4 = vrot.slane %v7538_v26, %v9239_v42  ;;  %v7584_v3 = vrot.slane %v7570_v15, %v9239_v42  ;;  %v8114_v33 = vpop.permute.xlu0 %8113 }
 0x4e6   : > { %v6640_v38 = vcombine.high %v11441_v31, %v11456_v9  ;;  %v6504_v42 = vcombine.high %v11459_v24, %v11696_v57  ;;  %v7728_v15 = vcombine.high %v11728_v13, %v11734_v51  ;;  %v8491_v31 = vsel %vm8490_vm10, %v11477_v55, %v11658_v40 }
 0x4e7   : > { %v8148_v59 = vpop.permute.xlu1 %8147  ;;  %v7591_v54 = vcombine.low %v7552_v4, %v7584_v3  ;;  %v8500_v36 = vsel %vm8499_vm11, %v8491_v31, %v11711_v47  ;;  %v7592_v57 = vcombine.high %v7552_v4, %v7584_v3  ;;  %v8495_v55 = vsel %vm8490_vm10, %v11509_v28, %v11690_v1  ;;  %v12417_v47 = vld [vmem:[#allocation29_spill] sm:$0xff] }
 0x4e8   : > { %v8523_v32 = vsel %vm8517_vm13, %v8514_v50, %v8148_v59  ;;  %v8509_v24 = vsel %vm8508_vm12, %v8500_v36, %v8106_v62  ;;  %v8504_v62 = vsel %vm8499_vm11, %v8495_v55, %v11746_v2  ;;  %v12420_v1 = vld [vmem:[#allocation21_spill] sm:$0xff] }
 0x4e9   : > { %8425 = vrot.lane.b32.xlu0 %v6503_v5, %s9038_s18  ;;  %8435 = vrot.lane.b32.xlu1 %v7727_v56, %s9038_s18  ;;  %v8138_v41 = vpop.permute.xlu0 %8137  ;;  %v12418_v56 = vld [vmem:[#allocation30_spill] sm:$0xff]  ;;  %v8513_v4 = vsel %vm8508_vm12, %v8504_v62, %v8114_v33 }
 0x4ea   : > { %v8518_v13 = vsel %vm8517_vm13, %v8509_v24, %v8138_v41  ;;  %v12419_v59 = vcombine.low %v12417_v47, %v12418_v56  ;;  %v12429_v24 = vld [vmem:[#allocation17_spill] sm:$0xff] }
 0x4eb   : > { %v8172_v30 = vpop.permute.xlu1 %8171 }
 0x4ec   : > { %v8528_v26 = vsel %vm8526_vm14, %v8519_v0, %v8172_v30 }
 0x4ed   : > { %8433 = vrot.lane.b32.xlu0 %v7591_v54, %s9038_s18  ;;  %8459 = vrot.lane.b32.xlu1 %v6640_v38, %s9039_s27  ;;  %v8146_v50 = vpop.permute.xlu0 %8145  ;;  %v12421_v54 = vld [vmem:[#allocation22_spill] sm:$0xff] }
 0x4ee   : > { %v8522_v3 = vsel %vm8517_vm13, %v8513_v4, %v8146_v50  ;;  %v12422_v38 = vcombine.low %v12420_v1, %v12421_v54  ;;  %v12426_v50 = vld [vmem:[#allocation45_spill] sm:$0xff]  ;;  %v12435_v4 = vld [vmem:[#allocation20_spill] sm:$0xff] }
 0x4ef   : > { %v8180_v7 = vpop.permute.xlu1 %8179 }
 0x4f0   : > { %v8532_v9 = vsel %vm8526_vm14, %v8523_v32, %v8180_v7  ;;  %v12427_v7 = vld [vmem:[#allocation46_spill] sm:$0xff] }
 0x4f1   : > { %8457 = vrot.lane.b32.xlu0 %v6504_v42, %s9039_s27  ;;  %8467 = vrot.lane.b32.xlu1 %v7728_v15, %s9039_s27  ;;  %v8170_v51 = vpop.permute.xlu0 %8169  ;;  %v12424_v42 = vld [vmem:[#allocation34_spill] sm:$0xff]  ;;  %v12428_v31 = vcombine.low %v12426_v50, %v12427_v7 }
 0x4f2   : > { %v8527_v40 = vsel %vm8526_vm14, %v8518_v13, %v8170_v51 }
 0x4f3   : > { %v8204_v0 = vpop.permute.xlu1 %8203 }
 0x4f4   : > { %v8537_v5 = vsel %vm8535_vm15, %v8528_v26, %v8204_v0  ;;  %v12423_v26 = vld [vmem:[#allocation33_spill] sm:$0xff] }
 0x4f5   : > { %8465 = vrot.lane.b32.xlu0 %v7592_v57, %s9039_s27  ;;  %8239 = vrot.lane.b32.xlu1 %v12419_v59, %s9023_s29  ;;  %v8178_v32 = vpop.permute.xlu0 %8177  ;;  %v12425_v15 = vcombine.low %v12423_v26, %v12424_v42  ;;  %v12430_v57 = vld [vmem:[#allocation18_spill] sm:$0xff]  ;;  %v12433_v59 = vcombine.high %v12420_v1, %v12421_v54  ;;  %v12439_v1 = vld [vmem:[#allocation27_spill] sm:$0xff]  ;;  %v12440_v54 = vld [vmem:[#allocation28_spill] sm:$0xff] }
 0x4f6   : > { %v8531_v41 = vsel %vm8526_vm14, %v8522_v3, %v8178_v32  ;;  %v12431_v13 = vcombine.low %v12429_v24, %v12430_v57 }
 0x4f7   : > { %v8212_v28 = vpop.permute.xlu1 %8211 }
 0x4f8   : > { %v8541_v30 = vsel %vm8535_vm15, %v8532_v9, %v8212_v28  ;;  %v12432_v9 = vcombine.high %v12417_v47, %v12418_v56  ;;  %v12437_v28 = vcombine.high %v12423_v26, %v12424_v42  ;;  %v12445_v26 = vcombine.low %v11211_v17, %v11217_v22 }
 0x4f9   : > { %8237 = vrot.lane.b32.xlu0 %v12422_v38, %s9023_s29  ;;  %8247 = vrot.lane.b32.xlu1 %v12425_v15, %s9023_s29  ;;  %v8202_v2 = vpop.permute.xlu0 %8201  ;;  %v12438_v38 = vcombine.high %v12426_v50, %v12427_v7  ;;  %v12446_v50 = vcombine.low %v11199_v21, %v11205_v45 }
 0x4fa   : > { %v8536_v36 = vsel %vm8535_vm15, %v8527_v40, %v8202_v2  ;;  %v12434_v40 = vld [vmem:[#allocation19_spill] sm:$0xff] }
 0x4fb   : > { %v8014_v33 = vpop.permute.xlu1 %8013  ;;  %v12436_v3 = vcombine.low %v12434_v40, %v12435_v4  ;;  %v12442_v2 = vld [vmem:[#allocation31_spill] sm:$0xff]  ;;  %v12450_v4 = vld [vmem:[#allocation36_spill] sm:$0xff] }
 0x4fc   : > { %v8484_v51 = vsel %vm8481_vm9, %v12431_v13, %v8014_v33  ;;  %v12443_v33 = vld [vmem:[#allocation32_spill] sm:$0xff]  ;;  %v12449_v40 = vld [vmem:[#allocation35_spill] sm:$0xff] }
 0x4fd   : > { %8245 = vrot.lane.b32.xlu0 %v12428_v31, %s9023_s29  ;;  %8271 = vrot.lane.b32.xlu1 %v12432_v9, %s9033_s15  ;;  %v8210_v0 = vpop.permute.xlu0 %8209  ;;  %v12444_v31 = vcombine.low %v12442_v2, %v12443_v33  ;;  %v12447_v9 = vld [vmem:[#allocation37_spill] sm:$0xff]  ;;  %s8641_s29 = sshll.u32 %s12060_s28, 4  ;;  %s12112_s29 = int_to_ptr.vmem [resolvable:$true] %s8641_s29 }
 0x4fe   : > { %v8540_v62 = vsel %vm8535_vm15, %v8531_v41, %v8210_v0  ;;  %v12441_v41 = vcombine.low %v12439_v1, %v12440_v54  ;;  %v12448_v0 = vcombine.low %v11485_v14, %v12447_v9  ;;  %s8921_s19 = scalar_lea.vmem %s12112_s29, 1024 }
 0x4ff   : > { %v8016_v55 = vpop.permute.xlu1 %8015  ;;  %p8922_p1 = scmp.ne.s32.totalorder %s12112_s29, %s8921_s19 }
 0x500   : > { %v8485_v32 = vsel %vm8481_vm9, %v12436_v3, %v8016_v55  ;;  %v12451_v3 = vcombine.low %v12449_v40, %v12450_v4 }
 0x501   : > { %8269 = vrot.lane.b32.xlu0 %v12433_v59, %s9033_s15  ;;  %8279 = vrot.lane.b32.xlu1 %v12437_v28, %s9033_s15  ;;  %v8022_v47 = vpop.permute.xlu0 %8021  ;;  %p8923_p8 = pnand %p8922_p1, %p9143_p0 }
 0x502   : > { %v8488_v15 = vsel %vm8481_vm9, %v12441_v41, %v8022_v47  ;;  %v12454_v41 = vcombine.high %v11485_v14, %v12447_v9 }
 0x503   : > { %v8024_v56 = vpop.permute.xlu1 %8023  ;;  %p8924_p13 = pneg %p8923_p8 }
 0x504   : > { %v8489_v24 = vsel %vm8481_vm9, %v12444_v31, %v8024_v56  ;;  %v12457_v31 = vcombine.low %v11560_v37, %v11567_v53 }
 0x505   : > { %8277 = vrot.lane.b32.xlu0 %v12438_v38, %s9033_s15  ;;  %8303 = vrot.lane.b32.xlu1 %v12445_v26, %s9034_s16  ;;  %v8046_v42 = vpop.permute.xlu0 %8045  ;;  %v12453_v38 = vcombine.high %v11199_v21, %v11205_v45  ;;  %v12456_v21 = vcombine.low %v11570_v49, %v11573_v23  ;;  %s8925_s15 = sshll.u32 %s9040_s8, 4  ;;  %s8926_s15 = int_to_ptr.vmem [resolvable:$false] %s8925_s15 }
 0x506   : > { %v8493_v7 = vsel %vm8490_vm10, %v8484_v51, %v8046_v42  ;;  %v12452_v51 = vcombine.high %v11211_v17, %v11217_v22  ;;  %v12455_v22 = vcombine.high %v12449_v40, %v12450_v4  ;;  %p8928_p11 = scmp.lt.s32.totalorder %s12112_s29, %s8926_s15 }
 0x507   : > { %v8048_v57 = vpop.permute.xlu1 %8047 }
 0x508   : > { %v8494_v13 = vsel %vm8490_vm10, %v8485_v32, %v8048_v57 }
 0x509   : > { %8301 = vrot.lane.b32.xlu0 %v12446_v50, %s9034_s16  ;;  %8311 = vrot.lane.b32.xlu1 %v12448_v0, %s9034_s16  ;;  %v8054_v55 = vpop.permute.xlu0 %8053 }
 0x50a   : > { %v8497_v28 = vsel %vm8490_vm10, %v8488_v15, %v8054_v55 }
 0x50b   : > { %v8056_v59 = vpop.permute.xlu1 %8055 }
 0x50c   : > { %v8498_v47 = vsel %vm8490_vm10, %v8489_v24, %v8056_v59 }
 0x50d   : > { %8309 = vrot.lane.b32.xlu0 %v12451_v3, %s9034_s16  ;;  %8335 = vrot.lane.b32.xlu1 %v12452_v51, %s9035_s22  ;;  %v8078_v32 = vpop.permute.xlu0 %8077  ;;  %s8927_s16 = scalar_lea.vmem %s8926_s15, 2048 }
 0x50e   : > { %v8502_v1 = vsel %vm8499_vm11, %v8493_v7, %v8078_v32  ;;  %p8929_p2 = scmp.lt.s32.totalorder %s8927_s16, %s8921_s19 }
 0x50f   : > { %v8080_v56 = vpop.permute.xlu1 %8079 }
 0x510   : > { %v8503_v54 = vsel %vm8499_vm11, %v8494_v13, %v8080_v56  ;;  %p8930_p12 = por %p8929_p2, %p8928_p11 }
 0x511   : > { %8333 = vrot.lane.b32.xlu0 %v12453_v38, %s9035_s22  ;;  %8343 = vrot.lane.b32.xlu1 %v12454_v41, %s9035_s22  ;;  %v8086_v15 = vpop.permute.xlu0 %8085 }
 0x512   : > { %v8506_v17 = vsel %vm8499_vm11, %v8497_v28, %v8086_v15  ;;  %p8931_p3 = pnand %p8930_p12, %p8924_p13 }
 0x513   : > { %v8088_v2 = vpop.permute.xlu1 %8087 }
 0x514   : > { %v8507_v45 = vsel %vm8499_vm11, %v8498_v47, %v8088_v2 }
 0x515   : > { %8341 = vrot.lane.b32.xlu0 %v12455_v22, %s9035_s22  ;;  %8367 = vrot.lane.b32.xlu1 %v12456_v21, %s9036_s23  ;;  %v8234_v33 = vpop.permute.xlu0 %8233 }
 0x516   : > { %v8545_v24 = vsel %vm8544_vm0, %v8536_v36, %v8234_v33 }
 0x517   : > { %v8236_v14 = vpop.permute.xlu1 %8235 }
 0x518   : > { %v8546_v26 = vsel %vm8544_vm0, %v8537_v5, %v8236_v14  ;;  %v12458_v5 = vcombine.high %v11570_v49, %v11573_v23 }
 0x519   : > { %8365 = vrot.lane.b32.xlu0 %v12457_v31, %s9036_s23  ;;  %8375 = vrot.lane.b32.xlu1 %v7997_v8, %s9036_s23  ;;  %v8242_v42 = vpop.permute.xlu0 %8241  ;;  %v12459_v8 = vcombine.high %v11560_v37, %v11567_v53 }
 0x51a   : > { %v8549_v50 = vsel %vm8544_vm0, %v8540_v62, %v8242_v42 }
 0x51b   : > { %v8244_v57 = vpop.permute.xlu1 %8243 }
 0x51c   : > { %v8550_v7 = vsel %vm8544_vm0, %v8541_v30, %v8244_v57 }
 0x51d   : > { %8373 = vrot.lane.b32.xlu0 %v7861_v18, %s9036_s23  ;;  %8399 = vrot.lane.b32.xlu1 %v12458_v5, %s9037_s24  ;;  %v8266_v36 = vpop.permute.xlu0 %8265 }
 0x51e   : > { %v8554_v9 = vsel %vm8553_vm1, %v8545_v24, %v8266_v36 }
 0x51f   : > { %v8268_v13 = vpop.permute.xlu1 %8267 }
 0x520   : > { %v8555_v18 = vsel %vm8553_vm1, %v8546_v26, %v8268_v13 }
 0x521   : > { %8397 = vrot.lane.b32.xlu0 %v12459_v8, %s9037_s24  ;;  %8407 = vrot.lane.b32.xlu1 %v7998_v19, %s9037_s24  ;;  %v8274_v30 = vpop.permute.xlu0 %8273 }
 0x522   : > { %v8558_v23 = vsel %vm8553_vm1, %v8549_v50, %v8274_v30 }
 0x523   : > { %v8276_v49 = vpop.permute.xlu1 %8275 }
 0x524   : > { %v8559_v37 = vsel %vm8553_vm1, %v8550_v7, %v8276_v49 }
 0x525   : > { %8405 = vrot.lane.b32.xlu0 %v7862_v16, %s9037_s24  ;;  %8431 = vrot.lane.b32.xlu1 %v6911_v52, %s9038_s18  ;;  %v8298_v53 = vpop.permute.xlu0 %8297 }
 0x526   : > { %v11976_v46 = vsel %vm8562_vm2, %v8554_v9, %v8298_v53 }
 0x527   : > { %v8300_v11 = vpop.permute.xlu1 %8299 }
 0x528   : > { %v11979_v27 = vsel %vm8562_vm2, %v8555_v18, %v8300_v11 }
 0x529   : > { %8429 = vrot.lane.b32.xlu0 %v6775_v63, %s9038_s18  ;;  %8439 = vrot.lane.b32.xlu1 %v7999_v44, %s9038_s18  ;;  %v8306_v16 = vpop.permute.xlu0 %8305 }
 0x52a   : > { %v11990_v63 = vsel %vm8562_vm2, %v8558_v23, %v8306_v16 }
 0x52b   : > { %v8308_v58 = vpop.permute.xlu1 %8307 }
 0x52c   : > { %v11993_v19 = vsel %vm8562_vm2, %v8559_v37, %v8308_v58 }
 0x52d   : > { %8437 = vrot.lane.b32.xlu0 %v7863_v34, %s9038_s18  ;;  %8463 = vrot.lane.b32.xlu1 %v6912_v61, %s9039_s27  ;;  %v8330_v52 = vpop.permute.xlu0 %8329 }
 0x52e   : > { %v8572_v13 = vsel %vm8571_vm3, %v11976_v46, %v8330_v52 }
 0x52f   : > { %v8332_v44 = vpop.permute.xlu1 %8331 }
 0x530   : > { %v8573_v8 = vsel %vm8571_vm3, %v11979_v27, %v8332_v44 }
 0x531   : > { %8461 = vrot.lane.b32.xlu0 %v6776_v29, %s9039_s27  ;;  %8471 = vrot.lane.b32.xlu1 %v8000_v12, %s9039_s27  ;;  %v12007_v34 = vpop.permute.xlu0 %8337 }
 0x532   : > { %v8576_v46 = vsel %vm8571_vm3, %v11990_v63, %v12007_v34 }
 0x533   : > { %v12009_v62 = vpop.permute.xlu1 %8339 }
 0x534   : > { %v8577_v27 = vsel %vm8571_vm3, %v11993_v19, %v12009_v62 }
 0x535   : > { %8469 = vrot.lane.b32.xlu0 %v7864_v48, %s9039_s27  ;;  %v8110_v25 = vpop.permute.xlu0 %8109 }
 0x536   : > { %v8511_v61 = vsel %vm8508_vm12, %v8502_v1, %v8110_v25 }
 0x537   : > { %v8112_v60 = vpop.permute.xlu1 %8111 }
 0x538   : > { %v8512_v20 = vsel %vm8508_vm12, %v8503_v54, %v8112_v60 }
 0x539   : > { %v8118_v6 = vpop.permute.xlu0 %8117 }
 0x53a   : > { %v8515_v10 = vsel %vm8508_vm12, %v8506_v17, %v8118_v6 }
 0x53b   : > { %v8120_v29 = vpop.permute.xlu1 %8119 }
 0x53c   : > { %v8516_v43 = vsel %vm8508_vm12, %v8507_v45, %v8120_v29 }
 0x53d   : > { %v8142_v12 = vpop.permute.xlu0 %8141 }
 0x53e   : > { %v8520_v55 = vsel %vm8517_vm13, %v8511_v61, %v8142_v12 }
 0x53f   : > { %v8144_v0 = vpop.permute.xlu1 %8143 }
 0x540   : > { %v8521_v59 = vsel %vm8517_vm13, %v8512_v20, %v8144_v0 }
 0x541   : > { %v8150_v39 = vpop.permute.xlu0 %8149 }
 0x542   : > { %v8524_v48 = vsel %vm8517_vm13, %v8515_v10, %v8150_v39 }
 0x543   : > { %v8152_v35 = vpop.permute.xlu1 %8151 }
 0x544   : > { %v8525_v40 = vsel %vm8517_vm13, %v8516_v43, %v8152_v35 }
 0x545   : > { %v8174_v4 = vpop.permute.xlu0 %8173 }
 0x546   : > { %v8529_v28 = vsel %vm8526_vm14, %v8520_v55, %v8174_v4 }
 0x547   : > { %v8176_v3 = vpop.permute.xlu1 %8175 }
 0x548   : > { %v8530_v47 = vsel %vm8526_vm14, %v8521_v59, %v8176_v3 }
 0x549   : > { %v8182_v51 = vpop.permute.xlu0 %8181 }
 0x54a   : > { %v8533_v56 = vsel %vm8526_vm14, %v8524_v48, %v8182_v51 }
 0x54b   : > { %v8184_v32 = vpop.permute.xlu1 %8183 }
 0x54c   : > { %v8534_v38 = vsel %vm8526_vm14, %v8525_v40, %v8184_v32 }
 0x54d   : > { %v8206_v1 = vpop.permute.xlu0 %8205 }
 0x54e   : > { %v12028_v41 = vsel %vm8535_vm15, %v8529_v28, %v8206_v1 }
 0x54f   : > { %v8208_v54 = vpop.permute.xlu1 %8207 }
 0x550   : > { %v12031_v15 = vsel %vm8535_vm15, %v8530_v47, %v8208_v54 }
 0x551   : > { %v8214_v2 = vpop.permute.xlu0 %8213 }
 0x552   : > { %v12034_v17 = vsel %vm8535_vm15, %v8533_v56, %v8214_v2 }
 0x553   : > { %v8216_v22 = vpop.permute.xlu1 %8215 }
 0x554   : > { %v12037_v45 = vsel %vm8535_vm15, %v8534_v38, %v8216_v22 }
 0x555   : > { %v8362_v21 = vpop.permute.xlu0 %8361 }
 0x556   : > { %v8581_v9 = vsel %vm8580_vm4, %v8572_v13, %v8362_v21 }
 0x557   : > { %v8364_v33 = vpop.permute.xlu1 %8363 }
 0x558   : > { %v8582_v18 = vsel %vm8580_vm4, %v8573_v8, %v8364_v33 }
 0x559   : > { %v8370_v14 = vpop.permute.xlu0 %8369 }
 0x55a   : > { %v8585_v52 = vsel %vm8580_vm4, %v8576_v46, %v8370_v14 }
 0x55b   : > { %v8372_v31 = vpop.permute.xlu1 %8371 }
 0x55c   : > { %v8586_v44 = vsel %vm8580_vm4, %v8577_v27, %v8372_v31 }
 0x55d   : > { %v8394_v24 = vpop.permute.xlu0 %8393 }
 0x55e   : > { %v8590_v30 = vsel %vm8589_vm5, %v8581_v9, %v8394_v24 }
 0x55f   : > { %v8396_v26 = vpop.permute.xlu1 %8395 }
 0x560   : > { %v8591_v49 = vsel %vm8589_vm5, %v8582_v18, %v8396_v26 }
 0x561   : > { %v8402_v42 = vpop.permute.xlu0 %8401 }
 0x562   : > { %v8594_v63 = vsel %vm8589_vm5, %v8585_v52, %v8402_v42 }
 0x563   : > { %v8404_v57 = vpop.permute.xlu1 %8403 }
 0x564   : > { %v8595_v19 = vsel %vm8589_vm5, %v8586_v44, %v8404_v57 }
 0x565   : > { %v8426_v50 = vpop.permute.xlu0 %8425 }
 0x566   : > { %v8599_v23 = vsel %vm8598_vm6, %v8590_v30, %v8426_v50 }
 0x567   : > { %v8428_v7 = vpop.permute.xlu1 %8427 }
 0x568   : > { %v8600_v37 = vsel %vm8598_vm6, %v8591_v49, %v8428_v7 }
 0x569   : > { %v8434_v5 = vpop.permute.xlu0 %8433 }
 0x56a   : > { %v8603_v34 = vsel %vm8598_vm6, %v8594_v63, %v8434_v5 }
 0x56b   : > { %v8436_v36 = vpop.permute.xlu1 %8435 }
 0x56c   : > { %v8604_v62 = vsel %vm8598_vm6, %v8595_v19, %v8436_v36 }
 0x56d   : > { %v8458_v53 = vpop.permute.xlu0 %8457 }
 0x56e   : > { %v8608_v16 = vsel %vm8607_vm7, %v8599_v23, %v8458_v53 }
 0x56f   : > { %v8460_v11 = vpop.permute.xlu1 %8459  ;;  %8617 = vst.msk [vmem:[%s12060_s28] sm:$0xff] %vm8616_vm8, %v8608_v16 }
 0x570   : > { %v8609_v58 = vsel %vm8607_vm7, %v8600_v37, %v8460_v11 }
 0x571   : > { %8618 = vst.msk [vmem:[%s12060_s28 + $0x8] sm:$0xff] %vm8616_vm8, %v8609_v58  ;;  %v8466_v25 = vpop.permute.xlu0 %8465 }
 0x572   : > { %v8612_v61 = vsel %vm8607_vm7, %v8603_v34, %v8466_v25 }
 0x573   : > { %v8468_v60 = vpop.permute.xlu1 %8467  ;;  %8621 = vst.msk [vmem:[%s12060_s28 + $0x20] sm:$0xff] %vm8616_vm8, %v8612_v61 }
 0x574   : > { %v8613_v20 = vsel %vm8607_vm7, %v8604_v62, %v8468_v60 }
 0x575   : > { %8622 = vst.msk [vmem:[%s12060_s28 + $0x28] sm:$0xff] %vm8616_vm8, %v8613_v20  ;;  %v8238_v6 = vpop.permute.xlu0 %8237 }
 0x576   : > { %v8547_v14 = vsel %vm8544_vm0, %v12028_v41, %v8238_v6 }
 0x577   : > { %v8240_v29 = vpop.permute.xlu1 %8239 }
 0x578   : > { %v8548_v31 = vsel %vm8544_vm0, %v12031_v15, %v8240_v29 }
 0x579   : > { %v8246_v10 = vpop.permute.xlu0 %8245 }
 0x57a   : > { %v8551_v41 = vsel %vm8544_vm0, %v12034_v17, %v8246_v10 }
 0x57b   : > { %v8248_v43 = vpop.permute.xlu1 %8247 }
 0x57c   : > { %v8552_v15 = vsel %vm8544_vm0, %v12037_v45, %v8248_v43 }
 0x57d   : > { %v8270_v12 = vpop.permute.xlu0 %8269 }
 0x57e   : > { %v8556_v24 = vsel %vm8553_vm1, %v8547_v14, %v8270_v12 }
 0x57f   : > { %v8272_v0 = vpop.permute.xlu1 %8271 }
 0x580   : > { %v8557_v26 = vsel %vm8553_vm1, %v8548_v31, %v8272_v0 }
 0x581   : > { %v8278_v55 = vpop.permute.xlu0 %8277 }
 0x582   : > { %v8560_v9 = vsel %vm8553_vm1, %v8551_v41, %v8278_v55 }
 0x583   : > { %v8280_v59 = vpop.permute.xlu1 %8279 }
 0x584   : > { %v8561_v18 = vsel %vm8553_vm1, %v8552_v15, %v8280_v59 }
 0x585   : > { %v8302_v39 = vpop.permute.xlu0 %8301 }
 0x586   : > { %v8565_v42 = vsel %vm8562_vm2, %v8556_v24, %v8302_v39 }
 0x587   : > { %v8304_v35 = vpop.permute.xlu1 %8303 }
 0x588   : > { %v8566_v57 = vsel %vm8562_vm2, %v8557_v26, %v8304_v35 }
 0x589   : > { %v8310_v48 = vpop.permute.xlu0 %8309 }
 0x58a   : > { %v8569_v17 = vsel %vm8562_vm2, %v8560_v9, %v8310_v48 }
 0x58b   : > { %v8312_v40 = vpop.permute.xlu1 %8311 }
 0x58c   : > { %v8570_v45 = vsel %vm8562_vm2, %v8561_v18, %v8312_v40 }
 0x58d   : > { %v8334_v4 = vpop.permute.xlu0 %8333 }
 0x58e   : > { %v8574_v5 = vsel %vm8571_vm3, %v8565_v42, %v8334_v4 }
 0x58f   : > { %v8336_v3 = vpop.permute.xlu1 %8335 }
 0x590   : > { %v8575_v36 = vsel %vm8571_vm3, %v8566_v57, %v8336_v3 }
 0x591   : > { %v8342_v28 = vpop.permute.xlu0 %8341 }
 0x592   : > { %v8578_v46 = vsel %vm8571_vm3, %v8569_v17, %v8342_v28 }
 0x593   : > { %v8344_v47 = vpop.permute.xlu1 %8343 }
 0x594   : > { %v8579_v27 = vsel %vm8571_vm3, %v8570_v45, %v8344_v47 }
 0x595   : > { %v8366_v51 = vpop.permute.xlu0 %8365 }
 0x596   : > { %v8583_v13 = vsel %vm8580_vm4, %v8574_v5, %v8366_v51 }
 0x597   : > { %v8368_v32 = vpop.permute.xlu1 %8367 }
 0x598   : > { %v8584_v8 = vsel %vm8580_vm4, %v8575_v36, %v8368_v32 }
 0x599   : > { %v8374_v56 = vpop.permute.xlu0 %8373 }
 0x59a   : > { %v8587_v52 = vsel %vm8580_vm4, %v8578_v46, %v8374_v56 }
 0x59b   : > { %v8376_v38 = vpop.permute.xlu1 %8375 }
 0x59c   : > { %v8588_v44 = vsel %vm8580_vm4, %v8579_v27, %v8376_v38 }
 0x59d   : > { %v8398_v1 = vpop.permute.xlu0 %8397 }
 0x59e   : > { %v8592_v30 = vsel %vm8589_vm5, %v8583_v13, %v8398_v1 }
 0x59f   : > { %v8400_v54 = vpop.permute.xlu1 %8399 }
 0x5a0   : > { %v8593_v49 = vsel %vm8589_vm5, %v8584_v8, %v8400_v54 }
 0x5a1   : > { %v8406_v2 = vpop.permute.xlu0 %8405 }
 0x5a2   : > { %v8596_v63 = vsel %vm8589_vm5, %v8587_v52, %v8406_v2 }
 0x5a3   : > { %v8408_v22 = vpop.permute.xlu1 %8407 }
 0x5a4   : > { %v8597_v19 = vsel %vm8589_vm5, %v8588_v44, %v8408_v22 }
 0x5a5   : > { %v8430_v21 = vpop.permute.xlu0 %8429 }
 0x5a6   : > { %v8601_v23 = vsel %vm8598_vm6, %v8592_v30, %v8430_v21 }
 0x5a7   : > { %v8432_v33 = vpop.permute.xlu1 %8431 }
 0x5a8   : > { %v8602_v37 = vsel %vm8598_vm6, %v8593_v49, %v8432_v33 }
 0x5a9   : > { %v8438_v50 = vpop.permute.xlu0 %8437 }
 0x5aa   : > { %v8605_v34 = vsel %vm8598_vm6, %v8596_v63, %v8438_v50 }
 0x5ab   : > { %v8440_v7 = vpop.permute.xlu1 %8439 }
 0x5ac   : > { %v8606_v62 = vsel %vm8598_vm6, %v8597_v19, %v8440_v7 }
 0x5ad   : > { %v8462_v53 = vpop.permute.xlu0 %8461 }
 0x5ae   : > { %v8610_v16 = vsel %vm8607_vm7, %v8601_v23, %v8462_v53 }
 0x5af   : > { %v8464_v11 = vpop.permute.xlu1 %8463  ;;  %8619 = vst.msk [vmem:[%s12060_s28 + $0x10] sm:$0xff] %vm8616_vm8, %v8610_v16 }
 0x5b0   : > { %v8611_v58 = vsel %vm8607_vm7, %v8602_v37, %v8464_v11 }
 0x5b1   : > { %8620 = vst.msk [vmem:[%s12060_s28 + $0x18] sm:$0xff] %vm8616_vm8, %v8611_v58  ;;  %v8470_v25 = vpop.permute.xlu0 %8469 }
 0x5b2   : > { %v8614_v61 = vsel %vm8607_vm7, %v8605_v34, %v8470_v25 }
 0x5b3   : > { %v8472_v60 = vpop.permute.xlu1 %8471  ;;  %8623 = vst.msk [vmem:[%s12060_s28 + $0x30] sm:$0xff] %vm8616_vm8, %v8614_v61 }
 0x5b4   : > { %v8615_v20 = vsel %vm8607_vm7, %v8606_v62, %v8472_v60 }
 0x5b5   : > { %8624 = vst.msk [vmem:[%s12060_s28 + $0x38] sm:$0xff] %vm8616_vm8, %v8615_v20 }
 0x5b6   : > { %8934 = shalt.err (!%p8931_p3)
}
 0x5b7   : > { %s8935_s22 = scalar_lea.hbm %s12121_s7, 1024  ;;  %s8939_s18 = scalar_lea.hbm %s12178_s2, 2048 }
 0x5b8   : > { %p8936_p5 = scmp.ne.s32.totalorder %s12121_s7, %s8935_s22  ;;  %p8940_p4 = scmp.lt.s32.totalorder %s12121_s7, %s12178_s2 }
 0x5b9   : > { %p8941_p10 = scmp.lt.s32.totalorder %s8939_s18, %s8935_s22 }
 0x5ba   : > { %p8937_p7 = pnand %p8936_p5, %p9143_p0 }
 0x5bb   : > { %p8942_p9 = por %p8941_p10, %p8940_p4 }
 0x5bc   : > { %p8938_p6 = pneg %p8937_p7 }
 0x5be   : > { %p8943_p1 = pnand %p8942_p9, %p8938_p6 }
 0x5c0   : > { %8946 = shalt.err (!%p8943_p1)
}
 0x5c1   : > { %s9041_s28 = smov 128  }
 0x5c2   : > { %8765 = dma.vmem_to_hbm [thread:$0]  (%p9143_p0), %s12112_s29, 1024, %s12121_s7, %s8626_s17, %s9041_s28, %s9041_s28, %s9029_s21  }
 0x5c3 PF: > { %s8656_s4 = sand.u32 1, %s8985_s9   ;;  %p12460_p8 = scmp.ne.s32.totalorder %s12253_s20, 0 }
 0x5c4   : > { %p12461_p13 = scmp.ge.s32.totalorder %s9005_s14, 2  ;;  %s8657_s12 = scalar_lea.sflag [#allocation6], %s8656_s4 }
 0x5c6   : > { %p8776_p11 = pnand %p12461_p13, %p12460_p8 }
 0x5c8   : > { %p8777_p2 = pneg %p8776_p11 }
 0x5ca   : > { %8980 = dma.done.wait (%p8777_p2), %s8657_s12, 1024  }
 0x5cb   : > { %8982 = vsyncadd (%p8777_p2), %s8657_s12, 4294966272  ;;  %s19_s14 = sadd.s32 1, %s9005_s14   ;;  %s12462_s9 = smov %s8989_s10 }
 0x5cc   : > { %p16_p12 = scmp.ge.s32.totalorder %s19_s14, 4   ;;  %s12463_s10 = smov %s8993_s11 }
 0x5cd   : > { %s12464_s11 = smov %s9149_s5  ;;  %s12465_s12 = smov %s9001_s13 }
 0x5ce   : > { %s12466_s13 = smov %s12468_s25  ;;  %18 = sbr.rel (!%p16_p12) target bundleno = 7 (0x7), region = 82 }
 0x5d3   :  { %8662 = vsyncpa [#allocation5], 1 }
 0x5d4   :  { %8664 = vsyncpa [#allocation5 + $0x1], 1 }
 0x5d5   :  { %8665 = vsyncpa [#allocation8], 1 }
 0x5d6   :  { %8666 = vsyncpa [#allocation6], 1 }
 0x5d7   :  { %8668 = vsyncpa [#allocation6 + $0x1], 1 }

</bundles_post_ra>
